<compile_context>
chip_gen: v7x
topology: tpu7x:2x2x1
jax: 0.10.0
libtpu: 0.0.40
codegen_flags: <defaults>
</compile_context>

<pallas_src>
import functools

import jax
import jax.numpy as jnp
from jax.experimental import pallas as pl
from jax.experimental.pallas import tpu as pltpu


# ----------------------------------------------------------------------------
# Pallas kernel
# ----------------------------------------------------------------------------
def _transformer_block_kernel(
    x_ref,        # (1, S, D) f32
    ln1_ref,      # (1, D)    f32
    ln2_ref,      # (1, D)    f32
    wq_ref,       # (D, D)    bf16, (in, out), per-head de-interleaved outputs
    wk_ref,       # (D, D)    bf16, (in, out), per-head de-interleaved outputs
    wv_ref,       # (D, D)    bf16, (in, out)
    wo_ref,       # (D, D)    bf16, (in, out)
    w1_ref,       # (D, F)    bf16, (in, out)
    w2_ref,       # (F, D)    bf16, (in, out)
    w3_ref,       # (D, F)    bf16, (in, out)
    cos_ref,      # (S, d_k/2) f32 RoPE cos table
    sin_ref,      # (S, d_k/2) f32 RoPE sin table
    out_ref,      # (1, S, D) f32
    attn_ref,     # (S, D)    f32 VMEM scratch: per-head attention outputs
    *,
    num_heads: int,
    d_k: int,
    eps: float,
):
    x = x_ref[0]                                   # (S, D) f32
    S, D = x.shape
    dk2 = d_k // 2
    inv_d = jnp.float32(1.0 / D)

    def rmsnorm(v, w):
        ms = jnp.sum(v * v, axis=-1, keepdims=True) * inv_d
        return (v * w) * jax.lax.rsqrt(ms + eps)   # rsqrt -> EUP, no divide

    # ---- ln1 -> QKV projections (weights already (in, out): plain MXU matmuls) ----
    h1 = rmsnorm(x, ln1_ref[...]).astype(jnp.bfloat16)
    q = jnp.dot(h1, wq_ref[...], preferred_element_type=jnp.float32)   # (S, D) f32
    k = jnp.dot(h1, wk_ref[...], preferred_element_type=jnp.float32)
    v = jnp.dot(h1, wv_ref[...], preferred_element_type=jnp.float32)

    cos = cos_ref[...]                              # (S, dk2)
    sin = sin_ref[...]

    scale = float(d_k) ** -0.5
    row = jax.lax.broadcasted_iota(jnp.int32, (S, S), 0)
    col = jax.lax.broadcasted_iota(jnp.int32, (S, S), 1)
    causal = col <= row
    mask_val = jnp.float32(-1e30)                   # finite; diagonal is never masked

    def rope(t_even, t_odd):
        # de-interleaved per-head layout: first half = even pair elems, second = odd
        return jnp.concatenate(
            [t_even * cos - t_odd * sin, t_even * sin + t_odd * cos],
            axis=-1).astype(jnp.bfloat16)

    # ---- causal attention per head; outputs written straight into the scratch slab ----
    for h in range(num_heads):
        lo = h * d_k
        qh = rope(q[:, lo:lo + dk2], q[:, lo + dk2:lo + d_k])      # (S, d_k) bf16
        kh = rope(k[:, lo:lo + dk2], k[:, lo + dk2:lo + d_k])
        vh = v[:, lo:lo + d_k].astype(jnp.bfloat16)

        scores = jax.lax.dot_general(
            qh, kh, (((1,), (1,)), ((), ())),
            preferred_element_type=jnp.float32) * scale            # (S, S) f32
        scores = jnp.where(causal, scores, mask_val)
        m = jnp.max(scores, axis=-1, keepdims=True)
        e = jnp.exp(scores - m)
        p = e * pl.reciprocal(jnp.sum(e, axis=-1, keepdims=True), approx=True)
        attn_ref[:, lo:lo + d_k] = jnp.dot(
            p.astype(jnp.bfloat16), vh, preferred_element_type=jnp.float32)

    # ---- output projection (single full-D contraction) + residual ----
    o = jnp.dot(attn_ref[...].astype(jnp.bfloat16), wo_ref[...],
                preferred_element_type=jnp.float32)                # (S, D) f32
    y = x + o

    # ---- ln2 + SwiGLU FFN + residual ----
    h2 = rmsnorm(y, ln2_ref[...]).astype(jnp.bfloat16)
    a1 = jnp.dot(h2, w1_ref[...], preferred_element_type=jnp.float32)   # (S, F)
    a3 = jnp.dot(h2, w3_ref[...], preferred_element_type=jnp.float32)
    gate = (a1 * jax.nn.sigmoid(a1) * a3).astype(jnp.bfloat16)
    ff = jnp.dot(gate, w2_ref[...], preferred_element_type=jnp.float32)  # (S, D)

    out_ref[0] = y + ff


# ----------------------------------------------------------------------------
# Wrapper
# ----------------------------------------------------------------------------
def transformer_block(x, params, *, num_heads, theta, eps=1e-5):
    B, S, D = x.shape
    d_k = D // num_heads
    dk2 = d_k // 2
    F = params["w1"].shape[0]

    # RoPE tables (token_positions = arange(S), matching the module's forward)
    pos = jnp.arange(S, dtype=jnp.float32)
    inv_freq = 1.0 / (theta ** (jnp.arange(0, d_k, 2, dtype=jnp.float32) / d_k))
    ang = pos[:, None] * inv_freq[None, :]                      # (S, dk2)
    cos_t = jnp.cos(ang)
    sin_t = jnp.sin(ang)

    # Per-head de-interleave permutation of Q/K output features so the in-kernel RoPE is
    # a rotate-half of static slices (no lane-pair swap).  Attention scores are invariant
    # to this permutation since Q and K share it; V / Wo stay in the original layout.
    head_perm = jnp.concatenate([jnp.arange(0, d_k, 2), jnp.arange(1, d_k, 2)])
    perm = (jnp.arange(num_heads)[:, None] * d_k + head_perm[None, :]).reshape(-1)

    bf16 = jnp.bfloat16
    wq_t = params["wq"][perm, :].T.astype(bf16)     # (D, D)  (in, out), de-interleaved
    wk_t = params["wk"][perm, :].T.astype(bf16)
    wv_t = params["wv"].T.astype(bf16)              # (D, D)
    wo_t = params["wo"].T.astype(bf16)              # (D, D)
    w1_t = params["w1"].T.astype(bf16)              # (D, F)
    w2_t = params["w2"].T.astype(bf16)              # (F, D)
    w3_t = params["w3"].T.astype(bf16)              # (D, F)
    ln1 = params["ln1"].astype(jnp.float32)
    ln2 = params["ln2"].astype(jnp.float32)

    kernel = functools.partial(
        _transformer_block_kernel, num_heads=num_heads, d_k=d_k, eps=eps)

    def build(single_buffer_invariants):
        def inv(shape):
            index_map = lambda b: (0,) * len(shape)
            if single_buffer_invariants:
                # Grid-invariant input: constant index_map means it is never re-fetched,
                # so one VMEM buffer suffices (halves the invariant-input footprint).
                return pl.BlockSpec(shape, index_map, pipeline_mode=pl.Buffered(1))
            return pl.BlockSpec(shape, index_map)

        return pl.pallas_call(
            kernel,
            out_shape=jax.ShapeDtypeStruct((B, S, D), jnp.float32),
            grid=(B,),
            in_specs=[
                pl.BlockSpec((1, S, D), lambda b: (b, 0, 0)),   # x (per-batch slab)
                inv((1, D)), inv((1, D)),                       # ln1, ln2
                inv((D, D)), inv((D, D)), inv((D, D)), inv((D, D)),  # wq, wk, wv, wo
                inv((D, F)), inv((F, D)), inv((D, F)),          # w1, w2, w3
                inv((S, dk2)), inv((S, dk2)),                   # cos, sin tables
            ],
            out_specs=pl.BlockSpec((1, S, D), lambda b: (b, 0, 0)),
            scratch_shapes=[pltpu.VMEM((S, D), jnp.float32)],   # attention output slab
            compiler_params=pltpu.CompilerParams(
                dimension_semantics=("parallel",),
                vmem_limit_bytes=48 * 1024 * 1024),
        )

    args = (x.astype(jnp.float32), ln1, ln2, wq_t, wk_t, wv_t, wo_t,
            w1_t, w2_t, w3_t, cos_t, sin_t)
    try:
        return build(True)(*args)
    except Exception:
        # Fallback if pl.Buffered(1) single-buffering is unsupported by this jax build;
        # identical kernel, default (double) buffering.  Any real kernel error still
        # surfaces here since the same kernel is re-run.
        return build(False)(*args)


# ----------------------------------------------------------------------------
# Pure-JAX reference (mirrors the PyTorch module, f32)
# ----------------------------------------------------------------------------
def _rmsnorm_ref(v, w, eps):
    ms = jnp.mean(v * v, axis=-1, keepdims=True)
    return v * w / jnp.sqrt(ms + eps)


def _rope_ref(t, theta):            # t: (B, H, S, d_k)
    d_k = t.shape[-1]
    pos = jnp.arange(t.shape[-2], dtype=jnp.float32)
    denom = 1.0 / (theta ** (jnp.arange(0, d_k, 2, dtype=jnp.float32) / d_k))
    ang = pos[:, None] * denom[None, :]
    cos, sin = jnp.cos(ang), jnp.sin(ang)
    te, to = t[..., 0::2], t[..., 1::2]
    oe = te * cos - to * sin
    oo = te * sin + to * cos
    return jnp.stack([oe, oo], axis=-1).reshape(t.shape)


def transformer_block_ref(x, p, *, num_heads, theta, eps=1e-5):
    B, S, D = x.shape
    d_k = D // num_heads
    h1 = _rmsnorm_ref(x, p["ln1"].reshape(-1), eps)
    q = h1 @ p["wq"].T
    k = h1 @ p["wk"].T
    v = h1 @ p["wv"].T
    split = lambda t: t.reshape(B, S, num_heads, d_k).transpose(0, 2, 1, 3)
    q, k, v = split(q), split(k), split(v)
    q, k = _rope_ref(q, theta), _rope_ref(k, theta)
    scores = jnp.einsum("bhqd,bhkd->bhqk", q, k) * d_k ** -0.5
    mask = jnp.tril(jnp.ones((S, S), bool))
    scores = jnp.where(mask, scores, -jnp.inf)
    probs = jax.nn.softmax(scores, axis=-1)
    o = jnp.einsum("bhqk,bhkd->bhqd", probs, v)
    o = o.transpose(0, 2, 1, 3).reshape(B, S, D)
    y = x + o @ p["wo"].T
    h2 = _rmsnorm_ref(y, p["ln2"].reshape(-1), eps)
    a1 = h2 @ p["w1"].T
    a3 = h2 @ p["w3"].T
    ff = (a1 * jax.nn.sigmoid(a1) * a3) @ p["w2"].T
    return y + ff


# ----------------------------------------------------------------------------
# Main
# ----------------------------------------------------------------------------
if __name__ == "__main__":
    # D = 128 -> lane-dense output blocks (full 128-lane vregs), d_k = 32 per head.
    B, S, D, H, F = 2, 16, 128, 4, 256
    THETA = 10000.0

    key = jax.random.PRNGKey(0)
    kx, kq, kk, kv, ko, k1, k2, k3 = jax.random.split(key, 8)

    def linear_w(k, out_f, in_f):
        sigma = 2.0 / (in_f + out_f) ** 0.5
        return sigma * jax.random.truncated_normal(
            k, -3.0, 3.0, (out_f, in_f), jnp.float32)

    params = {
        "ln1": jnp.ones((1, D), jnp.float32),
        "ln2": jnp.ones((1, D), jnp.float32),
        "wq": linear_w(kq, D, D),
        "wk": linear_w(kk, D, D),
        "wv": linear_w(kv, D, D),
        "wo": linear_w(ko, D, D),
        "w1": linear_w(k1, F, D),
        "w2": linear_w(k2, D, F),
        "w3": linear_w(k3, F, D),
    }

    x = jax.random.normal(kx, (B, S, D), jnp.float32)

    out = transformer_block(x, params, num_heads=H, theta=THETA)
    out = jax.block_until_ready(out)

    ref = transformer_block_ref(x, params, num_heads=H, theta=THETA)
    assert out.shape == (B, S, D)
    assert bool(jnp.all(jnp.isfinite(out)))
    # Kernel uses bf16 matmul operands (f32 accumulation) vs. a full-f32 reference, so
    # compare with a scale-normalized max-abs error rather than tight elementwise atol.
    err = float(jnp.max(jnp.abs(out - ref)) / jnp.max(jnp.abs(ref)))
    assert err < 3e-2, f"kernel/ref mismatch: normalized max abs err = {err:.4f}"

    print("KERNEL_OK")
</pallas_src>

<mosaic_0001>
module attributes {stable_mosaic.version = 11 : i64} {
  func.func @_transformer_block_kernel(%arg0: i32, %arg1: memref<1x16x128xf32, #tpu.memory_space<vmem>>, %arg2: memref<1x128xf32, #tpu.memory_space<vmem>>, %arg3: memref<1x128xf32, #tpu.memory_space<vmem>>, %arg4: memref<128x128xbf16, #tpu.memory_space<vmem>>, %arg5: memref<128x128xbf16, #tpu.memory_space<vmem>>, %arg6: memref<128x128xbf16, #tpu.memory_space<vmem>>, %arg7: memref<128x128xbf16, #tpu.memory_space<vmem>>, %arg8: memref<128x256xbf16, #tpu.memory_space<vmem>>, %arg9: memref<256x128xbf16, #tpu.memory_space<vmem>>, %arg10: memref<128x256xbf16, #tpu.memory_space<vmem>>, %arg11: memref<16x16xf32, #tpu.memory_space<vmem>>, %arg12: memref<16x16xf32, #tpu.memory_space<vmem>>, %arg13: memref<1x16x128xf32, #tpu.memory_space<vmem>>, %arg14: memref<16x128xf32, #tpu.memory_space<vmem>>) attributes {dimension_semantics = [#tpu.dimension_semantics<parallel>], iteration_bounds = array<i64: 2>, scalar_prefetch = 0 : i64, scratch_operands = 1 : i64, tpu.core_type = #tpu.core_type<tc>, window_params = [{transform_indices = @transform_0, window_bounds = array<i64: 1, 16, 128>}, {pipeline_mode = #tpu.pipeline_mode<synchronous>, transform_indices = @transform_1, window_bounds = array<i64: 1, 128>}, {pipeline_mode = #tpu.pipeline_mode<synchronous>, transform_indices = @transform_2, window_bounds = array<i64: 1, 128>}, {pipeline_mode = #tpu.pipeline_mode<synchronous>, transform_indices = @transform_3, window_bounds = array<i64: 128, 128>}, {pipeline_mode = #tpu.pipeline_mode<synchronous>, transform_indices = @transform_4, window_bounds = array<i64: 128, 128>}, {pipeline_mode = #tpu.pipeline_mode<synchronous>, transform_indices = @transform_5, window_bounds = array<i64: 128, 128>}, {pipeline_mode = #tpu.pipeline_mode<synchronous>, transform_indices = @transform_6, window_bounds = array<i64: 128, 128>}, {pipeline_mode = #tpu.pipeline_mode<synchronous>, transform_indices = @transform_7, window_bounds = array<i64: 128, 256>}, {pipeline_mode = #tpu.pipeline_mode<synchronous>, transform_indices = @transform_8, window_bounds = array<i64: 256, 128>}, {pipeline_mode = #tpu.pipeline_mode<synchronous>, transform_indices = @transform_9, window_bounds = array<i64: 128, 256>}, {pipeline_mode = #tpu.pipeline_mode<synchronous>, transform_indices = @transform_10, window_bounds = array<i64: 16, 16>}, {pipeline_mode = #tpu.pipeline_mode<synchronous>, transform_indices = @transform_11, window_bounds = array<i64: 16, 16>}, {transform_indices = @transform_12, window_bounds = array<i64: 1, 16, 128>}]} {
    %c0 = arith.constant 0 : index
    %c0_0 = arith.constant 0 : index
    %c0_1 = arith.constant 0 : index
    %0 = vector.load %arg1[%c0, %c0_0, %c0_1] : memref<1x16x128xf32, #tpu.memory_space<vmem>>, vector<1x16x128xf32>
    %1 = vector.shape_cast %0 : vector<1x16x128xf32> to vector<16x128xf32>
    %c0_2 = arith.constant 0 : index
    %c0_3 = arith.constant 0 : index
    %2 = vector.load %arg2[%c0_2, %c0_3] : memref<1x128xf32, #tpu.memory_space<vmem>>, vector<1x128xf32>
    %3 = arith.mulf %1, %1 : vector<16x128xf32>
    %cst = arith.constant dense<0.000000e+00> : vector<16xf32>
    %4 = vector.multi_reduction <add>, %3, %cst [1] : vector<16x128xf32> to vector<16xf32>
    %5 = vector.shape_cast %4 : vector<16xf32> to vector<16x1xf32>
    %cst_4 = arith.constant 7.812500e-03 : f32
    %6 = vector.broadcast %cst_4 : f32 to vector<16x1xf32>
    %7 = arith.mulf %5, %6 : vector<16x1xf32>
    %8 = vector.broadcast %2 : vector<1x128xf32> to vector<16x128xf32>
    %9 = arith.mulf %1, %8 : vector<16x128xf32>
    %cst_5 = arith.constant 9.99999974E-6 : f32
    %10 = vector.broadcast %cst_5 : f32 to vector<16x1xf32>
    %11 = arith.addf %7, %10 : vector<16x1xf32>
    %12 = math.rsqrt %11 : vector<16x1xf32>
    %13 = vector.broadcast %12 : vector<16x1xf32> to vector<16x128xf32>
    %14 = arith.mulf %9, %13 : vector<16x128xf32>
    %15 = arith.truncf %14 : vector<16x128xf32> to vector<16x128xbf16>
    %c0_6 = arith.constant 0 : index
    %c0_7 = arith.constant 0 : index
    %16 = vector.load %arg4[%c0_6, %c0_7] : memref<128x128xbf16, #tpu.memory_space<vmem>>, vector<128x128xbf16>
    %cst_8 = arith.constant dense<0.000000e+00> : vector<16x128xf32>
    %17 = tpu.matmul %15, %16, %cst_8 {dimension_numbers = #tpu.dot_dimension_numbers<[1], [0], [0], [1], [0, 0, 1, 1], [], []>} : vector<16x128xbf16>, vector<128x128xbf16>, vector<16x128xf32> -> vector<16x128xf32>
    %c0_9 = arith.constant 0 : index
    %c0_10 = arith.constant 0 : index
    %18 = vector.load %arg5[%c0_9, %c0_10] : memref<128x128xbf16, #tpu.memory_space<vmem>>, vector<128x128xbf16>
    %cst_11 = arith.constant dense<0.000000e+00> : vector<16x128xf32>
    %19 = tpu.matmul %15, %18, %cst_11 {dimension_numbers = #tpu.dot_dimension_numbers<[1], [0], [0], [1], [0, 0, 1, 1], [], []>} : vector<16x128xbf16>, vector<128x128xbf16>, vector<16x128xf32> -> vector<16x128xf32>
    %c0_12 = arith.constant 0 : index
    %c0_13 = arith.constant 0 : index
    %20 = vector.load %arg6[%c0_12, %c0_13] : memref<128x128xbf16, #tpu.memory_space<vmem>>, vector<128x128xbf16>
    %cst_14 = arith.constant dense<0.000000e+00> : vector<16x128xf32>
    %21 = tpu.matmul %15, %20, %cst_14 {dimension_numbers = #tpu.dot_dimension_numbers<[1], [0], [0], [1], [0, 0, 1, 1], [], []>} : vector<16x128xbf16>, vector<128x128xbf16>, vector<16x128xf32> -> vector<16x128xf32>
    %c0_15 = arith.constant 0 : index
    %c0_16 = arith.constant 0 : index
    %22 = vector.load %arg11[%c0_15, %c0_16] : memref<16x16xf32, #tpu.memory_space<vmem>>, vector<16x16xf32>
    %c0_17 = arith.constant 0 : index
    %c0_18 = arith.constant 0 : index
    %23 = vector.load %arg12[%c0_17, %c0_18] : memref<16x16xf32, #tpu.memory_space<vmem>>, vector<16x16xf32>
    %24 = tpu.iota {dimensions = array<i32: 0>} : vector<16x16xi32>
    %25 = tpu.iota {dimensions = array<i32: 1>} : vector<16x16xi32>
    %26 = arith.cmpi sle, %25, %24 : vector<16x16xi32>
    %27 = vector.extract_strided_slice %17 {offsets = [0, 0], sizes = [16, 16], strides = [1, 1]} : vector<16x128xf32> to vector<16x16xf32>
    %28 = vector.extract_strided_slice %17 {offsets = [0, 16], sizes = [16, 16], strides = [1, 1]} : vector<16x128xf32> to vector<16x16xf32>
    %29 = arith.mulf %27, %22 : vector<16x16xf32>
    %30 = arith.mulf %28, %23 : vector<16x16xf32>
    %31 = arith.subf %29, %30 : vector<16x16xf32>
    %32 = arith.mulf %27, %23 : vector<16x16xf32>
    %33 = arith.mulf %28, %22 : vector<16x16xf32>
    %34 = arith.addf %32, %33 : vector<16x16xf32>
    %35 = tpu.concatenate %31, %34 in 1 : vector<16x16xf32>, vector<16x16xf32> -> vector<16x32xf32>
    %36 = arith.truncf %35 : vector<16x32xf32> to vector<16x32xbf16>
    %37 = vector.extract_strided_slice %19 {offsets = [0, 0], sizes = [16, 16], strides = [1, 1]} : vector<16x128xf32> to vector<16x16xf32>
    %38 = vector.extract_strided_slice %19 {offsets = [0, 16], sizes = [16, 16], strides = [1, 1]} : vector<16x128xf32> to vector<16x16xf32>
    %39 = arith.mulf %37, %22 : vector<16x16xf32>
    %40 = arith.mulf %38, %23 : vector<16x16xf32>
    %41 = arith.subf %39, %40 : vector<16x16xf32>
    %42 = arith.mulf %37, %23 : vector<16x16xf32>
    %43 = arith.mulf %38, %22 : vector<16x16xf32>
    %44 = arith.addf %42, %43 : vector<16x16xf32>
    %45 = tpu.concatenate %41, %44 in 1 : vector<16x16xf32>, vector<16x16xf32> -> vector<16x32xf32>
    %46 = arith.truncf %45 : vector<16x32xf32> to vector<16x32xbf16>
    %47 = vector.extract_strided_slice %21 {offsets = [0, 0], sizes = [16, 32], strides = [1, 1]} : vector<16x128xf32> to vector<16x32xf32>
    %48 = arith.truncf %47 : vector<16x32xf32> to vector<16x32xbf16>
    %cst_19 = arith.constant dense<0.000000e+00> : vector<16x16xf32>
    %49 = tpu.matmul %36, %46, %cst_19 {dimension_numbers = #tpu.dot_dimension_numbers<[1], [1], [0], [0], [0, 0, 1, 0], [], []>} : vector<16x32xbf16>, vector<16x32xbf16>, vector<16x16xf32> -> vector<16x16xf32>
    %cst_20 = arith.constant 0.176776692 : f32
    %50 = vector.broadcast %cst_20 : f32 to vector<16x16xf32>
    %51 = arith.mulf %49, %50 : vector<16x16xf32>
    %cst_21 = arith.constant -1.000000e+30 : f32
    %52 = vector.broadcast %cst_21 : f32 to vector<16x16xf32>
    %53 = arith.select %26, %51, %52 : vector<16x16xi1>, vector<16x16xf32>
    %cst_22 = arith.constant dense<0xFF800000> : vector<16xf32>
    %54 = vector.multi_reduction <maximumf>, %53, %cst_22 [1] : vector<16x16xf32> to vector<16xf32>
    %55 = vector.shape_cast %54 : vector<16xf32> to vector<16x1xf32>
    %56 = vector.broadcast %55 : vector<16x1xf32> to vector<16x16xf32>
    %57 = arith.subf %53, %56 : vector<16x16xf32>
    %58 = math.exp %57 : vector<16x16xf32>
    %cst_23 = arith.constant dense<0.000000e+00> : vector<16xf32>
    %59 = vector.multi_reduction <add>, %58, %cst_23 [1] : vector<16x16xf32> to vector<16xf32>
    %60 = vector.shape_cast %59 : vector<16xf32> to vector<16x1xf32>
    %61 = tpu.reciprocal %60 {approx = true} : vector<16x1xf32> -> vector<16x1xf32>
    %62 = vector.broadcast %61 : vector<16x1xf32> to vector<16x16xf32>
    %63 = arith.mulf %58, %62 : vector<16x16xf32>
    %64 = arith.truncf %63 : vector<16x16xf32> to vector<16x16xbf16>
    %cst_24 = arith.constant dense<0.000000e+00> : vector<16x32xf32>
    %65 = tpu.matmul %64, %48, %cst_24 {dimension_numbers = #tpu.dot_dimension_numbers<[1], [0], [0], [1], [0, 0, 1, 1], [], []>} : vector<16x16xbf16>, vector<16x32xbf16>, vector<16x32xf32> -> vector<16x32xf32>
    %c0_25 = arith.constant 0 : index
    %c0_26 = arith.constant 0 : index
    %66 = vector.load %arg14[%c0_25, %c0_26] : memref<16x128xf32, #tpu.memory_space<vmem>>, vector<16x32xf32>
    tpu.vector_store %arg14[%c0_25, %c0_26], %65 {strides = array<i32>} : memref<16x128xf32, #tpu.memory_space<vmem>>, vector<16x32xf32>,
    %67 = vector.extract_strided_slice %17 {offsets = [0, 32], sizes = [16, 16], strides = [1, 1]} : vector<16x128xf32> to vector<16x16xf32>
    %68 = vector.extract_strided_slice %17 {offsets = [0, 48], sizes = [16, 16], strides = [1, 1]} : vector<16x128xf32> to vector<16x16xf32>
    %69 = arith.mulf %67, %22 : vector<16x16xf32>
    %70 = arith.mulf %68, %23 : vector<16x16xf32>
    %71 = arith.subf %69, %70 : vector<16x16xf32>
    %72 = arith.mulf %67, %23 : vector<16x16xf32>
    %73 = arith.mulf %68, %22 : vector<16x16xf32>
    %74 = arith.addf %72, %73 : vector<16x16xf32>
    %75 = tpu.concatenate %71, %74 in 1 : vector<16x16xf32>, vector<16x16xf32> -> vector<16x32xf32>
    %76 = arith.truncf %75 : vector<16x32xf32> to vector<16x32xbf16>
    %77 = vector.extract_strided_slice %19 {offsets = [0, 32], sizes = [16, 16], strides = [1, 1]} : vector<16x128xf32> to vector<16x16xf32>
    %78 = vector.extract_strided_slice %19 {offsets = [0, 48], sizes = [16, 16], strides = [1, 1]} : vector<16x128xf32> to vector<16x16xf32>
    %79 = arith.mulf %77, %22 : vector<16x16xf32>
    %80 = arith.mulf %78, %23 : vector<16x16xf32>
    %81 = arith.subf %79, %80 : vector<16x16xf32>
    %82 = arith.mulf %77, %23 : vector<16x16xf32>
    %83 = arith.mulf %78, %22 : vector<16x16xf32>
    %84 = arith.addf %82, %83 : vector<16x16xf32>
    %85 = tpu.concatenate %81, %84 in 1 : vector<16x16xf32>, vector<16x16xf32> -> vector<16x32xf32>
    %86 = arith.truncf %85 : vector<16x32xf32> to vector<16x32xbf16>
    %87 = vector.extract_strided_slice %21 {offsets = [0, 32], sizes = [16, 32], strides = [1, 1]} : vector<16x128xf32> to vector<16x32xf32>
    %88 = arith.truncf %87 : vector<16x32xf32> to vector<16x32xbf16>
    %cst_27 = arith.constant dense<0.000000e+00> : vector<16x16xf32>
    %89 = tpu.matmul %76, %86, %cst_27 {dimension_numbers = #tpu.dot_dimension_numbers<[1], [1], [0], [0], [0, 0, 1, 0], [], []>} : vector<16x32xbf16>, vector<16x32xbf16>, vector<16x16xf32> -> vector<16x16xf32>
    %cst_28 = arith.constant 0.176776692 : f32
    %90 = vector.broadcast %cst_28 : f32 to vector<16x16xf32>
    %91 = arith.mulf %89, %90 : vector<16x16xf32>
    %cst_29 = arith.constant -1.000000e+30 : f32
    %92 = vector.broadcast %cst_29 : f32 to vector<16x16xf32>
    %93 = arith.select %26, %91, %92 : vector<16x16xi1>, vector<16x16xf32>
    %cst_30 = arith.constant dense<0xFF800000> : vector<16xf32>
    %94 = vector.multi_reduction <maximumf>, %93, %cst_30 [1] : vector<16x16xf32> to vector<16xf32>
    %95 = vector.shape_cast %94 : vector<16xf32> to vector<16x1xf32>
    %96 = vector.broadcast %95 : vector<16x1xf32> to vector<16x16xf32>
    %97 = arith.subf %93, %96 : vector<16x16xf32>
    %98 = math.exp %97 : vector<16x16xf32>
    %cst_31 = arith.constant dense<0.000000e+00> : vector<16xf32>
    %99 = vector.multi_reduction <add>, %98, %cst_31 [1] : vector<16x16xf32> to vector<16xf32>
    %100 = vector.shape_cast %99 : vector<16xf32> to vector<16x1xf32>
    %101 = tpu.reciprocal %100 {approx = true} : vector<16x1xf32> -> vector<16x1xf32>
    %102 = vector.broadcast %101 : vector<16x1xf32> to vector<16x16xf32>
    %103 = arith.mulf %98, %102 : vector<16x16xf32>
    %104 = arith.truncf %103 : vector<16x16xf32> to vector<16x16xbf16>
    %cst_32 = arith.constant dense<0.000000e+00> : vector<16x32xf32>
    %105 = tpu.matmul %104, %88, %cst_32 {dimension_numbers = #tpu.dot_dimension_numbers<[1], [0], [0], [1], [0, 0, 1, 1], [], []>} : vector<16x16xbf16>, vector<16x32xbf16>, vector<16x32xf32> -> vector<16x32xf32>
    %c0_33 = arith.constant 0 : index
    %c32 = arith.constant 32 : index
    %106 = vector.load %arg14[%c0_33, %c32] : memref<16x128xf32, #tpu.memory_space<vmem>>, vector<16x32xf32>
    tpu.vector_store %arg14[%c0_33, %c32], %105 {strides = array<i32>} : memref<16x128xf32, #tpu.memory_space<vmem>>, vector<16x32xf32>,
    %107 = vector.extract_strided_slice %17 {offsets = [0, 64], sizes = [16, 16], strides = [1, 1]} : vector<16x128xf32> to vector<16x16xf32>
    %108 = vector.extract_strided_slice %17 {offsets = [0, 80], sizes = [16, 16], strides = [1, 1]} : vector<16x128xf32> to vector<16x16xf32>
    %109 = arith.mulf %107, %22 : vector<16x16xf32>
    %110 = arith.mulf %108, %23 : vector<16x16xf32>
    %111 = arith.subf %109, %110 : vector<16x16xf32>
    %112 = arith.mulf %107, %23 : vector<16x16xf32>
    %113 = arith.mulf %108, %22 : vector<16x16xf32>
    %114 = arith.addf %112, %113 : vector<16x16xf32>
    %115 = tpu.concatenate %111, %114 in 1 : vector<16x16xf32>, vector<16x16xf32> -> vector<16x32xf32>
    %116 = arith.truncf %115 : vector<16x32xf32> to vector<16x32xbf16>
    %117 = vector.extract_strided_slice %19 {offsets = [0, 64], sizes = [16, 16], strides = [1, 1]} : vector<16x128xf32> to vector<16x16xf32>
    %118 = vector.extract_strided_slice %19 {offsets = [0, 80], sizes = [16, 16], strides = [1, 1]} : vector<16x128xf32> to vector<16x16xf32>
    %119 = arith.mulf %117, %22 : vector<16x16xf32>
    %120 = arith.mulf %118, %23 : vector<16x16xf32>
    %121 = arith.subf %119, %120 : vector<16x16xf32>
    %122 = arith.mulf %117, %23 : vector<16x16xf32>
    %123 = arith.mulf %118, %22 : vector<16x16xf32>
    %124 = arith.addf %122, %123 : vector<16x16xf32>
    %125 = tpu.concatenate %121, %124 in 1 : vector<16x16xf32>, vector<16x16xf32> -> vector<16x32xf32>
    %126 = arith.truncf %125 : vector<16x32xf32> to vector<16x32xbf16>
    %127 = vector.extract_strided_slice %21 {offsets = [0, 64], sizes = [16, 32], strides = [1, 1]} : vector<16x128xf32> to vector<16x32xf32>
    %128 = arith.truncf %127 : vector<16x32xf32> to vector<16x32xbf16>
    %cst_34 = arith.constant dense<0.000000e+00> : vector<16x16xf32>
    %129 = tpu.matmul %116, %126, %cst_34 {dimension_numbers = #tpu.dot_dimension_numbers<[1], [1], [0], [0], [0, 0, 1, 0], [], []>} : vector<16x32xbf16>, vector<16x32xbf16>, vector<16x16xf32> -> vector<16x16xf32>
    %cst_35 = arith.constant 0.176776692 : f32
    %130 = vector.broadcast %cst_35 : f32 to vector<16x16xf32>
    %131 = arith.mulf %129, %130 : vector<16x16xf32>
    %cst_36 = arith.constant -1.000000e+30 : f32
    %132 = vector.broadcast %cst_36 : f32 to vector<16x16xf32>
    %133 = arith.select %26, %131, %132 : vector<16x16xi1>, vector<16x16xf32>
    %cst_37 = arith.constant dense<0xFF800000> : vector<16xf32>
    %134 = vector.multi_reduction <maximumf>, %133, %cst_37 [1] : vector<16x16xf32> to vector<16xf32>
    %135 = vector.shape_cast %134 : vector<16xf32> to vector<16x1xf32>
    %136 = vector.broadcast %135 : vector<16x1xf32> to vector<16x16xf32>
    %137 = arith.subf %133, %136 : vector<16x16xf32>
    %138 = math.exp %137 : vector<16x16xf32>
    %cst_38 = arith.constant dense<0.000000e+00> : vector<16xf32>
    %139 = vector.multi_reduction <add>, %138, %cst_38 [1] : vector<16x16xf32> to vector<16xf32>
    %140 = vector.shape_cast %139 : vector<16xf32> to vector<16x1xf32>
    %141 = tpu.reciprocal %140 {approx = true} : vector<16x1xf32> -> vector<16x1xf32>
    %142 = vector.broadcast %141 : vector<16x1xf32> to vector<16x16xf32>
    %143 = arith.mulf %138, %142 : vector<16x16xf32>
    %144 = arith.truncf %143 : vector<16x16xf32> to vector<16x16xbf16>
    %cst_39 = arith.constant dense<0.000000e+00> : vector<16x32xf32>
    %145 = tpu.matmul %144, %128, %cst_39 {dimension_numbers = #tpu.dot_dimension_numbers<[1], [0], [0], [1], [0, 0, 1, 1], [], []>} : vector<16x16xbf16>, vector<16x32xbf16>, vector<16x32xf32> -> vector<16x32xf32>
    %c0_40 = arith.constant 0 : index
    %c64 = arith.constant 64 : index
    %146 = vector.load %arg14[%c0_40, %c64] : memref<16x128xf32, #tpu.memory_space<vmem>>, vector<16x32xf32>
    tpu.vector_store %arg14[%c0_40, %c64], %145 {strides = array<i32>} : memref<16x128xf32, #tpu.memory_space<vmem>>, vector<16x32xf32>,
    %147 = vector.extract_strided_slice %17 {offsets = [0, 96], sizes = [16, 16], strides = [1, 1]} : vector<16x128xf32> to vector<16x16xf32>
    %148 = vector.extract_strided_slice %17 {offsets = [0, 112], sizes = [16, 16], strides = [1, 1]} : vector<16x128xf32> to vector<16x16xf32>
    %149 = arith.mulf %147, %22 : vector<16x16xf32>
    %150 = arith.mulf %148, %23 : vector<16x16xf32>
    %151 = arith.subf %149, %150 : vector<16x16xf32>
    %152 = arith.mulf %147, %23 : vector<16x16xf32>
    %153 = arith.mulf %148, %22 : vector<16x16xf32>
    %154 = arith.addf %152, %153 : vector<16x16xf32>
    %155 = tpu.concatenate %151, %154 in 1 : vector<16x16xf32>, vector<16x16xf32> -> vector<16x32xf32>
    %156 = arith.truncf %155 : vector<16x32xf32> to vector<16x32xbf16>
    %157 = vector.extract_strided_slice %19 {offsets = [0, 96], sizes = [16, 16], strides = [1, 1]} : vector<16x128xf32> to vector<16x16xf32>
    %158 = vector.extract_strided_slice %19 {offsets = [0, 112], sizes = [16, 16], strides = [1, 1]} : vector<16x128xf32> to vector<16x16xf32>
    %159 = arith.mulf %157, %22 : vector<16x16xf32>
    %160 = arith.mulf %158, %23 : vector<16x16xf32>
    %161 = arith.subf %159, %160 : vector<16x16xf32>
    %162 = arith.mulf %157, %23 : vector<16x16xf32>
    %163 = arith.mulf %158, %22 : vector<16x16xf32>
    %164 = arith.addf %162, %163 : vector<16x16xf32>
    %165 = tpu.concatenate %161, %164 in 1 : vector<16x16xf32>, vector<16x16xf32> -> vector<16x32xf32>
    %166 = arith.truncf %165 : vector<16x32xf32> to vector<16x32xbf16>
    %167 = vector.extract_strided_slice %21 {offsets = [0, 96], sizes = [16, 32], strides = [1, 1]} : vector<16x128xf32> to vector<16x32xf32>
    %168 = arith.truncf %167 : vector<16x32xf32> to vector<16x32xbf16>
    %cst_41 = arith.constant dense<0.000000e+00> : vector<16x16xf32>
    %169 = tpu.matmul %156, %166, %cst_41 {dimension_numbers = #tpu.dot_dimension_numbers<[1], [1], [0], [0], [0, 0, 1, 0], [], []>} : vector<16x32xbf16>, vector<16x32xbf16>, vector<16x16xf32> -> vector<16x16xf32>
    %cst_42 = arith.constant 0.176776692 : f32
    %170 = vector.broadcast %cst_42 : f32 to vector<16x16xf32>
    %171 = arith.mulf %169, %170 : vector<16x16xf32>
    %cst_43 = arith.constant -1.000000e+30 : f32
    %172 = vector.broadcast %cst_43 : f32 to vector<16x16xf32>
    %173 = arith.select %26, %171, %172 : vector<16x16xi1>, vector<16x16xf32>
    %cst_44 = arith.constant dense<0xFF800000> : vector<16xf32>
    %174 = vector.multi_reduction <maximumf>, %173, %cst_44 [1] : vector<16x16xf32> to vector<16xf32>
    %175 = vector.shape_cast %174 : vector<16xf32> to vector<16x1xf32>
    %176 = vector.broadcast %175 : vector<16x1xf32> to vector<16x16xf32>
    %177 = arith.subf %173, %176 : vector<16x16xf32>
    %178 = math.exp %177 : vector<16x16xf32>
    %cst_45 = arith.constant dense<0.000000e+00> : vector<16xf32>
    %179 = vector.multi_reduction <add>, %178, %cst_45 [1] : vector<16x16xf32> to vector<16xf32>
    %180 = vector.shape_cast %179 : vector<16xf32> to vector<16x1xf32>
    %181 = tpu.reciprocal %180 {approx = true} : vector<16x1xf32> -> vector<16x1xf32>
    %182 = vector.broadcast %181 : vector<16x1xf32> to vector<16x16xf32>
    %183 = arith.mulf %178, %182 : vector<16x16xf32>
    %184 = arith.truncf %183 : vector<16x16xf32> to vector<16x16xbf16>
    %cst_46 = arith.constant dense<0.000000e+00> : vector<16x32xf32>
    %185 = tpu.matmul %184, %168, %cst_46 {dimension_numbers = #tpu.dot_dimension_numbers<[1], [0], [0], [1], [0, 0, 1, 1], [], []>} : vector<16x16xbf16>, vector<16x32xbf16>, vector<16x32xf32> -> vector<16x32xf32>
    %c0_47 = arith.constant 0 : index
    %c96 = arith.constant 96 : index
    %186 = vector.load %arg14[%c0_47, %c96] : memref<16x128xf32, #tpu.memory_space<vmem>>, vector<16x32xf32>
    tpu.vector_store %arg14[%c0_47, %c96], %185 {strides = array<i32>} : memref<16x128xf32, #tpu.memory_space<vmem>>, vector<16x32xf32>,
    %c0_48 = arith.constant 0 : index
    %c0_49 = arith.constant 0 : index
    %187 = vector.load %arg14[%c0_48, %c0_49] : memref<16x128xf32, #tpu.memory_space<vmem>>, vector<16x128xf32>
    %188 = arith.truncf %187 : vector<16x128xf32> to vector<16x128xbf16>
    %c0_50 = arith.constant 0 : index
    %c0_51 = arith.constant 0 : index
    %189 = vector.load %arg7[%c0_50, %c0_51] : memref<128x128xbf16, #tpu.memory_space<vmem>>, vector<128x128xbf16>
    %cst_52 = arith.constant dense<0.000000e+00> : vector<16x128xf32>
    %190 = tpu.matmul %188, %189, %cst_52 {dimension_numbers = #tpu.dot_dimension_numbers<[1], [0], [0], [1], [0, 0, 1, 1], [], []>} : vector<16x128xbf16>, vector<128x128xbf16>, vector<16x128xf32> -> vector<16x128xf32>
    %191 = arith.addf %1, %190 : vector<16x128xf32>
    %c0_53 = arith.constant 0 : index
    %c0_54 = arith.constant 0 : index
    %192 = vector.load %arg3[%c0_53, %c0_54] : memref<1x128xf32, #tpu.memory_space<vmem>>, vector<1x128xf32>
    %193 = arith.mulf %191, %191 : vector<16x128xf32>
    %cst_55 = arith.constant dense<0.000000e+00> : vector<16xf32>
    %194 = vector.multi_reduction <add>, %193, %cst_55 [1] : vector<16x128xf32> to vector<16xf32>
    %195 = vector.shape_cast %194 : vector<16xf32> to vector<16x1xf32>
    %cst_56 = arith.constant 7.812500e-03 : f32
    %196 = vector.broadcast %cst_56 : f32 to vector<16x1xf32>
    %197 = arith.mulf %195, %196 : vector<16x1xf32>
    %198 = vector.broadcast %192 : vector<1x128xf32> to vector<16x128xf32>
    %199 = arith.mulf %191, %198 : vector<16x128xf32>
    %cst_57 = arith.constant 9.99999974E-6 : f32
    %200 = vector.broadcast %cst_57 : f32 to vector<16x1xf32>
    %201 = arith.addf %197, %200 : vector<16x1xf32>
    %202 = math.rsqrt %201 : vector<16x1xf32>
    %203 = vector.broadcast %202 : vector<16x1xf32> to vector<16x128xf32>
    %204 = arith.mulf %199, %203 : vector<16x128xf32>
    %205 = arith.truncf %204 : vector<16x128xf32> to vector<16x128xbf16>
    %c0_58 = arith.constant 0 : index
    %c0_59 = arith.constant 0 : index
    %206 = vector.load %arg8[%c0_58, %c0_59] : memref<128x256xbf16, #tpu.memory_space<vmem>>, vector<128x256xbf16>
    %cst_60 = arith.constant dense<0.000000e+00> : vector<16x256xf32>
    %207 = tpu.matmul %205, %206, %cst_60 {dimension_numbers = #tpu.dot_dimension_numbers<[1], [0], [0], [1], [0, 0, 1, 1], [], []>} : vector<16x128xbf16>, vector<128x256xbf16>, vector<16x256xf32> -> vector<16x256xf32>
    %c0_61 = arith.constant 0 : index
    %c0_62 = arith.constant 0 : index
    %208 = vector.load %arg10[%c0_61, %c0_62] : memref<128x256xbf16, #tpu.memory_space<vmem>>, vector<128x256xbf16>
    %cst_63 = arith.constant dense<0.000000e+00> : vector<16x256xf32>
    %209 = tpu.matmul %205, %208, %cst_63 {dimension_numbers = #tpu.dot_dimension_numbers<[1], [0], [0], [1], [0, 0, 1, 1], [], []>} : vector<16x128xbf16>, vector<128x256xbf16>, vector<16x256xf32> -> vector<16x256xf32>
    %210 = arith.negf %207 : vector<16x256xf32>
    %211 = math.exp %210 : vector<16x256xf32>
    %cst_64 = arith.constant 1.000000e+00 : f32
    %212 = vector.broadcast %cst_64 : f32 to vector<16x256xf32>
    %213 = arith.addf %212, %211 : vector<16x256xf32>
    %214 = arith.divf %212, %213 : vector<16x256xf32>
    %215 = arith.mulf %207, %214 : vector<16x256xf32>
    %216 = arith.mulf %215, %209 : vector<16x256xf32>
    %217 = arith.truncf %216 : vector<16x256xf32> to vector<16x256xbf16>
    %c0_65 = arith.constant 0 : index
    %c0_66 = arith.constant 0 : index
    %218 = vector.load %arg9[%c0_65, %c0_66] : memref<256x128xbf16, #tpu.memory_space<vmem>>, vector<256x128xbf16>
    %cst_67 = arith.constant dense<0.000000e+00> : vector<16x128xf32>
    %219 = tpu.matmul %217, %218, %cst_67 {dimension_numbers = #tpu.dot_dimension_numbers<[1], [0], [0], [1], [0, 0, 1, 1], [], []>} : vector<16x256xbf16>, vector<256x128xbf16>, vector<16x128xf32> -> vector<16x128xf32>
    %220 = arith.addf %191, %219 : vector<16x128xf32>
    %c0_68 = arith.constant 0 : index
    %c0_69 = arith.constant 0 : index
    %c0_70 = arith.constant 0 : index
    %221 = vector.load %arg13[%c0_68, %c0_69, %c0_70] : memref<1x16x128xf32, #tpu.memory_space<vmem>>, vector<1x16x128xf32>
    %222 = vector.shape_cast %221 : vector<1x16x128xf32> to vector<16x128xf32>
    %223 = vector.shape_cast %220 : vector<16x128xf32> to vector<1x16x128xf32>
    tpu.vector_store %arg13[%c0_68, %c0_69, %c0_70], %223 {strides = array<i32>} : memref<1x16x128xf32, #tpu.memory_space<vmem>>, vector<1x16x128xf32>,
    return
  }
  func.func @transform_0(%arg0: i32) -> (i32, i32, i32) {
    %c0_i32 = arith.constant 0 : i32
    %c0_i32_0 = arith.constant 0 : i32
    %c0_i32_1 = arith.constant 0 : i32
    return %arg0, %c0_i32, %c0_i32_0 : i32, i32, i32
  }
  func.func @transform_1(%arg0: i32) -> (i32, i32) {
    %c0_i32 = arith.constant 0 : i32
    %c0_i32_0 = arith.constant 0 : i32
    %c0_i32_1 = arith.constant 0 : i32
    return %c0_i32, %c0_i32_0 : i32, i32
  }
  func.func @transform_2(%arg0: i32) -> (i32, i32) {
    %c0_i32 = arith.constant 0 : i32
    %c0_i32_0 = arith.constant 0 : i32
    %c0_i32_1 = arith.constant 0 : i32
    return %c0_i32, %c0_i32_0 : i32, i32
  }
  func.func @transform_3(%arg0: i32) -> (i32, i32) {
    %c0_i32 = arith.constant 0 : i32
    %c0_i32_0 = arith.constant 0 : i32
    %c0_i32_1 = arith.constant 0 : i32
    return %c0_i32, %c0_i32_0 : i32, i32
  }
  func.func @transform_4(%arg0: i32) -> (i32, i32) {
    %c0_i32 = arith.constant 0 : i32
    %c0_i32_0 = arith.constant 0 : i32
    %c0_i32_1 = arith.constant 0 : i32
    return %c0_i32, %c0_i32_0 : i32, i32
  }
  func.func @transform_5(%arg0: i32) -> (i32, i32) {
    %c0_i32 = arith.constant 0 : i32
    %c0_i32_0 = arith.constant 0 : i32
    %c0_i32_1 = arith.constant 0 : i32
    return %c0_i32, %c0_i32_0 : i32, i32
  }
  func.func @transform_6(%arg0: i32) -> (i32, i32) {
    %c0_i32 = arith.constant 0 : i32
    %c0_i32_0 = arith.constant 0 : i32
    %c0_i32_1 = arith.constant 0 : i32
    return %c0_i32, %c0_i32_0 : i32, i32
  }
  func.func @transform_7(%arg0: i32) -> (i32, i32) {
    %c0_i32 = arith.constant 0 : i32
    %c0_i32_0 = arith.constant 0 : i32
    %c0_i32_1 = arith.constant 0 : i32
    return %c0_i32, %c0_i32_0 : i32, i32
  }
  func.func @transform_8(%arg0: i32) -> (i32, i32) {
    %c0_i32 = arith.constant 0 : i32
    %c0_i32_0 = arith.constant 0 : i32
    %c0_i32_1 = arith.constant 0 : i32
    return %c0_i32, %c0_i32_0 : i32, i32
  }
  func.func @transform_9(%arg0: i32) -> (i32, i32) {
    %c0_i32 = arith.constant 0 : i32
    %c0_i32_0 = arith.constant 0 : i32
    %c0_i32_1 = arith.constant 0 : i32
    return %c0_i32, %c0_i32_0 : i32, i32
  }
  func.func @transform_10(%arg0: i32) -> (i32, i32) {
    %c0_i32 = arith.constant 0 : i32
    %c0_i32_0 = arith.constant 0 : i32
    %c0_i32_1 = arith.constant 0 : i32
    return %c0_i32, %c0_i32_0 : i32, i32
  }
  func.func @transform_11(%arg0: i32) -> (i32, i32) {
    %c0_i32 = arith.constant 0 : i32
    %c0_i32_0 = arith.constant 0 : i32
    %c0_i32_1 = arith.constant 0 : i32
    return %c0_i32, %c0_i32_0 : i32, i32
  }
  func.func @transform_12(%arg0: i32) -> (i32, i32, i32) {
    %c0_i32 = arith.constant 0 : i32
    %c0_i32_0 = arith.constant 0 : i32
    %c0_i32_1 = arith.constant 0 : i32
    return %arg0, %c0_i32, %c0_i32_0 : i32, i32, i32
  }
}

module attributes {stable_mosaic.version = 11 : i64} {
  func.func @_transformer_block_kernel(%arg0: i32, %arg1: memref<1x16x128xf32, #tpu.memory_space<vmem>>, %arg2: memref<1x128xf32, #tpu.memory_space<vmem>>, %arg3: memref<1x128xf32, #tpu.memory_space<vmem>>, %arg4: memref<128x128xbf16, #tpu.memory_space<vmem>>, %arg5: memref<128x128xbf16, #tpu.memory_space<vmem>>, %arg6: memref<128x128xbf16, #tpu.memory_space<vmem>>, %arg7: memref<128x128xbf16, #tpu.memory_space<vmem>>, %arg8: memref<128x256xbf16, #tpu.memory_space<vmem>>, %arg9: memref<256x128xbf16, #tpu.memory_space<vmem>>, %arg10: memref<128x256xbf16, #tpu.memory_space<vmem>>, %arg11: memref<16x16xf32, #tpu.memory_space<vmem>>, %arg12: memref<16x16xf32, #tpu.memory_space<vmem>>, %arg13: memref<1x16x128xf32, #tpu.memory_space<vmem>>, %arg14: memref<16x128xf32, #tpu.memory_space<vmem>>) attributes {dimension_semantics = [#tpu.dimension_semantics<parallel>], iteration_bounds = array<i64: 2>, scalar_prefetch = 0 : i64, scratch_operands = 1 : i64, tpu.core_type = #tpu.core_type<tc>, window_params = [{transform_indices = @transform_0, window_bounds = array<i64: 1, 16, 128>}, {pipeline_mode = #tpu.pipeline_mode<synchronous>, transform_indices = @transform_1, window_bounds = array<i64: 1, 128>}, {pipeline_mode = #tpu.pipeline_mode<synchronous>, transform_indices = @transform_2, window_bounds = array<i64: 1, 128>}, {pipeline_mode = #tpu.pipeline_mode<synchronous>, transform_indices = @transform_3, window_bounds = array<i64: 128, 128>}, {pipeline_mode = #tpu.pipeline_mode<synchronous>, transform_indices = @transform_4, window_bounds = array<i64: 128, 128>}, {pipeline_mode = #tpu.pipeline_mode<synchronous>, transform_indices = @transform_5, window_bounds = array<i64: 128, 128>}, {pipeline_mode = #tpu.pipeline_mode<synchronous>, transform_indices = @transform_6, window_bounds = array<i64: 128, 128>}, {pipeline_mode = #tpu.pipeline_mode<synchronous>, transform_indices = @transform_7, window_bounds = array<i64: 128, 256>}, {pipeline_mode = #tpu.pipeline_mode<synchronous>, transform_indices = @transform_8, window_bounds = array<i64: 256, 128>}, {pipeline_mode = #tpu.pipeline_mode<synchronous>, transform_indices = @transform_9, window_bounds = array<i64: 128, 256>}, {pipeline_mode = #tpu.pipeline_mode<synchronous>, transform_indices = @transform_10, window_bounds = array<i64: 16, 16>}, {pipeline_mode = #tpu.pipeline_mode<synchronous>, transform_indices = @transform_11, window_bounds = array<i64: 16, 16>}, {transform_indices = @transform_12, window_bounds = array<i64: 1, 16, 128>}]} {
    %c0 = arith.constant 0 : index
    %c0_0 = arith.constant 0 : index
    %c0_1 = arith.constant 0 : index
    %0 = vector.load %arg1[%c0, %c0_0, %c0_1] : memref<1x16x128xf32, #tpu.memory_space<vmem>>, vector<1x16x128xf32>
    %1 = vector.shape_cast %0 : vector<1x16x128xf32> to vector<16x128xf32>
    %c0_2 = arith.constant 0 : index
    %c0_3 = arith.constant 0 : index
    %2 = vector.load %arg2[%c0_2, %c0_3] : memref<1x128xf32, #tpu.memory_space<vmem>>, vector<1x128xf32>
    %3 = arith.mulf %1, %1 : vector<16x128xf32>
    %cst = arith.constant dense<0.000000e+00> : vector<16xf32>
    %4 = vector.multi_reduction <add>, %3, %cst [1] : vector<16x128xf32> to vector<16xf32>
    %5 = vector.shape_cast %4 : vector<16xf32> to vector<16x1xf32>
    %cst_4 = arith.constant 7.812500e-03 : f32
    %6 = vector.broadcast %cst_4 : f32 to vector<16x1xf32>
    %7 = arith.mulf %5, %6 : vector<16x1xf32>
    %8 = vector.broadcast %2 : vector<1x128xf32> to vector<16x128xf32>
    %9 = arith.mulf %1, %8 : vector<16x128xf32>
    %cst_5 = arith.constant 9.99999974E-6 : f32
    %10 = vector.broadcast %cst_5 : f32 to vector<16x1xf32>
    %11 = arith.addf %7, %10 : vector<16x1xf32>
    %12 = math.rsqrt %11 : vector<16x1xf32>
    %13 = vector.broadcast %12 : vector<16x1xf32> to vector<16x128xf32>
    %14 = arith.mulf %9, %13 : vector<16x128xf32>
    %15 = arith.truncf %14 : vector<16x128xf32> to vector<16x128xbf16>
    %c0_6 = arith.constant 0 : index
    %c0_7 = arith.constant 0 : index
    %16 = vector.load %arg4[%c0_6, %c0_7] : memref<128x128xbf16, #tpu.memory_space<vmem>>, vector<128x128xbf16>
    %cst_8 = arith.constant dense<0.000000e+00> : vector<16x128xf32>
    %17 = tpu.matmul %15, %16, %cst_8 {dimension_numbers = #tpu.dot_dimension_numbers<[1], [0], [0], [1], [0, 0, 1, 1], [], []>} : vector<16x128xbf16>, vector<128x128xbf16>, vector<16x128xf32> -> vector<16x128xf32>
    %c0_9 = arith.constant 0 : index
    %c0_10 = arith.constant 0 : index
    %18 = vector.load %arg5[%c0_9, %c0_10] : memref<128x128xbf16, #tpu.memory_space<vmem>>, vector<128x128xbf16>
    %cst_11 = arith.constant dense<0.000000e+00> : vector<16x128xf32>
    %19 = tpu.matmul %15, %18, %cst_11 {dimension_numbers = #tpu.dot_dimension_numbers<[1], [0], [0], [1], [0, 0, 1, 1], [], []>} : vector<16x128xbf16>, vector<128x128xbf16>, vector<16x128xf32> -> vector<16x128xf32>
    %c0_12 = arith.constant 0 : index
    %c0_13 = arith.constant 0 : index
    %20 = vector.load %arg6[%c0_12, %c0_13] : memref<128x128xbf16, #tpu.memory_space<vmem>>, vector<128x128xbf16>
    %cst_14 = arith.constant dense<0.000000e+00> : vector<16x128xf32>
    %21 = tpu.matmul %15, %20, %cst_14 {dimension_numbers = #tpu.dot_dimension_numbers<[1], [0], [0], [1], [0, 0, 1, 1], [], []>} : vector<16x128xbf16>, vector<128x128xbf16>, vector<16x128xf32> -> vector<16x128xf32>
    %c0_15 = arith.constant 0 : index
    %c0_16 = arith.constant 0 : index
    %22 = vector.load %arg11[%c0_15, %c0_16] : memref<16x16xf32, #tpu.memory_space<vmem>>, vector<16x16xf32>
    %c0_17 = arith.constant 0 : index
    %c0_18 = arith.constant 0 : index
    %23 = vector.load %arg12[%c0_17, %c0_18] : memref<16x16xf32, #tpu.memory_space<vmem>>, vector<16x16xf32>
    %24 = tpu.iota {dimensions = array<i32: 0>} : vector<16x16xi32>
    %25 = tpu.iota {dimensions = array<i32: 1>} : vector<16x16xi32>
    %26 = arith.cmpi sle, %25, %24 : vector<16x16xi32>
    %27 = vector.extract_strided_slice %17 {offsets = [0, 0], sizes = [16, 16], strides = [1, 1]} : vector<16x128xf32> to vector<16x16xf32>
    %28 = vector.extract_strided_slice %17 {offsets = [0, 16], sizes = [16, 16], strides = [1, 1]} : vector<16x128xf32> to vector<16x16xf32>
    %29 = arith.mulf %27, %22 : vector<16x16xf32>
    %30 = arith.mulf %28, %23 : vector<16x16xf32>
    %31 = arith.subf %29, %30 : vector<16x16xf32>
    %32 = arith.mulf %27, %23 : vector<16x16xf32>
    %33 = arith.mulf %28, %22 : vector<16x16xf32>
    %34 = arith.addf %32, %33 : vector<16x16xf32>
    %35 = tpu.concatenate %31, %34 in 1 : vector<16x16xf32>, vector<16x16xf32> -> vector<16x32xf32>
    %36 = arith.truncf %35 : vector<16x32xf32> to vector<16x32xbf16>
    %37 = vector.extract_strided_slice %19 {offsets = [0, 0], sizes = [16, 16], strides = [1, 1]} : vector<16x128xf32> to vector<16x16xf32>
    %38 = vector.extract_strided_slice %19 {offsets = [0, 16], sizes = [16, 16], strides = [1, 1]} : vector<16x128xf32> to vector<16x16xf32>
    %39 = arith.mulf %37, %22 : vector<16x16xf32>
    %40 = arith.mulf %38, %23 : vector<16x16xf32>
    %41 = arith.subf %39, %40 : vector<16x16xf32>
    %42 = arith.mulf %37, %23 : vector<16x16xf32>
    %43 = arith.mulf %38, %22 : vector<16x16xf32>
    %44 = arith.addf %42, %43 : vector<16x16xf32>
    %45 = tpu.concatenate %41, %44 in 1 : vector<16x16xf32>, vector<16x16xf32> -> vector<16x32xf32>
    %46 = arith.truncf %45 : vector<16x32xf32> to vector<16x32xbf16>
    %47 = vector.extract_strided_slice %21 {offsets = [0, 0], sizes = [16, 32], strides = [1, 1]} : vector<16x128xf32> to vector<16x32xf32>
    %48 = arith.truncf %47 : vector<16x32xf32> to vector<16x32xbf16>
    %cst_19 = arith.constant dense<0.000000e+00> : vector<16x16xf32>
    %49 = tpu.matmul %36, %46, %cst_19 {dimension_numbers = #tpu.dot_dimension_numbers<[1], [1], [0], [0], [0, 0, 1, 0], [], []>} : vector<16x32xbf16>, vector<16x32xbf16>, vector<16x16xf32> -> vector<16x16xf32>
    %cst_20 = arith.constant 0.176776692 : f32
    %50 = vector.broadcast %cst_20 : f32 to vector<16x16xf32>
    %51 = arith.mulf %49, %50 : vector<16x16xf32>
    %cst_21 = arith.constant -1.000000e+30 : f32
    %52 = vector.broadcast %cst_21 : f32 to vector<16x16xf32>
    %53 = arith.select %26, %51, %52 : vector<16x16xi1>, vector<16x16xf32>
    %cst_22 = arith.constant dense<0xFF800000> : vector<16xf32>
    %54 = vector.multi_reduction <maximumf>, %53, %cst_22 [1] : vector<16x16xf32> to vector<16xf32>
    %55 = vector.shape_cast %54 : vector<16xf32> to vector<16x1xf32>
    %56 = vector.broadcast %55 : vector<16x1xf32> to vector<16x16xf32>
    %57 = arith.subf %53, %56 : vector<16x16xf32>
    %58 = math.exp %57 : vector<16x16xf32>
    %cst_23 = arith.constant dense<0.000000e+00> : vector<16xf32>
    %59 = vector.multi_reduction <add>, %58, %cst_23 [1] : vector<16x16xf32> to vector<16xf32>
    %60 = vector.shape_cast %59 : vector<16xf32> to vector<16x1xf32>
    %61 = tpu.reciprocal %60 {approx = true} : vector<16x1xf32> -> vector<16x1xf32>
    %62 = vector.broadcast %61 : vector<16x1xf32> to vector<16x16xf32>
    %63 = arith.mulf %58, %62 : vector<16x16xf32>
    %64 = arith.truncf %63 : vector<16x16xf32> to vector<16x16xbf16>
    %cst_24 = arith.constant dense<0.000000e+00> : vector<16x32xf32>
    %65 = tpu.matmul %64, %48, %cst_24 {dimension_numbers = #tpu.dot_dimension_numbers<[1], [0], [0], [1], [0, 0, 1, 1], [], []>} : vector<16x16xbf16>, vector<16x32xbf16>, vector<16x32xf32> -> vector<16x32xf32>
    %c0_25 = arith.constant 0 : index
    %c0_26 = arith.constant 0 : index
    %66 = vector.load %arg14[%c0_25, %c0_26] : memref<16x128xf32, #tpu.memory_space<vmem>>, vector<16x32xf32>
    tpu.vector_store %arg14[%c0_25, %c0_26], %65 {strides = array<i32>} : memref<16x128xf32, #tpu.memory_space<vmem>>, vector<16x32xf32>,
    %67 = vector.extract_strided_slice %17 {offsets = [0, 32], sizes = [16, 16], strides = [1, 1]} : vector<16x128xf32> to vector<16x16xf32>
    %68 = vector.extract_strided_slice %17 {offsets = [0, 48], sizes = [16, 16], strides = [1, 1]} : vector<16x128xf32> to vector<16x16xf32>
    %69 = arith.mulf %67, %22 : vector<16x16xf32>
    %70 = arith.mulf %68, %23 : vector<16x16xf32>
    %71 = arith.subf %69, %70 : vector<16x16xf32>
    %72 = arith.mulf %67, %23 : vector<16x16xf32>
    %73 = arith.mulf %68, %22 : vector<16x16xf32>
    %74 = arith.addf %72, %73 : vector<16x16xf32>
    %75 = tpu.concatenate %71, %74 in 1 : vector<16x16xf32>, vector<16x16xf32> -> vector<16x32xf32>
    %76 = arith.truncf %75 : vector<16x32xf32> to vector<16x32xbf16>
    %77 = vector.extract_strided_slice %19 {offsets = [0, 32], sizes = [16, 16], strides = [1, 1]} : vector<16x128xf32> to vector<16x16xf32>
    %78 = vector.extract_strided_slice %19 {offsets = [0, 48], sizes = [16, 16], strides = [1, 1]} : vector<16x128xf32> to vector<16x16xf32>
    %79 = arith.mulf %77, %22 : vector<16x16xf32>
    %80 = arith.mulf %78, %23 : vector<16x16xf32>
    %81 = arith.subf %79, %80 : vector<16x16xf32>
    %82 = arith.mulf %77, %23 : vector<16x16xf32>
    %83 = arith.mulf %78, %22 : vector<16x16xf32>
    %84 = arith.addf %82, %83 : vector<16x16xf32>
    %85 = tpu.concatenate %81, %84 in 1 : vector<16x16xf32>, vector<16x16xf32> -> vector<16x32xf32>
    %86 = arith.truncf %85 : vector<16x32xf32> to vector<16x32xbf16>
    %87 = vector.extract_strided_slice %21 {offsets = [0, 32], sizes = [16, 32], strides = [1, 1]} : vector<16x128xf32> to vector<16x32xf32>
    %88 = arith.truncf %87 : vector<16x32xf32> to vector<16x32xbf16>
    %cst_27 = arith.constant dense<0.000000e+00> : vector<16x16xf32>
    %89 = tpu.matmul %76, %86, %cst_27 {dimension_numbers = #tpu.dot_dimension_numbers<[1], [1], [0], [0], [0, 0, 1, 0], [], []>} : vector<16x32xbf16>, vector<16x32xbf16>, vector<16x16xf32> -> vector<16x16xf32>
    %cst_28 = arith.constant 0.176776692 : f32
    %90 = vector.broadcast %cst_28 : f32 to vector<16x16xf32>
    %91 = arith.mulf %89, %90 : vector<16x16xf32>
    %cst_29 = arith.constant -1.000000e+30 : f32
    %92 = vector.broadcast %cst_29 : f32 to vector<16x16xf32>
    %93 = arith.select %26, %91, %92 : vector<16x16xi1>, vector<16x16xf32>
    %cst_30 = arith.constant dense<0xFF800000> : vector<16xf32>
    %94 = vector.multi_reduction <maximumf>, %93, %cst_30 [1] : vector<16x16xf32> to vector<16xf32>
    %95 = vector.shape_cast %94 : vector<16xf32> to vector<16x1xf32>
    %96 = vector.broadcast %95 : vector<16x1xf32> to vector<16x16xf32>
    %97 = arith.subf %93, %96 : vector<16x16xf32>
    %98 = math.exp %97 : vector<16x16xf32>
    %cst_31 = arith.constant dense<0.000000e+00> : vector<16xf32>
    %99 = vector.multi_reduction <add>, %98, %cst_31 [1] : vector<16x16xf32> to vector<16xf32>
    %100 = vector.shape_cast %99 : vector<16xf32> to vector<16x1xf32>
    %101 = tpu.reciprocal %100 {approx = true} : vector<16x1xf32> -> vector<16x1xf32>
    %102 = vector.broadcast %101 : vector<16x1xf32> to vector<16x16xf32>
    %103 = arith.mulf %98, %102 : vector<16x16xf32>
    %104 = arith.truncf %103 : vector<16x16xf32> to vector<16x16xbf16>
    %cst_32 = arith.constant dense<0.000000e+00> : vector<16x32xf32>
    %105 = tpu.matmul %104, %88, %cst_32 {dimension_numbers = #tpu.dot_dimension_numbers<[1], [0], [0], [1], [0, 0, 1, 1], [], []>} : vector<16x16xbf16>, vector<16x32xbf16>, vector<16x32xf32> -> vector<16x32xf32>
    %c0_33 = arith.constant 0 : index
    %c32 = arith.constant 32 : index
    %106 = vector.load %arg14[%c0_33, %c32] : memref<16x128xf32, #tpu.memory_space<vmem>>, vector<16x32xf32>
    tpu.vector_store %arg14[%c0_33, %c32], %105 {strides = array<i32>} : memref<16x128xf32, #tpu.memory_space<vmem>>, vector<16x32xf32>,
    %107 = vector.extract_strided_slice %17 {offsets = [0, 64], sizes = [16, 16], strides = [1, 1]} : vector<16x128xf32> to vector<16x16xf32>
    %108 = vector.extract_strided_slice %17 {offsets = [0, 80], sizes = [16, 16], strides = [1, 1]} : vector<16x128xf32> to vector<16x16xf32>
    %109 = arith.mulf %107, %22 : vector<16x16xf32>
    %110 = arith.mulf %108, %23 : vector<16x16xf32>
    %111 = arith.subf %109, %110 : vector<16x16xf32>
    %112 = arith.mulf %107, %23 : vector<16x16xf32>
    %113 = arith.mulf %108, %22 : vector<16x16xf32>
    %114 = arith.addf %112, %113 : vector<16x16xf32>
    %115 = tpu.concatenate %111, %114 in 1 : vector<16x16xf32>, vector<16x16xf32> -> vector<16x32xf32>
    %116 = arith.truncf %115 : vector<16x32xf32> to vector<16x32xbf16>
    %117 = vector.extract_strided_slice %19 {offsets = [0, 64], sizes = [16, 16], strides = [1, 1]} : vector<16x128xf32> to vector<16x16xf32>
    %118 = vector.extract_strided_slice %19 {offsets = [0, 80], sizes = [16, 16], strides = [1, 1]} : vector<16x128xf32> to vector<16x16xf32>
    %119 = arith.mulf %117, %22 : vector<16x16xf32>
    %120 = arith.mulf %118, %23 : vector<16x16xf32>
    %121 = arith.subf %119, %120 : vector<16x16xf32>
    %122 = arith.mulf %117, %23 : vector<16x16xf32>
    %123 = arith.mulf %118, %22 : vector<16x16xf32>
    %124 = arith.addf %122, %123 : vector<16x16xf32>
    %125 = tpu.concatenate %121, %124 in 1 : vector<16x16xf32>, vector<16x16xf32> -> vector<16x32xf32>
    %126 = arith.truncf %125 : vector<16x32xf32> to vector<16x32xbf16>
    %127 = vector.extract_strided_slice %21 {offsets = [0, 64], sizes = [16, 32], strides = [1, 1]} : vector<16x128xf32> to vector<16x32xf32>
    %128 = arith.truncf %127 : vector<16x32xf32> to vector<16x32xbf16>
    %cst_34 = arith.constant dense<0.000000e+00> : vector<16x16xf32>
    %129 = tpu.matmul %116, %126, %cst_34 {dimension_numbers = #tpu.dot_dimension_numbers<[1], [1], [0], [0], [0, 0, 1, 0], [], []>} : vector<16x32xbf16>, vector<16x32xbf16>, vector<16x16xf32> -> vector<16x16xf32>
    %cst_35 = arith.constant 0.176776692 : f32
    %130 = vector.broadcast %cst_35 : f32 to vector<16x16xf32>
    %131 = arith.mulf %129, %130 : vector<16x16xf32>
    %cst_36 = arith.constant -1.000000e+30 : f32
    %132 = vector.broadcast %cst_36 : f32 to vector<16x16xf32>
    %133 = arith.select %26, %131, %132 : vector<16x16xi1>, vector<16x16xf32>
    %cst_37 = arith.constant dense<0xFF800000> : vector<16xf32>
    %134 = vector.multi_reduction <maximumf>, %133, %cst_37 [1] : vector<16x16xf32> to vector<16xf32>
    %135 = vector.shape_cast %134 : vector<16xf32> to vector<16x1xf32>
    %136 = vector.broadcast %135 : vector<16x1xf32> to vector<16x16xf32>
    %137 = arith.subf %133, %136 : vector<16x16xf32>
    %138 = math.exp %137 : vector<16x16xf32>
    %cst_38 = arith.constant dense<0.000000e+00> : vector<16xf32>
    %139 = vector.multi_reduction <add>, %138, %cst_38 [1] : vector<16x16xf32> to vector<16xf32>
    %140 = vector.shape_cast %139 : vector<16xf32> to vector<16x1xf32>
    %141 = tpu.reciprocal %140 {approx = true} : vector<16x1xf32> -> vector<16x1xf32>
    %142 = vector.broadcast %141 : vector<16x1xf32> to vector<16x16xf32>
    %143 = arith.mulf %138, %142 : vector<16x16xf32>
    %144 = arith.truncf %143 : vector<16x16xf32> to vector<16x16xbf16>
    %cst_39 = arith.constant dense<0.000000e+00> : vector<16x32xf32>
    %145 = tpu.matmul %144, %128, %cst_39 {dimension_numbers = #tpu.dot_dimension_numbers<[1], [0], [0], [1], [0, 0, 1, 1], [], []>} : vector<16x16xbf16>, vector<16x32xbf16>, vector<16x32xf32> -> vector<16x32xf32>
    %c0_40 = arith.constant 0 : index
    %c64 = arith.constant 64 : index
    %146 = vector.load %arg14[%c0_40, %c64] : memref<16x128xf32, #tpu.memory_space<vmem>>, vector<16x32xf32>
    tpu.vector_store %arg14[%c0_40, %c64], %145 {strides = array<i32>} : memref<16x128xf32, #tpu.memory_space<vmem>>, vector<16x32xf32>,
    %147 = vector.extract_strided_slice %17 {offsets = [0, 96], sizes = [16, 16], strides = [1, 1]} : vector<16x128xf32> to vector<16x16xf32>
    %148 = vector.extract_strided_slice %17 {offsets = [0, 112], sizes = [16, 16], strides = [1, 1]} : vector<16x128xf32> to vector<16x16xf32>
    %149 = arith.mulf %147, %22 : vector<16x16xf32>
    %150 = arith.mulf %148, %23 : vector<16x16xf32>
    %151 = arith.subf %149, %150 : vector<16x16xf32>
    %152 = arith.mulf %147, %23 : vector<16x16xf32>
    %153 = arith.mulf %148, %22 : vector<16x16xf32>
    %154 = arith.addf %152, %153 : vector<16x16xf32>
    %155 = tpu.concatenate %151, %154 in 1 : vector<16x16xf32>, vector<16x16xf32> -> vector<16x32xf32>
    %156 = arith.truncf %155 : vector<16x32xf32> to vector<16x32xbf16>
    %157 = vector.extract_strided_slice %19 {offsets = [0, 96], sizes = [16, 16], strides = [1, 1]} : vector<16x128xf32> to vector<16x16xf32>
    %158 = vector.extract_strided_slice %19 {offsets = [0, 112], sizes = [16, 16], strides = [1, 1]} : vector<16x128xf32> to vector<16x16xf32>
    %159 = arith.mulf %157, %22 : vector<16x16xf32>
    %160 = arith.mulf %158, %23 : vector<16x16xf32>
    %161 = arith.subf %159, %160 : vector<16x16xf32>
    %162 = arith.mulf %157, %23 : vector<16x16xf32>
    %163 = arith.mulf %158, %22 : vector<16x16xf32>
    %164 = arith.addf %162, %163 : vector<16x16xf32>
    %165 = tpu.concatenate %161, %164 in 1 : vector<16x16xf32>, vector<16x16xf32> -> vector<16x32xf32>
    %166 = arith.truncf %165 : vector<16x32xf32> to vector<16x32xbf16>
    %167 = vector.extract_strided_slice %21 {offsets = [0, 96], sizes = [16, 32], strides = [1, 1]} : vector<16x128xf32> to vector<16x32xf32>
    %168 = arith.truncf %167 : vector<16x32xf32> to vector<16x32xbf16>
    %cst_41 = arith.constant dense<0.000000e+00> : vector<16x16xf32>
    %169 = tpu.matmul %156, %166, %cst_41 {dimension_numbers = #tpu.dot_dimension_numbers<[1], [1], [0], [0], [0, 0, 1, 0], [], []>} : vector<16x32xbf16>, vector<16x32xbf16>, vector<16x16xf32> -> vector<16x16xf32>
    %cst_42 = arith.constant 0.176776692 : f32
    %170 = vector.broadcast %cst_42 : f32 to vector<16x16xf32>
    %171 = arith.mulf %169, %170 : vector<16x16xf32>
    %cst_43 = arith.constant -1.000000e+30 : f32
    %172 = vector.broadcast %cst_43 : f32 to vector<16x16xf32>
    %173 = arith.select %26, %171, %172 : vector<16x16xi1>, vector<16x16xf32>
    %cst_44 = arith.constant dense<0xFF800000> : vector<16xf32>
    %174 = vector.multi_reduction <maximumf>, %173, %cst_44 [1] : vector<16x16xf32> to vector<16xf32>
    %175 = vector.shape_cast %174 : vector<16xf32> to vector<16x1xf32>
    %176 = vector.broadcast %175 : vector<16x1xf32> to vector<16x16xf32>
    %177 = arith.subf %173, %176 : vector<16x16xf32>
    %178 = math.exp %177 : vector<16x16xf32>
    %cst_45 = arith.constant dense<0.000000e+00> : vector<16xf32>
    %179 = vector.multi_reduction <add>, %178, %cst_45 [1] : vector<16x16xf32> to vector<16xf32>
    %180 = vector.shape_cast %179 : vector<16xf32> to vector<16x1xf32>
    %181 = tpu.reciprocal %180 {approx = true} : vector<16x1xf32> -> vector<16x1xf32>
    %182 = vector.broadcast %181 : vector<16x1xf32> to vector<16x16xf32>
    %183 = arith.mulf %178, %182 : vector<16x16xf32>
    %184 = arith.truncf %183 : vector<16x16xf32> to vector<16x16xbf16>
    %cst_46 = arith.constant dense<0.000000e+00> : vector<16x32xf32>
    %185 = tpu.matmul %184, %168, %cst_46 {dimension_numbers = #tpu.dot_dimension_numbers<[1], [0], [0], [1], [0, 0, 1, 1], [], []>} : vector<16x16xbf16>, vector<16x32xbf16>, vector<16x32xf32> -> vector<16x32xf32>
    %c0_47 = arith.constant 0 : index
    %c96 = arith.constant 96 : index
    %186 = vector.load %arg14[%c0_47, %c96] : memref<16x128xf32, #tpu.memory_space<vmem>>, vector<16x32xf32>
    tpu.vector_store %arg14[%c0_47, %c96], %185 {strides = array<i32>} : memref<16x128xf32, #tpu.memory_space<vmem>>, vector<16x32xf32>,
    %c0_48 = arith.constant 0 : index
    %c0_49 = arith.constant 0 : index
    %187 = vector.load %arg14[%c0_48, %c0_49] : memref<16x128xf32, #tpu.memory_space<vmem>>, vector<16x128xf32>
    %188 = arith.truncf %187 : vector<16x128xf32> to vector<16x128xbf16>
    %c0_50 = arith.constant 0 : index
    %c0_51 = arith.constant 0 : index
    %189 = vector.load %arg7[%c0_50, %c0_51] : memref<128x128xbf16, #tpu.memory_space<vmem>>, vector<128x128xbf16>
    %cst_52 = arith.constant dense<0.000000e+00> : vector<16x128xf32>
    %190 = tpu.matmul %188, %189, %cst_52 {dimension_numbers = #tpu.dot_dimension_numbers<[1], [0], [0], [1], [0, 0, 1, 1], [], []>} : vector<16x128xbf16>, vector<128x128xbf16>, vector<16x128xf32> -> vector<16x128xf32>
    %191 = arith.addf %1, %190 : vector<16x128xf32>
    %c0_53 = arith.constant 0 : index
    %c0_54 = arith.constant 0 : index
    %192 = vector.load %arg3[%c0_53, %c0_54] : memref<1x128xf32, #tpu.memory_space<vmem>>, vector<1x128xf32>
    %193 = arith.mulf %191, %191 : vector<16x128xf32>
    %cst_55 = arith.constant dense<0.000000e+00> : vector<16xf32>
    %194 = vector.multi_reduction <add>, %193, %cst_55 [1] : vector<16x128xf32> to vector<16xf32>
    %195 = vector.shape_cast %194 : vector<16xf32> to vector<16x1xf32>
    %cst_56 = arith.constant 7.812500e-03 : f32
    %196 = vector.broadcast %cst_56 : f32 to vector<16x1xf32>
    %197 = arith.mulf %195, %196 : vector<16x1xf32>
    %198 = vector.broadcast %192 : vector<1x128xf32> to vector<16x128xf32>
    %199 = arith.mulf %191, %198 : vector<16x128xf32>
    %cst_57 = arith.constant 9.99999974E-6 : f32
    %200 = vector.broadcast %cst_57 : f32 to vector<16x1xf32>
    %201 = arith.addf %197, %200 : vector<16x1xf32>
    %202 = math.rsqrt %201 : vector<16x1xf32>
    %203 = vector.broadcast %202 : vector<16x1xf32> to vector<16x128xf32>
    %204 = arith.mulf %199, %203 : vector<16x128xf32>
    %205 = arith.truncf %204 : vector<16x128xf32> to vector<16x128xbf16>
    %c0_58 = arith.constant 0 : index
    %c0_59 = arith.constant 0 : index
    %206 = vector.load %arg8[%c0_58, %c0_59] : memref<128x256xbf16, #tpu.memory_space<vmem>>, vector<128x256xbf16>
    %cst_60 = arith.constant dense<0.000000e+00> : vector<16x256xf32>
    %207 = tpu.matmul %205, %206, %cst_60 {dimension_numbers = #tpu.dot_dimension_numbers<[1], [0], [0], [1], [0, 0, 1, 1], [], []>} : vector<16x128xbf16>, vector<128x256xbf16>, vector<16x256xf32> -> vector<16x256xf32>
    %c0_61 = arith.constant 0 : index
    %c0_62 = arith.constant 0 : index
    %208 = vector.load %arg10[%c0_61, %c0_62] : memref<128x256xbf16, #tpu.memory_space<vmem>>, vector<128x256xbf16>
    %cst_63 = arith.constant dense<0.000000e+00> : vector<16x256xf32>
    %209 = tpu.matmul %205, %208, %cst_63 {dimension_numbers = #tpu.dot_dimension_numbers<[1], [0], [0], [1], [0, 0, 1, 1], [], []>} : vector<16x128xbf16>, vector<128x256xbf16>, vector<16x256xf32> -> vector<16x256xf32>
    %210 = arith.negf %207 : vector<16x256xf32>
    %211 = math.exp %210 : vector<16x256xf32>
    %cst_64 = arith.constant 1.000000e+00 : f32
    %212 = vector.broadcast %cst_64 : f32 to vector<16x256xf32>
    %213 = arith.addf %212, %211 : vector<16x256xf32>
    %214 = arith.divf %212, %213 : vector<16x256xf32>
    %215 = arith.mulf %207, %214 : vector<16x256xf32>
    %216 = arith.mulf %215, %209 : vector<16x256xf32>
    %217 = arith.truncf %216 : vector<16x256xf32> to vector<16x256xbf16>
    %c0_65 = arith.constant 0 : index
    %c0_66 = arith.constant 0 : index
    %218 = vector.load %arg9[%c0_65, %c0_66] : memref<256x128xbf16, #tpu.memory_space<vmem>>, vector<256x128xbf16>
    %cst_67 = arith.constant dense<0.000000e+00> : vector<16x128xf32>
    %219 = tpu.matmul %217, %218, %cst_67 {dimension_numbers = #tpu.dot_dimension_numbers<[1], [0], [0], [1], [0, 0, 1, 1], [], []>} : vector<16x256xbf16>, vector<256x128xbf16>, vector<16x128xf32> -> vector<16x128xf32>
    %220 = arith.addf %191, %219 : vector<16x128xf32>
    %c0_68 = arith.constant 0 : index
    %c0_69 = arith.constant 0 : index
    %c0_70 = arith.constant 0 : index
    %221 = vector.load %arg13[%c0_68, %c0_69, %c0_70] : memref<1x16x128xf32, #tpu.memory_space<vmem>>, vector<1x16x128xf32>
    %222 = vector.shape_cast %221 : vector<1x16x128xf32> to vector<16x128xf32>
    %223 = vector.shape_cast %220 : vector<16x128xf32> to vector<1x16x128xf32>
    tpu.vector_store %arg13[%c0_68, %c0_69, %c0_70], %223 {strides = array<i32>} : memref<1x16x128xf32, #tpu.memory_space<vmem>>, vector<1x16x128xf32>,
    return
  }
  func.func @transform_0(%arg0: i32) -> (i32, i32, i32) {
    %c0_i32 = arith.constant 0 : i32
    %c0_i32_0 = arith.constant 0 : i32
    %c0_i32_1 = arith.constant 0 : i32
    return %arg0, %c0_i32, %c0_i32_0 : i32, i32, i32
  }
  func.func @transform_1(%arg0: i32) -> (i32, i32) {
    %c0_i32 = arith.constant 0 : i32
    %c0_i32_0 = arith.constant 0 : i32
    %c0_i32_1 = arith.constant 0 : i32
    return %c0_i32, %c0_i32_0 : i32, i32
  }
  func.func @transform_2(%arg0: i32) -> (i32, i32) {
    %c0_i32 = arith.constant 0 : i32
    %c0_i32_0 = arith.constant 0 : i32
    %c0_i32_1 = arith.constant 0 : i32
    return %c0_i32, %c0_i32_0 : i32, i32
  }
  func.func @transform_3(%arg0: i32) -> (i32, i32) {
    %c0_i32 = arith.constant 0 : i32
    %c0_i32_0 = arith.constant 0 : i32
    %c0_i32_1 = arith.constant 0 : i32
    return %c0_i32, %c0_i32_0 : i32, i32
  }
  func.func @transform_4(%arg0: i32) -> (i32, i32) {
    %c0_i32 = arith.constant 0 : i32
    %c0_i32_0 = arith.constant 0 : i32
    %c0_i32_1 = arith.constant 0 : i32
    return %c0_i32, %c0_i32_0 : i32, i32
  }
  func.func @transform_5(%arg0: i32) -> (i32, i32) {
    %c0_i32 = arith.constant 0 : i32
    %c0_i32_0 = arith.constant 0 : i32
    %c0_i32_1 = arith.constant 0 : i32
    return %c0_i32, %c0_i32_0 : i32, i32
  }
  func.func @transform_6(%arg0: i32) -> (i32, i32) {
    %c0_i32 = arith.constant 0 : i32
    %c0_i32_0 = arith.constant 0 : i32
    %c0_i32_1 = arith.constant 0 : i32
    return %c0_i32, %c0_i32_0 : i32, i32
  }
  func.func @transform_7(%arg0: i32) -> (i32, i32) {
    %c0_i32 = arith.constant 0 : i32
    %c0_i32_0 = arith.constant 0 : i32
    %c0_i32_1 = arith.constant 0 : i32
    return %c0_i32, %c0_i32_0 : i32, i32
  }
  func.func @transform_8(%arg0: i32) -> (i32, i32) {
    %c0_i32 = arith.constant 0 : i32
    %c0_i32_0 = arith.constant 0 : i32
    %c0_i32_1 = arith.constant 0 : i32
    return %c0_i32, %c0_i32_0 : i32, i32
  }
  func.func @transform_9(%arg0: i32) -> (i32, i32) {
    %c0_i32 = arith.constant 0 : i32
    %c0_i32_0 = arith.constant 0 : i32
    %c0_i32_1 = arith.constant 0 : i32
    return %c0_i32, %c0_i32_0 : i32, i32
  }
  func.func @transform_10(%arg0: i32) -> (i32, i32) {
    %c0_i32 = arith.constant 0 : i32
    %c0_i32_0 = arith.constant 0 : i32
    %c0_i32_1 = arith.constant 0 : i32
    return %c0_i32, %c0_i32_0 : i32, i32
  }
  func.func @transform_11(%arg0: i32) -> (i32, i32) {
    %c0_i32 = arith.constant 0 : i32
    %c0_i32_0 = arith.constant 0 : i32
    %c0_i32_1 = arith.constant 0 : i32
    return %c0_i32, %c0_i32_0 : i32, i32
  }
  func.func @transform_12(%arg0: i32) -> (i32, i32, i32) {
    %c0_i32 = arith.constant 0 : i32
    %c0_i32_0 = arith.constant 0 : i32
    %c0_i32_1 = arith.constant 0 : i32
    return %arg0, %c0_i32, %c0_i32_0 : i32, i32, i32
  }
}

</mosaic_0001>

<bundles_post_ra>
// kernel: tpu_custom_call.1
= control target key start
LH: loop header
LB: loop body
LE: loop exit
PB: predicated region body
PF: predicated region fallthrough
CT: control target
= control target key end

     0   :  { %s4555_s0 = inlined_call_operand.hbm [shape: f32[2,16,128], index: 0, kind: input, shape index: {}]   ;;  %s4556_s1 = inlined_call_operand.vmem [shape: f32[1,128], index: 1, kind: input, shape index: {}]   ;;  %s4557_s2 = inlined_call_operand.vmem [shape: f32[1,128], index: 2, kind: input, shape index: {}]   ;;  %s4558_s3 = inlined_call_operand.hbm [shape: bf16[128,128], index: 3, kind: input, shape index: {}]   ;;  %s4559_s4 = inlined_call_operand.hbm [shape: bf16[128,128], index: 4, kind: input, shape index: {}]   ;;  %s4560_s5 = inlined_call_operand.hbm [shape: bf16[128,128], index: 5, kind: input, shape index: {}]   ;;  %s4561_s6 = inlined_call_operand.hbm [shape: bf16[128,128], index: 6, kind: input, shape index: {}]   ;;  %s4562_s7 = inlined_call_operand.hbm [shape: bf16[128,256], index: 7, kind: input, shape index: {}]   ;;  %s4563_s8 = inlined_call_operand.hbm [shape: bf16[256,128], index: 8, kind: input, shape index: {}]   ;;  %s4564_s9 = inlined_call_operand.hbm [shape: bf16[128,256], index: 9, kind: input, shape index: {}]   ;;  %s4565_s10 = inlined_call_operand.vmem [shape: f32[16,16], index: 10, kind: input, shape index: {}]   ;;  %s4566_s11 = inlined_call_operand.vmem [shape: f32[16,16], index: 11, kind: input, shape index: {}]   ;;  %s4567_s12 = inlined_call_operand.hbm [shape: f32[2,16,128], index: 12, kind: output, shape index: {}]  }
   0x1   :  { %4579 = sst [smem:[#allocation24_spill]] %s4556_s1 }
   0x2   :  { %4580 = sst [smem:[#allocation25_spill]] %s4557_s2 }
   0x3   :  { %4581 = sst [smem:[#allocation26_spill]] %s4558_s3 }
   0x4   :  { %4582 = sst [smem:[#allocation27_spill]] %s4560_s5 }
   0x5   :  { %4583 = sst [smem:[#allocation28_spill]] %s4566_s11 }
   0x6   :  { %4584 = sst [smem:[#allocation29_spill]] %s4567_s12 }
   0x7   :  { %17 = vsyncpa [#allocation4], 0 }
   0x8   :  { %19 = vsyncpa [#allocation4 + $0x1], 0 }
   0x9   :  { %20 = vsyncpa [#allocation7], 0 }
   0xa   :  { %21 = vsyncpa [#allocation10], 0 }
   0xb   :  { %22 = vsyncpa [#allocation13], 0 }
   0xc   :  { %23 = vsyncpa [#allocation16], 0 }
   0xd   :  { %24 = vsyncpa [#allocation5], 0 }
   0xe   :  { %26 = vsyncpa [#allocation5 + $0x1], 0  ;;  %s3711_s21 = smov 0   ;;  %s3713_s22 = smov 0  }
   0xf   :  { %s3715_s23 = smov 0   ;;  %s3717_s24 = smov 0  }
  0x10 LB: > { %s3621_s25 = smov [#allocation6]   ;;  %s3732_s27 = sadd.s32 4294967295, %s3619_s24   ;;  %s3619_s24 = sphi %s3717_s24, %s4617_s24   ;;  %s3615_s23 = sphi %s3715_s23, %s4616_s23   ;;  %s3611_s22 = sphi %s3713_s22, %s4615_s22   ;;  %s3607_s21 = sphi %s3711_s21, %s4614_s21  }
  0x11   : > { %s338_s26 = sshll.u32 %s3621_s25, 4  ;;  %p2629_p0 = scmp.ge.s32.totalorder %s3619_s24, 1  ;;  %s3737_s26 = int_to_ptr.vmem [resolvable:$true] %s338_s26 }
  0x12   : > { %p4574_p1 = scmp.eq.s32.totalorder %s3732_s27, 0  ;;  %p320_p2 = scmp.lt.s32.totalorder %s3619_s24, 3 }
  0x13   : > { %s3622_s29 = smov [#allocation9]   ;;  %s3623_s14 = smov [#allocation12]  }
  0x14   : > { %p3739_p3 = pnand %p2629_p0, %p320_p2  ;;  %s364_s30 = sshll.u32 %s3622_s29, 4  ;;  %s3752_s30 = int_to_ptr.vmem [resolvable:$true] %s364_s30 }
  0x15   : > { %s390_s15 = sshll.u32 %s3623_s14, 4  ;;  %s4587_s3 = sld [smem:[#allocation26_spill]]  ;;  %s3754_s15 = int_to_ptr.vmem [resolvable:$true] %s390_s15 }
  0x16   : > { %s4585_s28 = scalar_select %p3739_p3, 1, 0 }
  0x17   : > { %p2986_p5 = pneg %p3739_p3 }
  0x19   : > { %p3748_p6 = pnand %p2986_p5, %p4574_p1 }
  0x1b   : > { %s3311_s18 = scalar_lea.hbm %s4587_s3, 1024  ;;  %p3764_p8 = pneg %p3748_p6 }
  0x1c   : > { %p3312_p7 = scmp.ne.s32.totalorder %s4587_s3, %s3311_s18  ;;  %p3318_p11 = scmp.lt.u32.totalorder %s3311_s18, %s4587_s3 }
  0x1e   : > { %p3314_p9 = pnand %p3764_p8, %p3312_p7 }
  0x20   : > { %p3315_p10 = pneg %p3314_p9 }
  0x22   : > { %p3320_p12 = pnand %p3318_p11, %p3315_p10 }
  0x24   : > { %3323 = shalt.err (!%p3320_p12)
}
  0x25   : > { %s3324_s16 = scalar_lea.vmem %s3737_s26, 1024  ;;  %p3332_p5 = scmp.lt.s32.totalorder %s3737_s26, %s3737_s26 }
  0x26   : > { %p3325_p13 = scmp.ne.s32.totalorder %s3737_s26, %s3324_s16  ;;  %p3333_p4 = scmp.lt.s32.totalorder %s3324_s16, %s3324_s16 }
  0x28   : > { %p3327_p0 = pnand %p3325_p13, %p3764_p8  ;;  %p3334_p7 = por %p3333_p4, %p3332_p5 }
  0x2a   : > { %p3328_p2 = pneg %p3327_p0 }
  0x2c   : > { %p3335_p9 = pnand %p3334_p7, %p3328_p2 }
  0x2e   : > { %3338 = shalt.err (!%p3335_p9)
}
  0x2f   : > { %s4570_s17 = smov 64   ;;  %s4572_s18 = smov 4  }
  0x30   : > { %2989 = dma.hbm_to_vmem [thread:$0]  (!%p3748_p6), %s4587_s3, 1024, %s3737_s26, [#allocation7], %s4570_s17, %s4570_s17, %s4572_s18  }
  0x31   : > { %s4589_s5 = sld [smem:[#allocation27_spill]] }
  0x37   : > { %s3339_s16 = scalar_lea.hbm %s4589_s5, 1024 }
  0x38   : > { %p3340_p4 = scmp.ne.s32.totalorder %s4589_s5, %s3339_s16  ;;  %p3346_p12 = scmp.lt.u32.totalorder %s3339_s16, %s4589_s5 }
  0x3a   : > { %p3342_p10 = pnand %p3340_p4, %p3764_p8 }
  0x3c   : > { %p3343_p11 = pneg %p3342_p10 }
  0x3e   : > { %p3348_p13 = pnand %p3346_p12, %p3343_p11 }
  0x40   : > { %3351 = shalt.err (!%p3348_p13)
}
  0x41   : > { %s3352_s26 = scalar_lea.vmem %s3752_s30, 1024  ;;  %p3360_p7 = scmp.lt.s32.totalorder %s3752_s30, %s3752_s30 }
  0x42   : > { %p3353_p0 = scmp.ne.s32.totalorder %s3752_s30, %s3352_s26  ;;  %p3361_p9 = scmp.lt.s32.totalorder %s3352_s26, %s3352_s26 }
  0x44   : > { %p3355_p2 = pnand %p3353_p0, %p3764_p8  ;;  %p3362_p4 = por %p3361_p9, %p3360_p7 }
  0x46   : > { %p3356_p5 = pneg %p3355_p2 }
  0x48   : > { %p3363_p10 = pnand %p3362_p4, %p3356_p5 }
  0x4a   : > { %3366 = shalt.err (!%p3363_p10)
}
  0x4b   : > { %2995 = dma.hbm_to_vmem [thread:$0]  (!%p3748_p6), %s4589_s5, 1024, %s3752_s30, [#allocation10], %s4570_s17, %s4570_s17, %s4572_s18  }
  0x4c   : > { %s3367_s19 = scalar_lea.hbm %s4562_s7, 2048 }
  0x4d   : > { %p3368_p11 = scmp.ne.s32.totalorder %s4562_s7, %s3367_s19  ;;  %p3374_p0 = scmp.lt.u32.totalorder %s3367_s19, %s4562_s7 }
  0x4f   : > { %p3370_p12 = pnand %p3368_p11, %p3764_p8 }
  0x51   : > { %p3371_p13 = pneg %p3370_p12 }
  0x53   : > { %p3376_p2 = pnand %p3374_p0, %p3371_p13 }
  0x55   : > { %3379 = shalt.err (!%p3376_p2)
}
  0x56   : > { %s3380_s30 = scalar_lea.vmem %s3754_s15, 2048  ;;  %p3388_p4 = scmp.lt.s32.totalorder %s3754_s15, %s3754_s15 }
  0x57   : > { %p3381_p5 = scmp.ne.s32.totalorder %s3754_s15, %s3380_s30  ;;  %p3389_p10 = scmp.lt.s32.totalorder %s3380_s30, %s3380_s30 }
  0x59   : > { %p3383_p7 = pnand %p3381_p5, %p3764_p8  ;;  %p3390_p11 = por %p3389_p10, %p3388_p4 }
  0x5b   : > { %p3384_p9 = pneg %p3383_p7 }
  0x5d   : > { %p3391_p12 = pnand %p3390_p11, %p3384_p9 }
  0x5f   : > { %3394 = shalt.err (!%p3391_p12)
}
  0x60   : > { %s4576_s26 = smov 128   ;;  %s3627_s1 = smov 8  }
  0x61   : > { %3001 = dma.hbm_to_vmem [thread:$0]  (!%p3748_p6), %s4562_s7, 2048, %s3754_s15, [#allocation13], %s4576_s26, %s4576_s26, %s3627_s1  }
  0x62   : > { %s3628_s12 = smov [#allocation8]   ;;  %s3629_s20 = smov [#allocation11]  }
  0x63   : > { %s351_s19 = sshll.u32 %s3628_s12, 4  ;;  %s377_s29 = sshll.u32 %s3629_s20, 4  ;;  %s352_s19 = int_to_ptr.vmem [resolvable:$true] %s351_s19  ;;  %s378_s29 = int_to_ptr.vmem [resolvable:$true] %s377_s29 }
  0x64   : > { %s3395_s30 = scalar_lea.hbm %s4559_s4, 1024 }
  0x65   : > { %p3396_p13 = scmp.ne.s32.totalorder %s4559_s4, %s3395_s30  ;;  %p3402_p5 = scmp.lt.u32.totalorder %s3395_s30, %s4559_s4 }
  0x67   : > { %p3398_p0 = pnand %p3396_p13, %p3764_p8 }
  0x69   : > { %p3399_p2 = pneg %p3398_p0 }
  0x6b   : > { %p3404_p7 = pnand %p3402_p5, %p3399_p2 }
  0x6d   : > { %3407 = shalt.err (!%p3404_p7)
}
  0x6e   : > { %s3408_s15 = scalar_lea.vmem %s352_s19, 1024  ;;  %p3416_p11 = scmp.lt.s32.totalorder %s352_s19, %s352_s19 }
  0x6f   : > { %p3409_p9 = scmp.ne.s32.totalorder %s352_s19, %s3408_s15  ;;  %p3417_p12 = scmp.lt.s32.totalorder %s3408_s15, %s3408_s15 }
  0x71   : > { %p3411_p4 = pnand %p3409_p9, %p3764_p8  ;;  %p3418_p1 = por %p3417_p12, %p3416_p11 }
  0x73   : > { %p3412_p10 = pneg %p3411_p4 }
  0x75   : > { %p3419_p3 = pnand %p3418_p1, %p3412_p10 }
  0x77   : > { %3422 = shalt.err (!%p3419_p3)
}
  0x78   : > { %s4590_s17 = smov 4   ;;  %s4591_s18 = smov 64  }
  0x79   : > { %2992 = dma.hbm_to_vmem [thread:$0]  (!%p3748_p6), %s4559_s4, 1024, %s352_s19, [#allocation7], %s4591_s18, %s4591_s18, %s4590_s17  }
  0x7a   : > { %s3423_s12 = scalar_lea.hbm %s4561_s6, 1024 }
  0x7b   : > { %p3424_p1 = scmp.ne.s32.totalorder %s4561_s6, %s3423_s12  ;;  %p3430_p0 = scmp.lt.u32.totalorder %s3423_s12, %s4561_s6 }
  0x7d   : > { %p3426_p3 = pnand %p3424_p1, %p3764_p8 }
  0x7f   : > { %p3427_p13 = pneg %p3426_p3 }
  0x81   : > { %p3432_p2 = pnand %p3430_p0, %p3427_p13 }
  0x83   : > { %3435 = shalt.err (!%p3432_p2)
}
  0x84   : > { %s3436_s15 = scalar_lea.vmem %s378_s29, 1024  ;;  %p3444_p4 = scmp.lt.s32.totalorder %s378_s29, %s378_s29 }
  0x85   : > { %p3437_p5 = scmp.ne.s32.totalorder %s378_s29, %s3436_s15  ;;  %p3445_p10 = scmp.lt.s32.totalorder %s3436_s15, %s3436_s15 }
  0x87   : > { %p3439_p7 = pnand %p3437_p5, %p3764_p8  ;;  %p3446_p11 = por %p3445_p10, %p3444_p4 }
  0x89   : > { %p3440_p9 = pneg %p3439_p7 }
  0x8b   : > { %p3447_p12 = pnand %p3446_p11, %p3440_p9 }
  0x8d   : > { %3450 = shalt.err (!%p3447_p12)
}
  0x8e   : > { %2998 = dma.hbm_to_vmem [thread:$0]  (!%p3748_p6), %s4561_s6, 1024, %s378_s29, [#allocation10], %s4591_s18, %s4591_s18, %s4590_s17  }
  0x8f   : > { %s3630_s5 = smov [#allocation14]   ;;  %s3631_s11 = smov [#allocation15]  }
  0x90   : > { %s403_s2 = sshll.u32 %s3630_s5, 4  ;;  %s416_s12 = sshll.u32 %s3631_s11, 4  ;;  %s404_s2 = int_to_ptr.vmem [resolvable:$true] %s403_s2  ;;  %s417_s12 = int_to_ptr.vmem [resolvable:$true] %s416_s12 }
  0x91   : > { %s3451_s16 = scalar_lea.hbm %s4563_s8, 2048 }
  0x92   : > { %p3452_p1 = scmp.ne.s32.totalorder %s4563_s8, %s3451_s16  ;;  %p3458_p0 = scmp.lt.u32.totalorder %s3451_s16, %s4563_s8 }
  0x94   : > { %p3454_p3 = pnand %p3452_p1, %p3764_p8 }
  0x96   : > { %p3455_p13 = pneg %p3454_p3 }
  0x98   : > { %p3460_p2 = pnand %p3458_p0, %p3455_p13 }
  0x9a   : > { %3463 = shalt.err (!%p3460_p2)
}
  0x9b   : > { %s3464_s29 = scalar_lea.vmem %s404_s2, 2048  ;;  %p3472_p4 = scmp.lt.s32.totalorder %s404_s2, %s404_s2 }
  0x9c   : > { %p3465_p5 = scmp.ne.s32.totalorder %s404_s2, %s3464_s29  ;;  %p3473_p10 = scmp.lt.s32.totalorder %s3464_s29, %s3464_s29 }
  0x9e   : > { %p3467_p7 = pnand %p3465_p5, %p3764_p8  ;;  %p3474_p11 = por %p3473_p10, %p3472_p4 }
  0xa0   : > { %p3468_p9 = pneg %p3467_p7 }
  0xa2   : > { %p3475_p12 = pnand %p3474_p11, %p3468_p9 }
  0xa4   : > { %3478 = shalt.err (!%p3475_p12)
}
  0xa5   : > { %3004 = dma.hbm_to_vmem [thread:$0]  (!%p3748_p6), %s4563_s8, 2048, %s404_s2, [#allocation13], %s4591_s18, %s4591_s18, %s4590_s17  }
  0xa6   : > { %s3479_s20 = scalar_lea.hbm %s4564_s9, 2048 }
  0xa7   : > { %p3480_p1 = scmp.ne.s32.totalorder %s4564_s9, %s3479_s20  ;;  %p3486_p0 = scmp.lt.u32.totalorder %s3479_s20, %s4564_s9 }
  0xa9   : > { %p3482_p3 = pnand %p3480_p1, %p3764_p8 }
  0xab   : > { %p3483_p13 = pneg %p3482_p3 }
  0xad   : > { %p3488_p2 = pnand %p3486_p0, %p3483_p13 }
  0xaf   : > { %3491 = shalt.err (!%p3488_p2)
}
  0xb0   : > { %s3492_s19 = scalar_lea.vmem %s417_s12, 2048  ;;  %p3500_p4 = scmp.lt.s32.totalorder %s417_s12, %s417_s12 }
  0xb1   : > { %p3493_p5 = scmp.ne.s32.totalorder %s417_s12, %s3492_s19  ;;  %p3501_p10 = scmp.lt.s32.totalorder %s3492_s19, %s3492_s19 }
  0xb3   : > { %p3495_p7 = pnand %p3493_p5, %p3764_p8  ;;  %p3502_p11 = por %p3501_p10, %p3500_p4 }
  0xb5   : > { %p3496_p9 = pneg %p3495_p7 }
  0xb7   : > { %p3503_p12 = pnand %p3502_p11, %p3496_p9 }
  0xb9   : > { %3506 = shalt.err (!%p3503_p12)
}
  0xba   : > { %s4592_s17 = smov 128   ;;  %s2628_s13 = sadd.s32 4294967294, %s3619_s24  }
  0xbb   : > { %3007 = dma.hbm_to_vmem [thread:$0]  (!%p3748_p6), %s4564_s9, 2048, %s417_s12, [#allocation16], %s4592_s17, %s4592_s17, %s3627_s1  }
  0xbc   : > { %s3926_s25 = sadd.s32 1, %s3619_s24   ;;  %s39_s29 = sadd.s32 1, %s3615_s23 }
  0xbd   : > { %s36_s26 = ssub.s32 %s3619_s24, %s3926_s25  ;;  %p46_p8 = scmp.ne.s32.totalorder %s3615_s23, %s3611_s22 }
  0xbe   : > { %p37_p1 = scmp.eq.s32.totalorder %s36_s26, 0  ;;  %p47_p3 = scmp.eq.s32.totalorder %s3619_s24, 0 }
  0xbf   : > { %p52_p13 = scmp.ne.s32.totalorder %s3611_s22, %s3607_s21  ;;  %p307_p0 = scmp.eq.s32.totalorder %s3732_s27, 1 }
  0xc0   : > { %s3938_s3 = scalar_select %p37_p1, %s3615_s23, %s39_s29  }
  0xc1   : > { %p48_p2 = por %p47_p3, %p46_p8  ;;  %p4593_p5 = scmp.eq.s32.totalorder %s3732_s27, 0 }
  0xc2   : > { %p3946_p6 = por %p307_p0, %p46_p8  ;;  %p313_p9 = scmp.eq.s32.totalorder %s2628_s13, 1 }
  0xc3   : > { %p3942_p7 = por %p4593_p5, %p52_p13  ;;  %p3023_p4 = scmp.lt.s32.totalorder %s3619_s24, 2 }
  0xc4   : > { %s4595_s12 = scalar_select %p3946_p6, 1, 0 }
  0xc5   : > { %s436_s11 = sand.u32 1, %s3615_s23   ;;  %p3952_p10 = por %p313_p9, %p52_p13 }
  0xc6   : > { %s2638_s14 = sshll.u32 %s436_s11, 4  ;;  %s2750_s16 = sshll.u32 %s3619_s24, 8 }
  0xc7   : > { %s4596_s20 = scalar_select %p3952_p10, 1, 0 }
  0xc8   : > { %s3960_s19 = scalar_lea.hbm %s4555_s0, %s2750_s16  ;;  %s440_s18 = scalar_lea.vmem [#allocation3], %s2638_s14 }
  0xc9   : > { %s447_s2 = sshll.u32 %s440_s18, 4  ;;  %p3962_p11 = pnand %p3023_p4, %p48_p2  ;;  %s3966_s2 = int_to_ptr.vmem [resolvable:$true] %s447_s2 }
  0xca   : > { %s3968_s29 = scalar_lea.sflag [#allocation4], %s436_s11  ;;  %s3507_s26 = scalar_lea.hbm %s3960_s19, 256 }
  0xcb   : > { %p3508_p12 = scmp.ne.s32.totalorder %s3960_s19, %s3507_s26  ;;  %p3509_p8 = pneg %p3962_p11 }
  0xcc   : > { %s3512_s30 = scalar_lea.hbm %s4555_s0, 512  ;;  %p3513_p13 = scmp.lt.u32.totalorder %s3960_s19, %s4555_s0 }
  0xcd   : > { %p3510_p1 = pnand %p3509_p8, %p3508_p12  ;;  %p3514_p0 = scmp.lt.u32.totalorder %s3512_s30, %s3507_s26 }
  0xce   : > { %p3516_p5 = scmp.lt.u32.totalorder %s3507_s26, %s3960_s19 }
  0xcf   : > { %p3511_p3 = pneg %p3510_p1  ;;  %p3515_p2 = por %p3514_p0, %p3513_p13 }
  0xd1   : > { %p3517_p9 = por %p3516_p5, %p3515_p2 }
  0xd3   : > { %p3518_p4 = pnand %p3517_p9, %p3511_p3 }
  0xd5   : > { %3521 = shalt.err (!%p3518_p4)
}
  0xd6   : > { %s3522_s11 = scalar_lea.vmem %s3966_s2, 256  ;;  %s3632_s14 = smov [#allocation3]  }
  0xd7   : > { %p3523_p12 = scmp.ne.s32.totalorder %s3966_s2, %s3522_s11  ;;  %s3527_s16 = sshll.u32 %s3632_s14, 4  ;;  %s3528_s16 = int_to_ptr.vmem [resolvable:$false] %s3527_s16 }
  0xd8   : > { %s3529_s15 = scalar_lea.vmem %s3528_s16, 512  ;;  %p3530_p6 = scmp.lt.s32.totalorder %s3966_s2, %s3528_s16 }
  0xd9   : > { %p3525_p1 = pnand %p3523_p12, %p3509_p8  ;;  %p3531_p13 = scmp.lt.s32.totalorder %s3529_s15, %s3522_s11 }
  0xdb   : > { %p3526_p10 = pneg %p3525_p1  ;;  %p3532_p0 = por %p3531_p13, %p3530_p6 }
  0xdd   : > { %p3533_p2 = pnand %p3532_p0, %p3526_p10 }
  0xdf   : > { %3536 = shalt.err (!%p3533_p2)
}
  0xe0   : > { %3011 = dma.hbm_to_vmem [thread:$0]  (!%p3962_p11), %s3960_s19, 256, %s3966_s2, %s3968_s29, %s4592_s17, %s4592_s17, %s3627_s1  }
  0xe1   : > { %p4598_p8 = scmp.ne.s32.totalorder %s4585_s28, 0 }
  0xe2   : > { %s4002_s26 = sand.u32 (!%p4598_p8), 1, %s3611_s22  }
  0xe3   : > { %459 = sbr.rel (%p4598_p8) target bundleno = 3183 (0xc6f), region = 68  ;;  %s2642_s30 = sshll.u32 (!%p4598_p8), %s4002_s26, 4 }
  0xe4   : > { %s462_s18 = scalar_lea.sflag (!%p4598_p8), [#allocation4], %s4002_s26  ;;  %s4008_s13 = scalar_lea.vmem (!%p4598_p8), [#allocation3], %s2642_s30 }
  0xea   : > { %3582 = dma.done.wait (%p3942_p7), %s462_s18, 256  }
  0xeb   : > { %3584 = vsyncadd (%p3942_p7), %s462_s18, 4294967040  ;;  %p4599_p6 = scmp.eq.s32.totalorder %s3732_s27, 0 }
  0xed   : > { %3586 = dma.done.wait (%p4599_p6), [#allocation7], 2048   ;;  %p4600_p10 = pmov %p4599_p6 }
  0xee   : > { %p4601_p11 = pmov %p4599_p6 }
  0xef   : > { %3588 = vsyncadd (%p4600_p10), [#allocation7], 4294965248 }
  0xf0   : > { %3590 = dma.done.wait (%p4601_p11), [#allocation10], 2048   ;;  %p4602_p3 = pmov %p4599_p6 }
  0xf2   : > { %3592 = vsyncadd (%p4602_p3), [#allocation10], 4294965248  ;;  %p4603_p5 = pmov %p4602_p3 }
  0xf3   : > { %p4604_p9 = pmov %p4602_p3 }
  0xf4   : > { %3594 = dma.done.wait (%p4603_p5), [#allocation13], 4096  }
  0xf5   : > { %3596 = vsyncadd (%p4604_p9), [#allocation13], 4294963200  ;;  %p4605_p7 = pmov %p4602_p3 }
  0xf6   : > { %p4606_p4 = pmov %p4602_p3 }
  0xf7   : > { %3598 = dma.done.wait (%p4605_p7), [#allocation16], 2048  }
  0xf8   : > { %3600 = vsyncadd (%p4606_p4), [#allocation16], 4294965248  ;;  %v3633_v0 = vmov 0.0   ;;  %v4033_v1 = vld [vmem:[%s4008_s13] sm:$0xff]  ;;  %v4036_v2 = vld [vmem:[%s4008_s13 + $0x8] sm:$0xff]  ;;  %vm3634_vm0 = vmmov 0  }
  0xf9   : > { %2826 = vmatprep.subr.bf16.mxu0 %v3633_v0  ;;  %2846 = vmatprep.subr.bf16.mxu1 %v3633_v0  ;;  %v538_v3 = vmul.f32 %v4033_v1, %v4033_v1  ;;  %v3157_v4 = vld [vmem:[#allocation6] sm:$0xff]   ;;  %v539_v6 = vmul.f32 %v4036_v2, %v4036_v2  ;;  %v3159_v7 = vld [vmem:[#allocation6 + $0x8] sm:$0xff]   ;;  %v3161_v9 = vld [vmem:[#allocation6 + $0x10] sm:$0xff]   ;;  %s4607_s19 = sld [smem:[#allocation28_spill]]  ;;  %s3635_s2 = smov 16   ;;  %vm939_vm1 = vcmask 130048  }
  0xfa   : > { %v3158_v5 = vld [vmem:[#allocation8] sm:$0xff]   ;;  %2827 = vmatpush3.bf16.msra.mxu0 %v3157_v4  ;;  %v3160_v8 = vld [vmem:[#allocation8 + $0x8] sm:$0xff]   ;;  %v3162_v10 = vld [vmem:[#allocation8 + $0x10] sm:$0xff]   ;;  %2842 = vmatprep.mubr.msk.bf16.mxu0 %vm3634_vm0, %v3633_v0  ;;  %s4608_s28 = sld [smem:[#allocation24_spill]]  ;;  %s3636_s1 = smov 112   ;;  %vm983_vm2 = vcmask 261120  }
  0xfb   : > { %540 = vadd.xlane.f32.xlu0 %v538_v3  ;;  %2847 = vmatpush3.bf16.msra.mxu1 %v3158_v5  ;;  %v3163_v11 = vld [vmem:[#allocation6 + $0x18] sm:$0xff]   ;;  %v3165_v13 = vld [vmem:[#allocation6 + $0x20] sm:$0xff]   ;;  %v3167_v15 = vld [vmem:[#allocation6 + $0x28] sm:$0xff]   ;;  %s3637_s17 = smov 48   ;;  %s3638_s5 = smov 80   ;;  %vm1352_vm5 = vcmask 523520  }
  0xfc   : > { %2828 = vmatprep.subr.bf16.mxu0 %v3633_v0  ;;  %2848 = vmatprep.subr.bf16.mxu1 %v3633_v0  ;;  %v3164_v12 = vld [vmem:[#allocation8 + $0x18] sm:$0xff]   ;;  %v3166_v14 = vld [vmem:[#allocation8 + $0x20] sm:$0xff]   ;;  %v3168_v16 = vld [vmem:[#allocation8 + $0x28] sm:$0xff]   ;;  %s3640_s29 = smov 64   ;;  %s3641_s11 = smov 96   ;;  %vm1602_vm6 = vcmask 785920  }
  0xfd   : > { %v3169_v17 = vld [vmem:[#allocation6 + $0x30] sm:$0xff]   ;;  %2862 = vmatprep.mubr.msk.bf16.mxu1 %vm3634_vm0, %v3633_v0  ;;  %v3171_v19 = vld [vmem:[#allocation6 + $0x38] sm:$0xff]   ;;  %v3173_v38 = vld [vmem:[#allocation9] sm:$0xff]   ;;  %vm1852_vm7 = vcmask 1048320   ;;  %s4609_s16 = sld [smem:[#allocation25_spill]]  ;;  %s533_s15 = scalar_lea.vmem [#allocation17], %s2642_s30 }
  0xfe   : > { %2829 = vmatpush3.bf16.msra.mxu0 %v3159_v7  ;;  %v3170_v18 = vld [vmem:[#allocation8 + $0x30] sm:$0xff]   ;;  %v3172_v20 = vld [vmem:[#allocation8 + $0x38] sm:$0xff]   ;;  %v3174_v40 = vld [vmem:[#allocation9 + $0x8] sm:$0xff]   ;;  %s2488_s18 = sshll.u32 %s533_s15, 4  ;;  %s2475_s30 = scalar_lea.sflag [#allocation5], %s4002_s26  ;;  %s4505_s18 = int_to_ptr.vmem [resolvable:$true] %s2488_s18 }
  0xff   : > { %542 = vadd.xlane.f32.xlu0 %v539_v6  ;;  %2849 = vmatpush3.bf16.msra.mxu1 %v3160_v8  ;;  %v4065_v21 = vld [vmem:[%s4565_s10] sm:$0xff]  ;;  %v4079_v23 = vld [vmem:[%s4565_s10 + $0x8] sm:$0xff]  ;;  %v3177_v43 = vld [vmem:[#allocation9 + $0x20] sm:$0xff]   ;;  %p4611_p1 = scmp.ne.s32.totalorder %s4595_s12, 0 }
 0x100   : > { %2830 = vmatprep.subr.bf16.mxu0 %v3633_v0  ;;  %2850 = vmatprep.subr.bf16.mxu1 %v3633_v0  ;;  %v4070_v22 = vld [vmem:[%s4607_s19] sm:$0xff]  ;;  %v4086_v24 = vld [vmem:[%s4607_s19 + $0x8] sm:$0xff]  ;;  %v3178_v44 = vld [vmem:[#allocation9 + $0x28] sm:$0xff]  }
 0x101   : > { %913 = vrot.lane.b32.xlu1 %v4065_v21, %s3635_s2  ;;  %v2651_v31 = vld [vmem:[%s4608_s28] ss:$0 sm:$0xff]  ;;  %v3176_v42 = vld [vmem:[#allocation9 + $0x18] sm:$0xff]   ;;  %s2751_s28 = sshll.u32 %s3732_s27, 8  ;;  %s3537_s27 = scalar_lea.vmem %s4505_s18, 256 }
 0x102   : > { %2831 = vmatpush3.bf16.msra.mxu0 %v3161_v9  ;;  %v552_v32 = vmul.f32 %v2651_v31, %v4033_v1  ;;  %v553_v33 = vmul.f32 %v2651_v31, %v4036_v2  ;;  %v3175_v41 = vld [vmem:[#allocation9 + $0x10] sm:$0xff]   ;;  %v3180_v46 = vld [vmem:[#allocation9 + $0x38] sm:$0xff]   ;;  %p3538_p12 = scmp.ne.s32.totalorder %s4505_s18, %s3537_s27 }
 0x103   : > { %2832 = vmatprep.subr.bf16.mxu0 %v3633_v0  ;;  %2851 = vmatpush3.bf16.msra.mxu1 %v3162_v10  ;;  %v3179_v45 = vld [vmem:[#allocation9 + $0x30] sm:$0xff]  }
 0x104   : > { %2852 = vmatprep.subr.bf16.mxu1 %v3633_v0  ;;  %p3539_p13 = pnand %p3538_p12, %p4611_p1 }
 0x105   : > { %915 = vrot.lane.b32.xlu1 %v4079_v23, %s3635_s2 }
 0x106   : > { %2833 = vmatpush3.bf16.msra.mxu0 %v3163_v11  ;;  %p3540_p0 = pneg %p3539_p13 }
 0x107   : > { %2853 = vmatpush3.bf16.msra.mxu1 %v3164_v12  ;;  %2834 = vmatprep.subr.bf16.mxu0 %v3633_v0 }
 0x108   : > { %2854 = vmatprep.subr.bf16.mxu1 %v3633_v0 }
 0x109   : > { %893 = vrot.lane.b32.xlu1 %v4086_v24, %s3635_s2 }
 0x10a   : > { %2835 = vmatpush3.bf16.msra.mxu0 %v3165_v13 }
 0x10b   : > { %2855 = vmatpush3.bf16.msra.mxu1 %v3166_v14  ;;  %2836 = vmatprep.subr.bf16.mxu0 %v3633_v0 }
 0x10c   : > { %2856 = vmatprep.subr.bf16.mxu1 %v3633_v0 }
 0x10e   : > { %2837 = vmatpush3.bf16.msra.mxu0 %v3167_v15 }
 0x10f   : > { %2857 = vmatpush3.bf16.msra.mxu1 %v3168_v16  ;;  %2838 = vmatprep.subr.bf16.mxu0 %v3633_v0 }
 0x110   : > { %2858 = vmatprep.subr.bf16.mxu1 %v3633_v0 }
 0x112   : > { %2839 = vmatpush3.bf16.msra.mxu0 %v3169_v17 }
 0x113   : > { %2859 = vmatpush3.bf16.msra.mxu1 %v3170_v18  ;;  %2840 = vmatprep.subr.bf16.mxu0 %v3633_v0 }
 0x114   : > { %2860 = vmatprep.subr.bf16.mxu1 %v3633_v0 }
 0x115   : > { %891 = vrot.lane.b32.xlu0 %v4070_v22, %s3635_s2 }
 0x116   : > { %2841 = vmatpush3.bf16.msra.mxu0 %v3171_v19 }
 0x117   : > { %2861 = vmatpush3.bf16.msra.mxu1 %v3172_v20  ;;  %2866 = vmatprep.subr.bf16.mxu0 %v3633_v0 }
 0x118   : > { %2886 = vmatprep.subr.bf16.mxu1 %v3633_v0 }
 0x173   : > { %v914_v47 = vpop.permute.xlu1 %913 }
 0x177   : > { %v916_v48 = vpop.permute.xlu1 %915 }
 0x17b   : > { %v894_v49 = vpop.permute.xlu1 %893 }
 0x188   : > { %v541_v25 = vpop.xlane.xlu0 %540 }
 0x189   : > { %v544_v26 = vmul.f32 0.0078125, %v541_v25 }
 0x18b   : > { %v554_v27 = vadd.f32 1e-05, %v544_v26 }
 0x18c   : > { %v543_v28 = vpop.xlane.xlu0 %542 }
 0x18d   : > { %v545_v29 = vmul.f32 0.0078125, %v543_v28  ;;  %3253 = vrsqrt.f32 %v554_v27 }
 0x18f   : > { %v555_v30 = vadd.f32 1e-05, %v545_v29 }
 0x190   : > { %v892_v60 = vpop.permute.xlu0 %891 }
 0x191   : > { %3255 = vrsqrt.f32 %v555_v30 }
 0x197   : > { %v3254_v34 = vpop.eup %3253 }
 0x198   : > { %v558_v36 = vmul.f32 %v3254_v34, %v552_v32 }
 0x19b   : > { %v3256_v35 = vpop.eup %3255 }
 0x19c   : > { %v559_v37 = vmul.f32 %v3256_v35, %v553_v33 }
 0x19e   : > { %v560_v39 = vpack.c.bf16 %v559_v37, %v558_v36 }
 0x1a0   : > { %2843 = vmatmul.mubr.bf16.vlgmr.msra.gmra.mrb[0].mxu0 %v560_v39  ;;  %2863 = vmatmul.mubr.bf16.vlgmr.msra.gmra.mrb[0].mxu1 %v560_v39 }
 0x1a1   : > { %2867 = vmatpush3.bf16.msra.mxu0 %v3173_v38  ;;  %2882 = vmatprep.mubr.msk.bf16.mxu0 %vm3634_vm0, %v3633_v0 }
 0x1a2   : > { %2868 = vmatprep.subr.bf16.mxu0 %v3633_v0  ;;  %2888 = vmatprep.mubr.msk.bf16.mxu1 %vm3634_vm0, %v3633_v0 }
 0x1a5   : > { %2869 = vmatpush3.bf16.msra.mxu0 %v3174_v40 }
 0x1a6   : > { %2870 = vmatprep.subr.bf16.mxu0 %v3633_v0 }
 0x1a9   : > { %2871 = vmatpush3.bf16.msra.mxu0 %v3175_v41 }
 0x1aa   : > { %2872 = vmatprep.subr.bf16.mxu0 %v3633_v0 }
 0x1ad   : > { %2873 = vmatpush3.bf16.msra.mxu0 %v3176_v42 }
 0x1ae   : > { %2874 = vmatprep.subr.bf16.mxu0 %v3633_v0 }
 0x1b1   : > { %2875 = vmatpush3.bf16.msra.mxu0 %v3177_v43 }
 0x1b2   : > { %2876 = vmatprep.subr.bf16.mxu0 %v3633_v0 }
 0x1b5   : > { %2877 = vmatpush3.bf16.msra.mxu0 %v3178_v44 }
 0x1b6   : > { %2878 = vmatprep.subr.bf16.mxu0 %v3633_v0 }
 0x1b9   : > { %2879 = vmatpush3.bf16.msra.mxu0 %v3179_v45 }
 0x1ba   : > { %2880 = vmatprep.subr.bf16.mxu0 %v3633_v0 }
 0x1bd   : > { %2881 = vmatpush3.bf16.msra.mxu0 %v3180_v46 }
 0x1be   : > { %2910 = vmatprep.subr.bf16.mxu0 %v3633_v0 }
 0x1c0   : > { %2883 = vmatmul.mubr.bf16.vlgmr.msra.gmra.mrb[4].mxu0 %v560_v39 }
 0x1c1   : > { %2912 = vmatprep.mubr.msk.bf16.mxu0 %vm3634_vm0, %v3633_v0 }
 0x273   : > { %v4109_v50 = vpop.f32.mrb[0].mxu0  ;;  %v4111_v51 = vpop.f32.mrb[0].mxu1 }
 0x274   : > { %v2844_v52 = vpop.f32.mrb[1].mxu0  ;;  %v2864_v53 = vpop.f32.mrb[1].mxu1  ;;  %v959_v54 = vmul.f32 %v914_v47, %v4111_v51  ;;  %v897_v62 = vmul.f32 %v892_v60, %v4109_v50  ;;  %v919_v63 = vmul.f32 %v914_v47, %v4109_v50  ;;  %v945_v2 = vmul.f32 %v892_v60, %v4111_v51 }
 0x275   : > { %v4114_v55 = vpop.f32.mrb[2].mxu0  ;;  %v4116_v56 = vpop.f32.mrb[2].mxu1  ;;  %v957_v9 = vmul.f32 %v4070_v22, %v4111_v51  ;;  %v909_v16 = vmul.f32 %v4070_v22, %v4109_v50  ;;  %v943_v30 = vmul.f32 %v4065_v21, %v4111_v51  ;;  %v887_v41 = vmul.f32 %v4065_v21, %v4109_v50 }
 0x276   : > { %963 = vrot.lane.b32.xlu1 %v959_v54, %s3636_s1  ;;  %v2845_v57 = vpop.f32.mrb[3].mxu0  ;;  %v2865_v58 = vpop.f32.mrb[3].mxu1  ;;  %v946_v59 = vmul.f32 %v894_v49, %v4116_v56  ;;  %v960_v61 = vmul.f32 %v916_v48, %v4116_v56  ;;  %v920_v1 = vmul.f32 %v916_v48, %v4114_v55  ;;  %v958_v10 = vmul.f32 %v4086_v24, %v4116_v56 }
 0x277   : > { %v910_v17 = vmul.f32 %v4086_v24, %v4114_v55  ;;  %v898_v18 = vmul.f32 %v894_v49, %v4114_v55  ;;  %v944_v29 = vmul.f32 %v4079_v23, %v4116_v56  ;;  %v888_v43 = vmul.f32 %v4079_v23, %v4114_v55 }
 0x278   : > { %951 = vrot.lane.b32.xlu0 %v946_v59, %s3636_s1 }
 0x27a   : > { %965 = vrot.lane.b32.xlu1 %v960_v61, %s3636_s1 }
 0x27c   : > { %901 = vrot.lane.b32.xlu0 %v897_v62, %s3636_s1 }
 0x27e   : > { %923 = vrot.lane.b32.xlu1 %v919_v63, %s3636_s1 }
 0x282   : > { %925 = vrot.lane.b32.xlu1 %v920_v1, %s3636_s1 }
 0x286   : > { %949 = vrot.lane.b32.xlu1 %v945_v2, %s3636_s1 }
 0x293   : > { %v869_v3 = vpop.f32.mrb[4].mxu0 }
 0x294   : > { %v2884_v4 = vpop.f32.mrb[5].mxu0 }
 0x295   : > { %v872_v5 = vpop.f32.mrb[6].mxu0 }
 0x296   : > { %v4131_v6 = vpack.c.bf16 %v872_v5, %v869_v3  ;;  %v2885_v7 = vpop.f32.mrb[7].mxu0 }
 0x2e8   : > { %v964_v8 = vpop.permute.xlu1 %963 }
 0x2e9   : > { %v969_v12 = vadd.f32 %v964_v8, %v957_v9 }
 0x2ea   : > { %v952_v28 = vpop.permute.xlu0 %951 }
 0x2eb   : > { %v956_v32 = vsub.f32 %v944_v29, %v952_v28 }
 0x2ec   : > { %v966_v11 = vpop.permute.xlu1 %965 }
 0x2ed   : > { %v970_v13 = vadd.f32 %v966_v11, %v958_v10 }
 0x2ee   : > { %v902_v38 = vpop.permute.xlu0 %901 }
 0x2ef   : > { %v3087_v14 = vpack.i.bf16 %v970_v13, %v969_v12  ;;  %v907_v44 = vsub.f32 %v887_v41, %v902_v38 }
 0x2f0   : > { %v924_v15 = vpop.permute.xlu1 %923 }
 0x2f1   : > { %3088 = vrot.lane.b32.xlu1 %v3087_v14, %s3635_s2  ;;  %v929_v20 = vadd.f32 %v924_v15, %v909_v16 }
 0x2f4   : > { %v926_v19 = vpop.permute.xlu1 %925 }
 0x2f5   : > { %v930_v25 = vadd.f32 %v926_v19, %v910_v17  ;;  %903 = vrot.lane.b32.xlu1 %v898_v18, %s3636_s1 }
 0x2f7   : > { %v3092_v26 = vpack.i.bf16 %v930_v25, %v929_v20 }
 0x2f8   : > { %v950_v27 = vpop.permute.xlu1 %949 }
 0x2f9   : > { %1112 = vrot.lane.b32.xlu1 %v4070_v22, %s3637_s17  ;;  %3093 = vrot.lane.b32.xlu0 %v3092_v26, %s3635_s2  ;;  %s3639_s2 = smov 32   ;;  %v955_v33 = vsub.f32 %v943_v30, %v950_v27 }
 0x2fd   : > { %1138 = vrot.lane.b32.xlu1 %v4065_v21, %s3637_s17  ;;  %1114 = vrot.lane.b32.xlu0 %v4086_v24, %s3637_s17 }
 0x301   : > { %1365 = vrot.lane.b32.xlu1 %v4086_v24, %s3638_s5  ;;  %1140 = vrot.lane.b32.xlu0 %v4079_v23, %s3637_s17 }
 0x305   : > { %1389 = vrot.lane.b32.xlu1 %v4065_v21, %s3638_s5  ;;  %1363 = vrot.lane.b32.xlu0 %v4070_v22, %s3638_s5 }
 0x309   : > { %1613 = vrot.lane.b32.xlu1 %v4070_v22, %s3636_s1  ;;  %1391 = vrot.lane.b32.xlu0 %v4079_v23, %s3638_s5 }
 0x30d   : > { %1639 = vrot.lane.b32.xlu1 %v4065_v21, %s3636_s1  ;;  %1615 = vrot.lane.b32.xlu0 %v4086_v24, %s3636_s1 }
 0x311   : > { %1104 = vrot.lane.b32.xlu1 %v4065_v21, %s3639_s2  ;;  %1641 = vrot.lane.b32.xlu0 %v4079_v23, %s3636_s1 }
 0x315   : > { %1130 = vrot.lane.b32.xlu1 %v4070_v22, %s3639_s2  ;;  %1106 = vrot.lane.b32.xlu0 %v4079_v23, %s3639_s2 }
 0x319   : > { %1132 = vrot.lane.b32.xlu0 %v4086_v24, %s3639_s2 }
 0x363   : > { %v3089_v31 = vpop.permute.xlu1 %3088 }
 0x364   : > { %v3091_v34 = vunpack.i.h.bf16 %v3089_v31  ;;  %v3090_v35 = vunpack.i.l.bf16 %v3089_v31 }
 0x366   : > { %v979_v36 = vsel %vm939_vm1, %v955_v33, %v3090_v35  ;;  %v980_v37 = vsel %vm939_vm1, %v956_v32, %v3091_v34 }
 0x367   : > { %v904_v39 = vpop.permute.xlu1 %903  ;;  %v981_v40 = vpack.c.bf16 %v980_v37, %v979_v36 }
 0x368   : > { %v908_v47 = vsub.f32 %v888_v43, %v904_v39 }
 0x369   : > { %v988_v42 = vsel %vm983_vm2, %v981_v40, 0 }
 0x36a   : > { %2887 = vmatpush3.bf16.xpose.msra.mxu1 %v988_v42 }
 0x36b   : > { %v1113_v45 = vpop.permute.xlu1 %1112  ;;  %v3094_v46 = vpop.permute.xlu0 %3093  ;;  %2892 = vmatprep.subr.bf16.mxu1 %v3633_v0 }
 0x36c   : > { %v1177_v48 = vmul.f32 %v1113_v45, %v4111_v51  ;;  %v3096_v49 = vunpack.i.h.bf16 %v3094_v46  ;;  %v3095_v52 = vunpack.i.l.bf16 %v3094_v46  ;;  %v1118_v8 = vmul.f32 %v1113_v45, %v4109_v50 }
 0x36e   : > { %v941_v53 = vsel %vm939_vm1, %v908_v47, %v3096_v49  ;;  %v940_v54 = vsel %vm939_vm1, %v907_v44, %v3095_v52  ;;  %1181 = vrot.lane.b32.xlu1 %v1177_v48, %s3636_s1 }
 0x36f   : > { %v942_v57 = vpack.c.bf16 %v941_v53, %v940_v54  ;;  %v1139_v58 = vpop.permute.xlu1 %1138  ;;  %v1115_v59 = vpop.permute.xlu0 %1114 }
 0x370   : > { %v1191_v60 = vmul.f32 %v1139_v58, %v4111_v51  ;;  %v1178_v61 = vmul.f32 %v1115_v59, %v4116_v56  ;;  %v1144_v9 = vmul.f32 %v1139_v58, %v4109_v50  ;;  %v1119_v10 = vmul.f32 %v1115_v59, %v4114_v55 }
 0x371   : > { %2889 = vmatmul.mubr.msk.bf16.vlgmr.msra.gmra.mrb[4].mxu1 %vm983_vm2, %v942_v57 }
 0x372   : > { %1195 = vrot.lane.b32.xlu1 %v1191_v60, %s3636_s1  ;;  %1183 = vrot.lane.b32.xlu0 %v1178_v61, %s3636_s1 }
 0x373   : > { %2893 = vmatpush3.bf16.msra.mxu1 %v4131_v6  ;;  %v1366_v62 = vpop.permute.xlu1 %1365  ;;  %v1141_v63 = vpop.permute.xlu0 %1140  ;;  %2894 = vmatprep.mubr.msk.bf16.mxu1 %vm3634_vm0, %v3633_v0 }
 0x374   : > { %v4202_v1 = vmul.f32 %v1366_v62, %v4114_v55  ;;  %v1192_v2 = vmul.f32 %v1141_v63, %v4116_v56  ;;  %2898 = vmatprep.subr.bf16.mxu1 %v3633_v0  ;;  %v1145_v11 = vmul.f32 %v1141_v63, %v4114_v55  ;;  %v1429_v13 = vmul.f32 %v1366_v62, %v4116_v56 }
 0x376   : > { %1355 = vrot.lane.b32.xlu1 %v4065_v21, %s3640_s29  ;;  %1197 = vrot.lane.b32.xlu0 %v1192_v2, %s3636_s1 }
 0x377   : > { %v1390_v3 = vpop.permute.xlu1 %1389  ;;  %v1364_v4 = vpop.permute.xlu0 %1363 }
 0x378   : > { %v4210_v5 = vmul.f32 %v1390_v3, %v4109_v50  ;;  %v4213_v7 = vmul.f32 %v1364_v4, %v4109_v50  ;;  %v1428_v12 = vmul.f32 %v1364_v4, %v4111_v51  ;;  %v1442_v14 = vmul.f32 %v1390_v3, %v4111_v51 }
 0x37a   : > { %1381 = vrot.lane.b32.xlu1 %v4070_v22, %s3640_s29  ;;  %1357 = vrot.lane.b32.xlu0 %v4079_v23, %s3640_s29 }
 0x37b   : > { %v4235_v15 = vpop.permute.xlu0 %1391  ;;  %v4237_v16 = vpop.permute.xlu1 %1613 }
 0x37e   : > { %1122 = vrot.lane.b32.xlu1 %v1118_v8, %s3636_s1  ;;  %1383 = vrot.lane.b32.xlu0 %v4086_v24, %s3640_s29 }
 0x37f   : > { %v4239_v17 = vpop.permute.xlu0 %1615  ;;  %v4241_v18 = vpop.permute.xlu1 %1639 }
 0x382   : > { %1148 = vrot.lane.b32.xlu1 %v1144_v9, %s3636_s1  ;;  %1124 = vrot.lane.b32.xlu0 %v1119_v10, %s3636_s1 }
 0x383   : > { %v4243_v19 = vpop.permute.xlu0 %1641  ;;  %v1105_v20 = vpop.permute.xlu1 %1104 }
 0x384   : > { %v1175_v29 = vmul.f32 %v1105_v20, %v4111_v51  ;;  %v1110_v59 = vmul.f32 %v1105_v20, %v4109_v50 }
 0x386   : > { %1150 = vrot.lane.b32.xlu0 %v1145_v11, %s3636_s1  ;;  %1432 = vrot.lane.b32.xlu1 %v1428_v12, %s3636_s1 }
 0x387   : > { %v1107_v25 = vpop.permute.xlu0 %1106  ;;  %v1131_v26 = vpop.permute.xlu1 %1130 }
 0x388   : > { %v1176_v30 = vmul.f32 %v1107_v25, %v4116_v56  ;;  %v1189_v35 = vmul.f32 %v1131_v26, %v4111_v51  ;;  %v1111_v60 = vmul.f32 %v1107_v25, %v4114_v55  ;;  %v1136_v3 = vmul.f32 %v1131_v26, %v4109_v50 }
 0x38a   : > { %1434 = vrot.lane.b32.xlu0 %v1429_v13, %s3636_s1  ;;  %1446 = vrot.lane.b32.xlu1 %v1442_v14, %s3636_s1 }
 0x38b   : > { %v1133_v27 = vpop.permute.xlu0 %1132 }
 0x38c   : > { %v1190_v36 = vmul.f32 %v1133_v27, %v4116_v56  ;;  %v1137_v4 = vmul.f32 %v1133_v27, %v4114_v55 }
 0x3e0   : > { %v1182_v28 = vpop.permute.xlu1 %1181 }
 0x3e1   : > { %v1187_v33 = vsub.f32 %v1175_v29, %v1182_v28  ;;  %v880_v29 = vlaneseq }
 0x3e3   : > { %v4291_v26 = vand.u32 127, %v880_v29 }
 0x3e4   : > { %v1196_v31 = vpop.permute.xlu1 %1195  ;;  %v1184_v32 = vpop.permute.xlu0 %1183 }
 0x3e5   : > { %v1188_v34 = vsub.f32 %v1176_v30, %v1184_v32  ;;  %v4251_v40 = vadd.f32 %v1196_v31, %v1189_v35  ;;  %v4289_v30 = vshrl.u32 %v880_v29, 7 }
 0x3e7   : > { %v4249_v37 = vpack.i.bf16 %v1188_v34, %v1187_v33  ;;  %v4294_v27 = vadd.s32 8, %v4289_v30  ;;  %vm885_vm3 = vcmp.le.s32.totalorder %v4291_v26, %v4289_v30 }
 0x3e8   : > { %v1356_v38 = vpop.permute.xlu1 %1355  ;;  %v1198_v39 = vpop.permute.xlu0 %1197 }
 0x3e9   : > { %v4254_v41 = vmul.f32 %v1356_v38, %v4109_v50  ;;  %v1426_v42 = vmul.f32 %v1356_v38, %v4111_v51  ;;  %v4257_v43 = vadd.f32 %v1198_v39, %v1190_v36  ;;  %vm886_vm4 = vcmp.le.s32.totalorder %v4291_v26, %v4294_v27 }
 0x3eb   : > { %v3102_v44 = vpack.i.bf16 %v4257_v43, %v4251_v40 }
 0x3ec   : > { %v1382_v45 = vpop.permute.xlu1 %1381  ;;  %v1358_v46 = vpop.permute.xlu0 %1357 }
 0x3ed   : > { %v4262_v47 = vmul.f32 %v1382_v45, %v4109_v50  ;;  %v4265_v48 = vmul.f32 %v1382_v45, %v4111_v51  ;;  %v4268_v49 = vmul.f32 %v1358_v46, %v4114_v55  ;;  %v1427_v52 = vmul.f32 %v1358_v46, %v4116_v56 }
 0x3ee   : > { %v1443_v46 = vmul.f32 %v4235_v15, %v4116_v56 }
 0x3f0   : > { %v1123_v53 = vpop.permute.xlu1 %1122  ;;  %v1384_v54 = vpop.permute.xlu0 %1383 }
 0x3f1   : > { %v4272_v57 = vmul.f32 %v1384_v54, %v4114_v55  ;;  %v4275_v58 = vmul.f32 %v1384_v54, %v4116_v56  ;;  %v1128_v63 = vsub.f32 %v1110_v59, %v1123_v53 }
 0x3f4   : > { %v1149_v61 = vpop.permute.xlu1 %1148  ;;  %v1125_v62 = vpop.permute.xlu0 %1124 }
 0x3f5   : > { %v1129_v2 = vsub.f32 %v1111_v60, %v1125_v62  ;;  %v4281_v10 = vadd.f32 %v1149_v61, %v1136_v3 }
 0x3f7   : > { %v3107_v8 = vpack.i.bf16 %v1129_v2, %v1128_v63 }
 0x3f8   : > { %v1151_v9 = vpop.permute.xlu0 %1150  ;;  %v1433_v12 = vpop.permute.xlu1 %1432 }
 0x3f9   : > { %v4283_v11 = vadd.f32 %v1151_v9, %v1137_v4  ;;  %v1438_v20 = vsub.f32 %v1426_v42, %v1433_v12 }
 0x3fb   : > { %v3112_v13 = vpack.i.bf16 %v4283_v11, %v4281_v10 }
 0x3fc   : > { %v1435_v14 = vpop.permute.xlu0 %1434 }
 0x3fd   : > { %v1439_v25 = vsub.f32 %v1427_v52, %v1435_v14 }
 0x3ff   : > { %v4287_v28 = vpack.i.bf16 %v1439_v25, %v1438_v20 }
 0x444   : > { %v1024_v31 = vpop.f32.mrb[4].mxu1 }
 0x445   : > { %v1031_v32 = vmul.f32 0.17677669, %v1024_v31  ;;  %v2890_v33 = vpop.f32.mrb[5].mxu1 }
 0x446   : > { %v1027_v34 = vpop.f32.mrb[6].mxu1 }
 0x447   : > { %v1032_v35 = vmul.f32 0.17677669, %v1027_v34  ;;  %v2891_v36 = vpop.f32.mrb[7].mxu1  ;;  %v1033_v38 = vsel %vm885_vm3, %v1031_v32, -1e+30 }
 0x448   : > { %v1035_v39 = vsel %vm939_vm1, %v1033_v38, -inf }
 0x449   : > { %1036 = vmax.xlane.f32.xlu1 %v1035_v39  ;;  %v1034_v42 = vsel %vm886_vm4, %v1032_v35, -1e+30 }
 0x44a   : > { %v1038_v45 = vsel %vm939_vm1, %v1034_v42, -inf }
 0x44b   : > { %1039 = vmax.xlane.f32.xlu0 %v1038_v45 }
 0x45a   : > { %1605 = vrot.lane.b32.xlu1 %v4065_v21, %s3641_s11  ;;  %v1678_v21 = vmul.f32 %v4237_v16, %v4111_v51 }
 0x45e   : > { %1631 = vrot.lane.b32.xlu1 %v4070_v22, %s3641_s11  ;;  %v1692_v22 = vmul.f32 %v4241_v18, %v4111_v51 }
 0x461   : > { %1448 = vrot.lane.b32.xlu0 %v1443_v46, %s3636_s1 }
 0x462   : > { %1373 = vrot.lane.b32.xlu1 %v4213_v7, %s3636_s1  ;;  %v1645_v7 = vmul.f32 %v4241_v18, %v4109_v50  ;;  %v1447_v18 = vpop.permute.xlu1 %1446 }
 0x463   : > { %v1452_v60 = vadd.f32 %v1447_v18, %v4265_v48 }
 0x465   : > { %1607 = vrot.lane.b32.xlu0 %v4079_v23, %s3641_s11  ;;  %v1396_v23 = vmul.f32 %v4235_v15, %v4114_v55  ;;  %v1620_v15 = vmul.f32 %v4239_v17, %v4114_v55 }
 0x466   : > { %1399 = vrot.lane.b32.xlu1 %v4210_v5, %s3636_s1  ;;  %v1619_v5 = vmul.f32 %v4237_v16, %v4109_v50  ;;  %v1646_v16 = vmul.f32 %v4243_v19, %v4114_v55 }
 0x469   : > { %1633 = vrot.lane.b32.xlu0 %v4086_v24, %s3641_s11  ;;  %v1679_v24 = vmul.f32 %v4239_v17, %v4116_v56 }
 0x46a   : > { %1682 = vrot.lane.b32.xlu1 %v1678_v21, %s3636_s1 }
 0x46d   : > { %1375 = vrot.lane.b32.xlu0 %v4202_v1, %s3636_s1  ;;  %v1693_v1 = vmul.f32 %v4243_v19, %v4116_v56 }
 0x46e   : > { %1696 = vrot.lane.b32.xlu1 %v1692_v22, %s3636_s1 }
 0x471   : > { %1401 = vrot.lane.b32.xlu0 %v1396_v23, %s3636_s1 }
 0x472   : > { %1623 = vrot.lane.b32.xlu1 %v1619_v5, %s3636_s1 }
 0x475   : > { %1684 = vrot.lane.b32.xlu0 %v1679_v24, %s3636_s1 }
 0x476   : > { %1649 = vrot.lane.b32.xlu1 %v1645_v7, %s3636_s1 }
 0x479   : > { %1698 = vrot.lane.b32.xlu0 %v1693_v1, %s3636_s1 }
 0x47a   : > { %3103 = vrot.lane.b32.xlu1 %v3102_v44, %s3636_s1 }
 0x47d   : > { %1625 = vrot.lane.b32.xlu0 %v1620_v15, %s3636_s1 }
 0x47e   : > { %3108 = vrot.lane.b32.xlu1 %v3107_v8, %s3641_s11 }
 0x481   : > { %1651 = vrot.lane.b32.xlu0 %v1646_v16, %s3636_s1 }
 0x485   : > { %3098 = vrot.lane.b32.xlu0 %v4249_v37, %s3641_s11 }
 0x4d6   : > { %v1037_v52 = vpop.xlane.xlu1 %1036 }
 0x4d7   : > { %v1041_v53 = vsub.f32 %v1033_v38, %v1037_v52 }
 0x4d8   : > { %v1040_v40 = vpop.xlane.xlu0 %1039 }
 0x4d9   : > { %v1043_v43 = vmul.f32 1.442695, %v1041_v53  ;;  %v1042_v44 = vsub.f32 %v1034_v42, %v1040_v40 }
 0x4da   : > { %v1606_v54 = vpop.permute.xlu1 %1605 }
 0x4db   : > { %3257 = vpow2.f32 %v1043_v43  ;;  %v1045_v17 = vmul.f32 1.442695, %v1042_v44  ;;  %v1676_v34 = vmul.f32 %v1606_v54, %v4111_v51 }
 0x4dc   : > { %v1449_v59 = vpop.permute.xlu0 %1448 }
 0x4dd   : > { %3259 = vpow2.f32 %v1045_v17  ;;  %v1453_v19 = vadd.f32 %v1449_v59, %v4275_v58 }
 0x4de   : > { %v1632_v61 = vpop.permute.xlu1 %1631 }
 0x4df   : > { %v3122_v62 = vpack.i.bf16 %v1453_v19, %v1452_v60 }
 0x4e0   : > { %v1608_v63 = vpop.permute.xlu0 %1607 }
 0x4e1   : > { %v1677_v35 = vmul.f32 %v1608_v63, %v4116_v56  ;;  %v1612_v23 = vmul.f32 %v1608_v63, %v4114_v55 }
 0x4e2   : > { %v1374_v2 = vpop.permute.xlu1 %1373 }
 0x4e3   : > { %v1379_v58 = vsub.f32 %v4254_v41, %v1374_v2  ;;  %v1690_v41 = vmul.f32 %v1632_v61, %v4111_v51  ;;  %v1637_v51 = vmul.f32 %v1632_v61, %v4109_v50 }
 0x4e4   : > { %v1634_v37 = vpop.permute.xlu0 %1633 }
 0x4e5   : > { %v4361_v3 = vpop.eup %3257 }
 0x4e6   : > { %v1400_v4 = vpop.permute.xlu1 %1399  ;;  %v1047_v8 = vsel %vm939_vm1, %v4361_v3, 0.0 }
 0x4e7   : > { %v4365_v9 = vpop.eup %3259  ;;  %1048 = vadd.xlane.f32.xlu1 %v1047_v8  ;;  %v1405_v31 = vadd.f32 %v1400_v4, %v4262_v47 }
 0x4e8   : > { %v1376_v12 = vpop.permute.xlu0 %1375  ;;  %v1050_v48 = vsel %vm939_vm1, %v4365_v9, 0.0 }
 0x4e9   : > { %v1380_v14 = vsub.f32 %v4268_v49, %v1376_v12  ;;  %1051 = vadd.xlane.f32.xlu0 %v1050_v48  ;;  %v1691_v49 = vmul.f32 %v1634_v37, %v4116_v56  ;;  %v1638_v56 = vmul.f32 %v1634_v37, %v4114_v55 }
 0x4ea   : > { %v1683_v20 = vpop.permute.xlu1 %1682 }
 0x4eb   : > { %v3127_v25 = vpack.i.bf16 %v1380_v14, %v1379_v58  ;;  %v1688_v39 = vsub.f32 %v1676_v34, %v1683_v20 }
 0x4ec   : > { %v1402_v29 = vpop.permute.xlu0 %1401 }
 0x4ed   : > { %v1406_v32 = vadd.f32 %v1402_v29, %v4272_v57  ;;  %v1611_v57 = vmul.f32 %v1606_v54, %v4109_v50 }
 0x4ee   : > { %v1697_v33 = vpop.permute.xlu1 %1696 }
 0x4ef   : > { %v3132_v36 = vpack.i.bf16 %v1406_v32, %v1405_v31  ;;  %v1702_v22 = vadd.f32 %v1697_v33, %v1690_v41 }
 0x4f0   : > { %v1685_v38 = vpop.permute.xlu0 %1684 }
 0x4f1   : > { %v1689_v42 = vsub.f32 %v1677_v35, %v1685_v38 }
 0x4f2   : > { %v1624_v46 = vpop.permute.xlu1 %1623 }
 0x4f3   : > { %v3137_v45 = vpack.i.bf16 %v1689_v42, %v1688_v39  ;;  %v1629_v7 = vsub.f32 %v1611_v57, %v1624_v46 }
 0x4f4   : > { %v1699_v21 = vpop.permute.xlu0 %1698 }
 0x4f5   : > { %v1703_v47 = vadd.f32 %v1699_v21, %v1691_v49 }
 0x4f6   : > { %v1650_v15 = vpop.permute.xlu1 %1649 }
 0x4f7   : > { %v3142_v5 = vpack.i.bf16 %v1703_v47, %v1702_v22  ;;  %v1655_v52 = vadd.f32 %v1650_v15, %v1637_v51 }
 0x4f8   : > { %3118 = vrot.lane.b32.xlu1 %v4287_v28, %s3640_s29  ;;  %v1626_v24 = vpop.permute.xlu0 %1625 }
 0x4f9   : > { %v1630_v1 = vsub.f32 %v1612_v23, %v1626_v24 }
 0x4fa   : > { %v3104_v50 = vpop.permute.xlu1 %3103 }
 0x4fb   : > { %v3147_v16 = vpack.i.bf16 %v1630_v1, %v1629_v7  ;;  %v3106_v17 = vunpack.i.h.bf16 %v3104_v50  ;;  %v3105_v59 = vunpack.i.l.bf16 %v3104_v50 }
 0x4fc   : > { %3128 = vrot.lane.b32.xlu1 %v3127_v25, %s3640_s29  ;;  %v1652_v18 = vpop.permute.xlu0 %1651 }
 0x4fd   : > { %v1656_v53 = vadd.f32 %v1652_v18, %v1638_v56 }
 0x4fe   : > { %v3109_v55 = vpop.permute.xlu1 %3108 }
 0x4ff   : > { %v3152_v40 = vpack.i.bf16 %v1656_v53, %v1655_v52  ;;  %3113 = vrot.lane.b32.xlu0 %v3112_v13, %s3636_s1  ;;  %v3111_v35 = vunpack.i.h.bf16 %v3109_v55 }
 0x500   : > { %3138 = vrot.lane.b32.xlu1 %v3137_v45, %s3639_s2  ;;  %v3099_v28 = vpop.permute.xlu0 %3098  ;;  %v3110_v45 = vunpack.i.l.bf16 %v3109_v55 }
 0x501   : > { %v3101_v11 = vunpack.i.h.bf16 %v3099_v28  ;;  %v3100_v13 = vunpack.i.l.bf16 %v3099_v28 }
 0x503   : > { %3123 = vrot.lane.b32.xlu0 %v3122_v62, %s3638_s5  ;;  %v1220_v19 = vsel %vm939_vm1, %v3101_v11, %v3106_v17  ;;  %v1219_v61 = vsel %vm939_vm1, %v3100_v13, %v3105_v59 }
 0x504   : > { %3148 = vrot.lane.b32.xlu1 %v3147_v16, %s3639_s2  ;;  %v1221_v31 = vpack.c.bf16 %v1220_v19, %v1219_v61 }
 0x506   : > { %v1226_v21 = vsel %vm983_vm2, %v1221_v31, 0 }
 0x507   : > { %3133 = vrot.lane.b32.xlu0 %v3132_v36, %s3638_s5  ;;  %s4610_s5 = sld [smem:[#allocation29_spill]] }
 0x50b   : > { %3143 = vrot.lane.b32.xlu0 %v3142_v5, %s3637_s17 }
 0x50f   : > { %3153 = vrot.lane.b32.xlu0 %v3152_v40, %s3637_s17 }
 0x574   : > { %v1049_v43 = vpop.xlane.xlu1 %1048 }
 0x575   : > { %3261 = vrcp.f32 %v1049_v43 }
 0x576   : > { %v1052_v44 = vpop.xlane.xlu0 %1051 }
 0x577   : > { %3263 = vrcp.f32 %v1052_v44 }
 0x578   : > { %v3119_v10 = vpop.permute.xlu1 %3118 }
 0x579   : > { %v3121_v2 = vunpack.i.h.bf16 %v3119_v10  ;;  %v3120_v37 = vunpack.i.l.bf16 %v3119_v10 }
 0x57a   : > { %v3114_v54 = vpop.permute.xlu0 %3113 }
 0x57b   : > { %v3116_v39 = vunpack.i.h.bf16 %v3114_v54  ;;  %v3115_v42 = vunpack.i.l.bf16 %v3114_v54 }
 0x57c   : > { %v3129_v60 = vpop.permute.xlu1 %3128 }
 0x57d   : > { %v3131_v41 = vunpack.i.h.bf16 %v3129_v60  ;;  %v3130_v49 = vunpack.i.l.bf16 %v3129_v60  ;;  %v1173_v5 = vsel %vm939_vm1, %v3111_v35, %v3116_v39  ;;  %v1172_v24 = vsel %vm939_vm1, %v3110_v45, %v3115_v42 }
 0x57e   : > { %v3124_v62 = vpop.permute.xlu0 %3123  ;;  %v1174_v53 = vpack.c.bf16 %v1173_v5, %v1172_v24 }
 0x57f   : > { %v3262_v63 = vpop.eup %3261  ;;  %v3126_v4 = vunpack.i.h.bf16 %v3124_v62  ;;  %v3125_v8 = vunpack.i.l.bf16 %v3124_v62 }
 0x580   : > { %v1055_v14 = vmul.f32 %v3262_v63, %v4361_v3  ;;  %v3139_v32 = vpop.permute.xlu1 %3138 }
 0x581   : > { %v3264_v12 = vpop.eup %3263  ;;  %v1471_v48 = vsel %vm939_vm1, %v3121_v2, %v3126_v4  ;;  %v1470_v58 = vsel %vm939_vm1, %v3120_v37, %v3125_v8  ;;  %v3141_v46 = vunpack.i.h.bf16 %v3139_v32  ;;  %v3140_v3 = vunpack.i.l.bf16 %v3139_v32 }
 0x582   : > { %v1056_v20 = vmul.f32 %v3264_v12, %v4365_v9  ;;  %v3134_v25 = vpop.permute.xlu0 %3133  ;;  %v1472_v29 = vpack.c.bf16 %v1471_v48, %v1470_v58 }
 0x583   : > { %v3136_v33 = vunpack.i.h.bf16 %v3134_v25  ;;  %v3135_v34 = vunpack.i.l.bf16 %v3134_v25 }
 0x584   : > { %v1477_v36 = vsel %vm983_vm2, %v1472_v29, 0  ;;  %v1057_v38 = vpack.c.bf16 %v1056_v20, %v1055_v14  ;;  %v3149_v51 = vpop.permute.xlu1 %3148 }
 0x585   : > { %2911 = vmatpush3.bf16.xpose.msra.mxu0 %v1477_v36  ;;  %v1424_v22 = vsel %vm939_vm1, %v3131_v41, %v3136_v33  ;;  %v1423_v47 = vsel %vm939_vm1, %v3130_v49, %v3135_v34  ;;  %v3151_v50 = vunpack.i.h.bf16 %v3149_v51  ;;  %v3150_v55 = vunpack.i.l.bf16 %v3149_v51 }
 0x586   : > { %2895 = vmatmul.mubr.msk.bf16.vlgmr.msra.gmra.mrb[8].mxu1 %vm939_vm1, %v1057_v38  ;;  %v3144_v9 = vpop.permute.xlu0 %3143  ;;  %2922 = vmatprep.subr.bf16.mxu0 %v3633_v0  ;;  %v1425_v15 = vpack.c.bf16 %v1424_v22, %v1423_v47 }
 0x587   : > { %v3146_v57 = vunpack.i.h.bf16 %v3144_v9  ;;  %v3145_v23 = vunpack.i.l.bf16 %v3144_v9  ;;  %2899 = vmatpush3.bf16.xpose.msra.mxu1 %v1226_v21  ;;  %2900 = vmatprep.mubr.msk.bf16.mxu1 %vm3634_vm0, %v3633_v0 }
 0x588   : > { %2904 = vmatprep.subr.bf16.mxu1 %v3633_v0 }
 0x589   : > { %v1721_v7 = vsel %vm939_vm1, %v3141_v46, %v3146_v57  ;;  %v1720_v1 = vsel %vm939_vm1, %v3140_v3, %v3145_v23 }
 0x58a   : > { %v3154_v56 = vpop.permute.xlu0 %3153  ;;  %v1722_v16 = vpack.c.bf16 %v1721_v7, %v1720_v1 }
 0x58b   : > { %v3156_v18 = vunpack.i.h.bf16 %v3154_v56  ;;  %v3155_v52 = vunpack.i.l.bf16 %v3154_v56 }
 0x58c   : > { %2913 = vmatmul.mubr.msk.bf16.vlgmr.msra.gmra.mrb[8].mxu0 %vm983_vm2, %v1425_v15  ;;  %v1727_v40 = vsel %vm983_vm2, %v1722_v16, 0 }
 0x58d   : > { %2923 = vmatpush3.bf16.xpose.msra.mxu0 %v1727_v40  ;;  %2924 = vmatprep.mubr.msk.bf16.mxu0 %vm3634_vm0, %v3633_v0  ;;  %v1674_v28 = vsel %vm939_vm1, %v3151_v50, %v3156_v18  ;;  %v1673_v43 = vsel %vm939_vm1, %v3150_v55, %v3155_v52 }
 0x58e   : > { %2901 = vmatmul.mubr.msk.bf16.vlgmr.msra.gmra.mrb[12].mxu1 %vm983_vm2, %v1174_v53  ;;  %2934 = vmatprep.subr.bf16.mxu0 %v3633_v0  ;;  %v1675_v44 = vpack.c.bf16 %v1674_v28, %v1673_v43 }
 0x58f   : > { %2906 = vmatprep.mubr.msk.bf16.mxu1 %vm3634_vm0, %v3633_v0 }
 0x594   : > { %2925 = vmatmul.mubr.msk.bf16.vlgmr.msra.gmra.mrb[12].mxu0 %vm983_vm2, %v1675_v44 }
 0x595   : > { %2950 = vmatprep.mubr.msk.bf16.mxu0 %vm3634_vm0, %v3633_v0 }
 0x659   : > { %v1095_v10 = vpop.f32.mrb[8].mxu1 }
 0x65a   : > { %1102 = vst.msk [vmem:[#allocation2] sm:$0xff] %vm983_vm2, %v1095_v10  ;;  %v2896_v11 = vpop.f32.mrb[9].mxu1 }
 0x65b   : > { %v1098_v13 = vpop.f32.mrb[10].mxu1 }
 0x65c   : > { %1103 = vst.msk [vmem:[#allocation2 + $0x8] sm:$0xff] %vm983_vm2, %v1098_v13  ;;  %v2897_v54 = vpop.f32.mrb[11].mxu1 }
 0x65f   : > { %v1513_v17 = vpop.f32.mrb[8].mxu0 }
 0x660   : > { %v2914_v59 = vpop.f32.mrb[9].mxu0  ;;  %v1520_v37 = vmul.f32 0.17677669, %v1513_v17 }
 0x661   : > { %v1262_v60 = vpop.f32.mrb[12].mxu1  ;;  %v1516_v19 = vpop.f32.mrb[10].mxu0 }
 0x662   : > { %v1269_v61 = vmul.f32 0.17677669, %v1262_v60  ;;  %v1521_v62 = vmul.f32 0.17677669, %v1516_v19  ;;  %v2902_v63 = vpop.f32.mrb[13].mxu1  ;;  %v2915_v2 = vpop.f32.mrb[11].mxu0 }
 0x663   : > { %v1265_v4 = vpop.f32.mrb[14].mxu1  ;;  %v1522_v33 = vsel %vm885_vm3, %v1520_v37, -1e+30 }
 0x664   : > { %v1270_v8 = vmul.f32 0.17677669, %v1265_v4  ;;  %v2903_v12 = vpop.f32.mrb[15].mxu1  ;;  %v1271_v48 = vsel %vm885_vm3, %v1269_v61, -1e+30  ;;  %v1524_v39 = vsel %vm939_vm1, %v1522_v33, -inf }
 0x665   : > { %v1273_v58 = vsel %vm939_vm1, %v1271_v48, -inf  ;;  %v1523_v20 = vsel %vm886_vm4, %v1521_v62, -1e+30 }
 0x666   : > { %1274 = vmax.xlane.f32.xlu1 %v1273_v58  ;;  %v1272_v14 = vsel %vm886_vm4, %v1270_v8, -1e+30  ;;  %v1527_v35 = vsel %vm939_vm1, %v1523_v20, -inf }
 0x667   : > { %v1763_v25 = vpop.f32.mrb[12].mxu0  ;;  %v1276_v29 = vsel %vm939_vm1, %v1272_v14, -inf }
 0x668   : > { %v1770_v31 = vmul.f32 0.17677669, %v1763_v25  ;;  %v2926_v32 = vpop.f32.mrb[13].mxu0  ;;  %1277 = vmax.xlane.f32.xlu0 %v1276_v29 }
 0x669   : > { %v1766_v34 = vpop.f32.mrb[14].mxu0 }
 0x66a   : > { %v1771_v36 = vmul.f32 0.17677669, %v1766_v34  ;;  %v2927_v38 = vpop.f32.mrb[15].mxu0  ;;  %1528 = vmax.xlane.f32.xlu1 %v1527_v35  ;;  %v1772_v41 = vsel %vm885_vm3, %v1770_v31, -1e+30  ;;  %v3181_v34 = vld [vmem:[#allocation11] sm:$0xff]  }
 0x66b   : > { %v1774_v45 = vsel %vm939_vm1, %v1772_v41, -inf  ;;  %2935 = vmatpush3.bf16.msra.mxu0 %v3181_v34  ;;  %v3182_v35 = vld [vmem:[#allocation11 + $0x8] sm:$0xff]   ;;  %v3184_v38 = vld [vmem:[#allocation11 + $0x18] sm:$0xff]  }
 0x66c   : > { %1525 = vmax.xlane.f32.xlu0 %v1524_v39  ;;  %v1773_v42 = vsel %vm886_vm4, %v1771_v36, -1e+30  ;;  %2936 = vmatprep.subr.bf16.mxu0 %v3633_v0  ;;  %v3183_v36 = vld [vmem:[#allocation11 + $0x10] sm:$0xff]   ;;  %v3185_v39 = vld [vmem:[#allocation11 + $0x20] sm:$0xff]  }
 0x66d   : > { %v1777_v49 = vsel %vm939_vm1, %v1773_v42, -inf  ;;  %v3230_v34 = vld [vmem:[#allocation15 + $0x64] ss:$8 sps:$4 sm:$0xff]  }
 0x66e   : > { %1778 = vmax.xlane.f32.xlu1 %v1777_v49 }
 0x66f   : > { %2937 = vmatpush3.bf16.msra.mxu0 %v3182_v35  ;;  %v3225_v35 = vld [vmem:[#allocation12 + $0x60] ss:$8 sps:$4 sm:$0xff]  }
 0x670   : > { %1775 = vmax.xlane.f32.xlu0 %v1774_v45  ;;  %2938 = vmatprep.subr.bf16.mxu0 %v3633_v0 }
 0x673   : > { %2939 = vmatpush3.bf16.msra.mxu0 %v3183_v36  ;;  %v3228_v36 = vld [vmem:[#allocation15 + $0x60] ss:$8 sps:$4 sm:$0xff]  }
 0x674   : > { %2940 = vmatprep.subr.bf16.mxu0 %v3633_v0 }
 0x677   : > { %2941 = vmatpush3.bf16.msra.mxu0 %v3184_v38  ;;  %v3233_v38 = vld [vmem:[#allocation12 + $0x74] ss:$8 sps:$4 sm:$0xff]  }
 0x678   : > { %2942 = vmatprep.subr.bf16.mxu0 %v3633_v0 }
 0x67b   : > { %2943 = vmatpush3.bf16.msra.mxu0 %v3185_v39  ;;  %v3236_v39 = vld [vmem:[#allocation15 + $0x74] ss:$8 sps:$4 sm:$0xff]  }
 0x67c   : > { %2944 = vmatprep.subr.bf16.mxu0 %v3633_v0 }
 0x6f3   : > { %v1275_v46 = vpop.xlane.xlu1 %1274 }
 0x6f4   : > { %v1279_v5 = vsub.f32 %v1271_v48, %v1275_v46  ;;  %v3186_v46 = vld [vmem:[#allocation11 + $0x28] sm:$0xff]  }
 0x6f5   : > { %v1278_v3 = vpop.xlane.xlu0 %1277  ;;  %2945 = vmatpush3.bf16.msra.mxu0 %v3186_v46 }
 0x6f6   : > { %v1280_v22 = vsub.f32 %v1272_v14, %v1278_v3  ;;  %v1281_v51 = vmul.f32 1.442695, %v1279_v5  ;;  %v3187_v3 = vld [vmem:[#allocation11 + $0x30] sm:$0xff]   ;;  %2946 = vmatprep.subr.bf16.mxu0 %v3633_v0 }
 0x6f7   : > { %v1529_v9 = vpop.xlane.xlu1 %1528 }
 0x6f8   : > { %v1531_v21 = vsub.f32 %v1523_v20, %v1529_v9  ;;  %v1283_v26 = vmul.f32 1.442695, %v1280_v22 }
 0x6f9   : > { %v1526_v47 = vpop.xlane.xlu0 %1525  ;;  %2947 = vmatpush3.bf16.msra.mxu0 %v3187_v3 }
 0x6fa   : > { %v1534_v57 = vmul.f32 1.442695, %v1531_v21  ;;  %v1530_v23 = vsub.f32 %v1522_v33, %v1526_v47  ;;  %v3188_v47 = vld [vmem:[#allocation11 + $0x38] sm:$0xff]   ;;  %2948 = vmatprep.subr.bf16.mxu0 %v3633_v0 }
 0x6fb   : > { %v1779_v27 = vpop.xlane.xlu1 %1778 }
 0x6fc   : > { %3265 = vpow2.f32 %v1534_v57  ;;  %v1532_v24 = vmul.f32 1.442695, %v1530_v23  ;;  %v1781_v30 = vsub.f32 %v1773_v42, %v1779_v27 }
 0x6fd   : > { %v1776_v7 = vpop.xlane.xlu0 %1775  ;;  %2949 = vmatpush3.bf16.msra.mxu0 %v3188_v47  ;;  %v2692_v47 = vld [vmem:[%s4609_s16] ss:$0 sm:$0xff] }
 0x6fe   : > { %3267 = vpow2.f32 %v1532_v24  ;;  %v1784_v1 = vmul.f32 1.442695, %v1781_v30  ;;  %v1780_v15 = vsub.f32 %v1772_v41, %v1776_v7 }
 0x700   : > { %3269 = vpow2.f32 %v1784_v1  ;;  %v1782_v56 = vmul.f32 1.442695, %v1780_v15 }
 0x701   : > { %3271 = vpow2.f32 %v1283_v26 }
 0x702   : > { %3273 = vpow2.f32 %v1782_v56 }
 0x703   : > { %3275 = vpow2.f32 %v1281_v51 }
 0x706   : > { %v3266_v16 = vpop.eup %3265 }
 0x707   : > { %v1539_v18 = vsel %vm939_vm1, %v3266_v16, 0.0 }
 0x708   : > { %v3268_v52 = vpop.eup %3267  ;;  %1540 = vadd.xlane.f32.xlu1 %v1539_v18  ;;  %v3189_v18 = vld [vmem:[#allocation12] ss:$8 sps:$4 sm:$0xff]  }
 0x709   : > { %v1536_v53 = vsel %vm939_vm1, %v3268_v52, 0.0 }
 0x70a   : > { %v3270_v40 = vpop.eup %3269  ;;  %1537 = vadd.xlane.f32.xlu0 %v1536_v53  ;;  %v3192_v53 = vld [vmem:[#allocation15] ss:$8 sps:$4 sm:$0xff]  }
 0x70b   : > { %v3272_v50 = vpop.eup %3271  ;;  %v1789_v55 = vsel %vm939_vm1, %v3270_v40, 0.0 }
 0x70c   : > { %v3274_v28 = vpop.eup %3273  ;;  %1790 = vadd.xlane.f32.xlu1 %v1789_v55  ;;  %v1288_v10 = vsel %vm939_vm1, %v3272_v50, 0.0  ;;  %v3200_v55 = vld [vmem:[#allocation15 + $0x14] ss:$8 sps:$4 sm:$0xff]  }
 0x70d   : > { %v1786_v43 = vsel %vm939_vm1, %v3274_v28, 0.0  ;;  %v3276_v44 = vpop.eup %3275 }
 0x70e   : > { %1787 = vadd.xlane.f32.xlu0 %v1786_v43  ;;  %v1285_v11 = vsel %vm939_vm1, %v3276_v44, 0.0  ;;  %v3198_v43 = vld [vmem:[#allocation15 + $0x10] ss:$8 sps:$4 sm:$0xff]  }
 0x710   : > { %1289 = vadd.xlane.f32.xlu1 %v1288_v10  ;;  %v3206_v10 = vld [vmem:[#allocation15 + $0x24] ss:$8 sps:$4 sm:$0xff]  }
 0x712   : > { %1286 = vadd.xlane.f32.xlu0 %v1285_v11  ;;  %v3201_v11 = vld [vmem:[#allocation12 + $0x20] ss:$8 sps:$4 sm:$0xff]  }
 0x721   : > { %1547 = vrot.lane.b32.xlu1 %v4131_v6, %s3640_s29 }
 0x725   : > { %1797 = vrot.lane.b32.xlu1 %v4131_v6, %s3639_s2 }
 0x728   : > { %1297 = vrot.lane.b32.xlu0 %v4131_v6, %s3641_s11 }
 0x795   : > { %v1541_v13 = vpop.xlane.xlu1 %1540 }
 0x797   : > { %v1538_v54 = vpop.xlane.xlu0 %1537 }
 0x799   : > { %v1791_v17 = vpop.xlane.xlu1 %1790 }
 0x79b   : > { %v1788_v59 = vpop.xlane.xlu0 %1787 }
 0x79d   : > { %v1290_v60 = vpop.xlane.xlu1 %1289 }
 0x79e   : > { %3277 = vrcp.f32 %v1290_v60 }
 0x79f   : > { %v1287_v19 = vpop.xlane.xlu0 %1286 }
 0x7a0   : > { %3279 = vrcp.f32 %v1287_v19 }
 0x7a1   : > { %3281 = vrcp.f32 %v1538_v54  ;;  %v1548_v8 = vpop.permute.xlu1 %1547 }
 0x7a2   : > { %3283 = vrcp.f32 %v1541_v13  ;;  %v3204_v13 = vld [vmem:[#allocation15 + $0x20] ss:$8 sps:$4 sm:$0xff]  }
 0x7a3   : > { %v1298_v61 = vpop.permute.xlu0 %1297  ;;  %3285 = vrcp.f32 %v1788_v59 }
 0x7a4   : > { %2905 = vmatpush3.bf16.msra.mxu1 %v1298_v61  ;;  %3287 = vrcp.f32 %v1791_v17  ;;  %v3309_v17 = vld [vmem:[%s4008_s13] sm:$0xff]  ;;  %v3310_v61 = vld [vmem:[%s4008_s13 + $0x8] sm:$0xff] }
 0x7a5   : > { %2916 = vmatprep.subr.bf16.mxu1 %v3633_v0  ;;  %v1798_v25 = vpop.permute.xlu1 %1797 }
 0x7a8   : > { %v3278_v62 = vpop.eup %3277 }
 0x7a9   : > { %v1294_v2 = vmul.f32 %v3278_v62, %v3272_v50  ;;  %v3197_v50 = vld [vmem:[#allocation12 + $0x14] ss:$8 sps:$4 sm:$0xff]  }
 0x7aa   : > { %v3280_v63 = vpop.eup %3279 }
 0x7ab   : > { %v1293_v37 = vmul.f32 %v3280_v63, %v3276_v44  ;;  %v3282_v4 = vpop.eup %3281  ;;  %v3203_v44 = vld [vmem:[#allocation12 + $0x24] ss:$8 sps:$4 sm:$0xff]  }
 0x7ac   : > { %v3284_v12 = vpop.eup %3283  ;;  %v1544_v48 = vmul.f32 %v3282_v4, %v3268_v52  ;;  %v3191_v52 = vld [vmem:[#allocation12 + $0x4] ss:$8 sps:$4 sm:$0xff]   ;;  %v3212_v4 = vld [vmem:[#allocation15 + $0x34] ss:$8 sps:$4 sm:$0xff]  }
 0x7ad   : > { %v1295_v6 = vpack.c.bf16 %v1294_v2, %v1293_v37  ;;  %v1545_v58 = vmul.f32 %v3284_v12, %v3266_v16  ;;  %v3286_v20 = vpop.eup %3285  ;;  %v3210_v12 = vld [vmem:[#allocation15 + $0x30] ss:$8 sps:$4 sm:$0xff]  }
 0x7ae   : > { %v3288_v29 = vpop.eup %3287  ;;  %v1794_v31 = vmul.f32 %v3286_v20, %v3274_v28  ;;  %v3195_v28 = vld [vmem:[#allocation12 + $0x10] ss:$8 sps:$4 sm:$0xff]   ;;  %v3216_v20 = vld [vmem:[#allocation15 + $0x40] ss:$8 sps:$4 sm:$0xff]  }
 0x7af   : > { %2907 = vmatmul.mubr.msk.bf16.vlgmr.msra.gmra.mrb[16].mxu1 %vm939_vm1, %v1295_v6  ;;  %v1546_v14 = vpack.c.bf16 %v1545_v58, %v1544_v48  ;;  %v1795_v32 = vmul.f32 %v3288_v29, %v3270_v40  ;;  %v3194_v40 = vld [vmem:[#allocation15 + $0x4] ss:$8 sps:$4 sm:$0xff]   ;;  %v3209_v6 = vld [vmem:[#allocation12 + $0x34] ss:$8 sps:$4 sm:$0xff]   ;;  %v3219_v29 = vld [vmem:[#allocation12 + $0x50] ss:$8 sps:$4 sm:$0xff]  }
 0x7b0   : > { %2917 = vmatpush3.bf16.msra.mxu1 %v1548_v8  ;;  %2918 = vmatprep.mubr.msk.bf16.mxu1 %vm3634_vm0, %v3633_v0  ;;  %v3207_v8 = vld [vmem:[#allocation12 + $0x30] ss:$8 sps:$4 sm:$0xff]   ;;  %v3215_v48 = vld [vmem:[#allocation12 + $0x44] ss:$8 sps:$4 sm:$0xff]  }
 0x7b1   : > { %2928 = vmatprep.subr.bf16.mxu1 %v3633_v0  ;;  %v1796_v33 = vpack.c.bf16 %v1795_v32, %v1794_v31  ;;  %2224 = vmatprep.subr.bf16.mxu0 %v3194_v40  ;;  %v3218_v58 = vld [vmem:[#allocation15 + $0x44] ss:$8 sps:$4 sm:$0xff]   ;;  %v3222_v31 = vld [vmem:[#allocation15 + $0x50] ss:$8 sps:$4 sm:$0xff]   ;;  %v3224_v32 = vld [vmem:[#allocation15 + $0x54] ss:$8 sps:$4 sm:$0xff]  }
 0x7b2   : > { %v3247_v40 = vld [vmem:[#allocation14 + $0x68] sm:$0xff]  }
 0x7b7   : > { %2919 = vmatmul.mubr.msk.bf16.vlgmr.msra.gmra.mrb[20].mxu1 %vm939_vm1, %v1546_v14  ;;  %v3213_v14 = vld [vmem:[#allocation12 + $0x40] ss:$8 sps:$4 sm:$0xff]  }
 0x7b8   : > { %2929 = vmatpush3.bf16.msra.mxu1 %v1798_v25  ;;  %2930 = vmatprep.mubr.msk.bf16.mxu1 %vm3634_vm0, %v3633_v0  ;;  %v3221_v25 = vld [vmem:[#allocation12 + $0x54] ss:$8 sps:$4 sm:$0xff]  }
 0x7b9   : > { %2085 = vmatprep.subr.bf16.mxu1 %v3191_v52  ;;  %v3245_v52 = vld [vmem:[#allocation14 + $0x60] sm:$0xff]  }
 0x7bf   : > { %2931 = vmatmul.mubr.msk.bf16.vlgmr.msra.gmra.mrb[24].mxu1 %vm939_vm1, %v1796_v33  ;;  %v3227_v33 = vld [vmem:[#allocation12 + $0x64] ss:$8 sps:$4 sm:$0xff]  }
 0x7c0   : > { %2086 = vmatpush1.bf16.msra.mxu1 %v3189_v18  ;;  %v3244_v18 = vld [vmem:[#allocation14 + $0x18] sm:$0xff]  }
 0x7c1   : > { %2087 = vmatprep.subr.bf16.mxu1 %v3197_v50  ;;  %v3248_v50 = vld [vmem:[#allocation14 + $0x28] sm:$0xff]  }
 0x7c4   : > { %2088 = vmatpush1.bf16.msra.mxu1 %v3195_v28  ;;  %v3250_v28 = vld [vmem:[#allocation14 + $0x30] sm:$0xff]  }
 0x7c5   : > { %2089 = vmatprep.subr.bf16.mxu1 %v3203_v44  ;;  %v3252_v44 = vld [vmem:[#allocation14 + $0x38] sm:$0xff]  }
 0x7c8   : > { %2090 = vmatpush1.bf16.msra.mxu1 %v3201_v11 }
 0x7c9   : > { %2091 = vmatprep.subr.bf16.mxu1 %v3209_v6 }
 0x7cc   : > { %2092 = vmatpush1.bf16.msra.mxu1 %v3207_v8 }
 0x7cd   : > { %2093 = vmatprep.subr.bf16.mxu1 %v3215_v48 }
 0x7d0   : > { %2094 = vmatpush1.bf16.msra.mxu1 %v3213_v14 }
 0x7d1   : > { %2095 = vmatprep.subr.bf16.mxu1 %v3221_v25 }
 0x7d4   : > { %2096 = vmatpush1.bf16.msra.mxu1 %v3219_v29 }
 0x7d5   : > { %2097 = vmatprep.subr.bf16.mxu1 %v3227_v33 }
 0x7d8   : > { %2098 = vmatpush1.bf16.msra.mxu1 %v3225_v35 }
 0x7d9   : > { %2099 = vmatprep.subr.bf16.mxu1 %v3233_v38 }
 0x882   : > { %v1337_v42 = vpop.f32.mrb[16].mxu1 }
 0x883   : > { %1346 = vrot.lane.b32.xlu0 %v1337_v42, %s3639_s2  ;;  %v2908_v41 = vpop.f32.mrb[17].mxu1  ;;  %v3642_v42 = vmov 0  }
 0x884   : > { %v1340_v49 = vpop.f32.mrb[18].mxu1  ;;  %2117 = vmatprep.mubr.bf16.mxu1 %v3642_v42  ;;  %v3231_v41 = vld [vmem:[#allocation12 + $0x70] ss:$8 sps:$4 sm:$0xff]  }
 0x885   : > { %1348 = vrot.lane.b32.xlu1 %v1340_v49, %s3639_s2  ;;  %v2909_v45 = vpop.f32.mrb[19].mxu1  ;;  %v3234_v49 = vld [vmem:[#allocation15 + $0x70] ss:$8 sps:$4 sm:$0xff]   ;;  %2100 = vmatpush1.bf16.msra.mxu1 %v3231_v41  ;;  %s4510_s2 = scalar_lea.hbm %s4610_s5, %s2751_s28 }
 0x88a   : > { %v1587_v9 = vpop.f32.mrb[20].mxu1 }
 0x88b   : > { %1596 = vrot.lane.b32.xlu0 %v1587_v9, %s3640_s29  ;;  %v2920_v21 = vpop.f32.mrb[21].mxu1 }
 0x88c   : > { %v1590_v22 = vpop.f32.mrb[22].mxu1 }
 0x88d   : > { %1598 = vrot.lane.b32.xlu1 %v1590_v22, %s3640_s29  ;;  %v2921_v57 = vpop.f32.mrb[23].mxu1  ;;  %s3643_s29 = smov [#allocation17]  }
 0x892   : > { %v1837_v23 = vpop.f32.mrb[24].mxu1 }
 0x893   : > { %1846 = vrot.lane.b32.xlu0 %v1837_v23, %s3641_s11  ;;  %v2932_v27 = vpop.f32.mrb[25].mxu1 }
 0x894   : > { %v1840_v5 = vpop.f32.mrb[26].mxu1 }
 0x895   : > { %1848 = vrot.lane.b32.xlu1 %v1840_v5, %s3641_s11  ;;  %v2933_v24 = vpop.f32.mrb[27].mxu1  ;;  %s3541_s11 = sshll.u32 %s3643_s29, 4  ;;  %s3542_s11 = int_to_ptr.vmem [resolvable:$false] %s3541_s11 }
 0x896   : > { %s3543_s13 = scalar_lea.vmem %s3542_s11, 512  ;;  %p3544_p2 = scmp.lt.s32.totalorder %s4505_s18, %s3542_s11 }
 0x897   : > { %p3545_p8 = scmp.lt.s32.totalorder %s3543_s13, %s3537_s27 }
 0x899   : > { %p3546_p6 = por %p3545_p8, %p3544_p2 }
 0x89b   : > { %p3547_p10 = pnand %p3546_p6, %p3540_p0 }
 0x8f5   : > { %v1347_v30 = vpop.permute.xlu0 %1346 }
 0x8f6   : > { %1353 = vst.msk [vmem:[#allocation2] sm:$0xff] %vm1352_vm5, %v1347_v30 }
 0x8f7   : > { %v1349_v26 = vpop.permute.xlu1 %1348 }
 0x8f8   : > { %1354 = vst.msk [vmem:[#allocation2 + $0x8] sm:$0xff] %vm1352_vm5, %v1349_v26 }
 0x8fd   : > { %v1597_v7 = vpop.permute.xlu0 %1596 }
 0x8fe   : > { %1603 = vst.msk [vmem:[#allocation2] sm:$0xff] %vm1602_vm6, %v1597_v7  ;;  %v3237_v7 = vld [vmem:[#allocation14 + $0x40] sm:$0xff]  }
 0x8ff   : > { %v1599_v1 = vpop.permute.xlu1 %1598  ;;  %2804 = vmatprep.subr.bf16.mxu1 %v3237_v7 }
 0x900   : > { %1604 = vst.msk [vmem:[#allocation2 + $0x8] sm:$0xff] %vm1602_vm6, %v1599_v1  ;;  %v3238_v1 = vld [vmem:[#allocation14] sm:$0xff]  }
 0x905   : > { %v1847_v0 = vpop.permute.xlu0 %1846 }
 0x906   : > { %1853 = vst.msk [vmem:[#allocation2] sm:$0xff] %vm1852_vm7, %v1847_v0  ;;  %v3239_v0 = vld [vmem:[#allocation14 + $0x48] sm:$0xff]  }
 0x907   : > { %v1849_v15 = vpop.permute.xlu1 %1848 }
 0x908   : > { %1854 = vst.msk [vmem:[#allocation2 + $0x8] sm:$0xff] %vm1852_vm7, %v1849_v15  ;;  %v3240_v15 = vld [vmem:[#allocation14 + $0x8] sm:$0xff]  }
 0x90d   : > { %v1855_v51 = vld [vmem:[#allocation2] sm:$0xff] }
 0x90f   : > { %v1856_v56 = vld [vmem:[#allocation2 + $0x8] sm:$0xff] }
 0x910   : > { %v1857_v16 = vpack.c.bf16 %v1856_v56, %v1855_v51  ;;  %v3241_v51 = vld [vmem:[#allocation14 + $0x50] sm:$0xff]  }
 0x911   : > { %v3242_v56 = vld [vmem:[#allocation14 + $0x10] sm:$0xff]  }
 0x912   : > { %2951 = vmatmul.mubr.bf16.vlgmr.msra.gmra.mrb[16].mxu0 %v1857_v16  ;;  %v3243_v16 = vld [vmem:[#allocation14 + $0x58] sm:$0xff]  }
 0x913   : > { %2225 = vmatpush1.bf16.msra.mxu0 %v3192_v53  ;;  %2256 = vmatprep.mubr.bf16.mxu0 %v3642_v42  ;;  %v3246_v53 = vld [vmem:[#allocation14 + $0x20] sm:$0xff]  }
 0x914   : > { %2226 = vmatprep.subr.bf16.mxu0 %v3200_v55  ;;  %v3249_v55 = vld [vmem:[#allocation14 + $0x70] sm:$0xff]  }
 0x917   : > { %2227 = vmatpush1.bf16.msra.mxu0 %v3198_v43  ;;  %v3251_v43 = vld [vmem:[#allocation14 + $0x78] sm:$0xff]  }
 0x918   : > { %2228 = vmatprep.subr.bf16.mxu0 %v3206_v10 }
 0x91b   : > { %2229 = vmatpush1.bf16.msra.mxu0 %v3204_v13 }
 0x91c   : > { %2230 = vmatprep.subr.bf16.mxu0 %v3212_v4 }
 0x91f   : > { %2231 = vmatpush1.bf16.msra.mxu0 %v3210_v12 }
 0x920   : > { %2232 = vmatprep.subr.bf16.mxu0 %v3218_v58 }
 0x923   : > { %2233 = vmatpush1.bf16.msra.mxu0 %v3216_v20 }
 0x924   : > { %2234 = vmatprep.subr.bf16.mxu0 %v3224_v32 }
 0x927   : > { %2235 = vmatpush1.bf16.msra.mxu0 %v3222_v31 }
 0x928   : > { %2236 = vmatprep.subr.bf16.mxu0 %v3230_v34 }
 0x92b   : > { %2237 = vmatpush1.bf16.msra.mxu0 %v3228_v36 }
 0x92c   : > { %2238 = vmatprep.subr.bf16.mxu0 %v3236_v39 }
 0x92f   : > { %2239 = vmatpush1.bf16.msra.mxu0 %v3234_v49 }
 0x9e5   : > { %v1956_v54 = vpop.f32.mrb[16].mxu0 }
 0x9e6   : > { %v4487_v59 = vadd.f32 %v3309_v17, %v1956_v54  ;;  %v2952_v60 = vpop.f32.mrb[17].mxu0 }
 0x9e7   : > { %v1959_v19 = vpop.f32.mrb[18].mxu0 }
 0x9e8   : > { %v4490_v62 = vadd.f32 %v3310_v61, %v1959_v19  ;;  %v2953_v63 = vpop.f32.mrb[19].mxu0  ;;  %v1966_v2 = vmul.f32 %v4487_v59, %v4487_v59  ;;  %v1980_v23 = vmul.f32 %v2692_v47, %v4487_v59 }
 0x9ea   : > { %1968 = vadd.xlane.f32.xlu0 %v1966_v2  ;;  %v1967_v37 = vmul.f32 %v4490_v62, %v4490_v62  ;;  %v1981_v27 = vmul.f32 %v2692_v47, %v4490_v62 }
 0x9ec   : > { %1970 = vadd.xlane.f32.xlu1 %v1967_v37 }
 0xa77   : > { %v1969_v45 = vpop.xlane.xlu0 %1968 }
 0xa78   : > { %v1972_v46 = vmul.f32 0.0078125, %v1969_v45 }
 0xa79   : > { %v1971_v3 = vpop.xlane.xlu1 %1970 }
 0xa7a   : > { %v1982_v9 = vadd.f32 1e-05, %v1972_v46  ;;  %v1973_v21 = vmul.f32 0.0078125, %v1971_v3 }
 0xa7c   : > { %3289 = vrsqrt.f32 %v1982_v9  ;;  %v1983_v22 = vadd.f32 1e-05, %v1973_v21 }
 0xa7e   : > { %3291 = vrsqrt.f32 %v1983_v22 }
 0xa86   : > { %v3290_v57 = vpop.eup %3289 }
 0xa87   : > { %v1986_v24 = vmul.f32 %v3290_v57, %v1980_v23 }
 0xa88   : > { %v3292_v5 = vpop.eup %3291 }
 0xa89   : > { %v1987_v30 = vmul.f32 %v3292_v5, %v1981_v27 }
 0xa8b   : > { %v1988_v26 = vpack.c.bf16 %v1987_v30, %v1986_v24 }
 0xa8d   : > { %2118 = vmatmul.mubr.bf16.vlgmr.msra.gmra.mrb[28].mxu1 %v1988_v26  ;;  %2257 = vmatmul.mubr.bf16.vlgmr.msra.gmra.mrb[20].mxu0 %v1988_v26 }
 0xa8e   : > { %2805 = vmatpush3.bf16.msra.mxu1 %v3238_v1 }
 0xa8f   : > { %2806 = vmatprep.subr.bf16.mxu1 %v3239_v0 }
 0xa92   : > { %2807 = vmatpush3.bf16.msra.mxu1 %v3240_v15 }
 0xa93   : > { %2808 = vmatprep.subr.bf16.mxu1 %v3241_v51 }
 0xa96   : > { %2809 = vmatpush3.bf16.msra.mxu1 %v3242_v56 }
 0xa97   : > { %2810 = vmatprep.subr.bf16.mxu1 %v3243_v16 }
 0xa9a   : > { %2811 = vmatpush3.bf16.msra.mxu1 %v3244_v18 }
 0xa9b   : > { %2812 = vmatprep.subr.bf16.mxu1 %v3245_v52 }
 0xa9e   : > { %2813 = vmatpush3.bf16.msra.mxu1 %v3246_v53 }
 0xa9f   : > { %2814 = vmatprep.subr.bf16.mxu1 %v3247_v40 }
 0xaa2   : > { %2815 = vmatpush3.bf16.msra.mxu1 %v3248_v50 }
 0xaa3   : > { %2816 = vmatprep.subr.bf16.mxu1 %v3249_v55 }
 0xaa6   : > { %2817 = vmatpush3.bf16.msra.mxu1 %v3250_v28 }
 0xaa7   : > { %2818 = vmatprep.subr.bf16.mxu1 %v3251_v43 }
 0xaaa   : > { %2819 = vmatpush3.bf16.msra.mxu1 %v3252_v44 }
 0xb60   : > { %v2119_v10 = vpop.f32.mrb[28].mxu1  ;;  %v2258_v11 = vpop.f32.mrb[20].mxu0 }
 0xb61   : > { %v2725_v13 = vmul.f32 -1.442695, %v2119_v10  ;;  %v2121_v54 = vpop.f32.mrb[29].mxu1  ;;  %v2260_v17 = vpop.f32.mrb[21].mxu0 }
 0xb62   : > { %v2726_v60 = vmul.f32 -1.442695, %v2121_v54  ;;  %v2123_v19 = vpop.f32.mrb[30].mxu1  ;;  %v2262_v61 = vpop.f32.mrb[22].mxu0 }
 0xb63   : > { %3293 = vpow2.f32 %v2725_v13  ;;  %v2727_v63 = vmul.f32 -1.442695, %v2123_v19  ;;  %v2125_v2 = vpop.f32.mrb[31].mxu1  ;;  %v2264_v37 = vpop.f32.mrb[23].mxu0 }
 0xb64   : > { %3295 = vpow2.f32 %v2726_v60  ;;  %v2728_v6 = vmul.f32 -1.442695, %v2125_v2 }
 0xb65   : > { %3297 = vpow2.f32 %v2727_v63 }
 0xb66   : > { %3299 = vpow2.f32 %v2728_v6 }
 0xb6d   : > { %v3294_v4 = vpop.eup %3293 }
 0xb6e   : > { %v3296_v8 = vpop.eup %3295  ;;  %v2279_v12 = vadd.f32 1.0, %v3294_v4 }
 0xb6f   : > { %v3298_v48 = vpop.eup %3297  ;;  %v2280_v58 = vadd.f32 1.0, %v3296_v8 }
 0xb70   : > { %v3300_v14 = vpop.eup %3299  ;;  %3301 = vrcp.f32 %v2279_v12  ;;  %v2281_v20 = vadd.f32 1.0, %v3298_v48 }
 0xb71   : > { %3303 = vrcp.f32 %v2280_v58  ;;  %v2282_v25 = vadd.f32 1.0, %v3300_v14 }
 0xb72   : > { %3305 = vrcp.f32 %v2281_v20 }
 0xb73   : > { %3307 = vrcp.f32 %v2282_v25 }
 0xb7a   : > { %v3302_v29 = vpop.eup %3301 }
 0xb7b   : > { %v3304_v31 = vpop.eup %3303  ;;  %v2291_v32 = vmul.f32 %v3302_v29, %v2119_v10 }
 0xb7c   : > { %v3306_v33 = vpop.eup %3305  ;;  %v2292_v34 = vmul.f32 %v3304_v31, %v2121_v54 }
 0xb7d   : > { %v3308_v35 = vpop.eup %3307  ;;  %v2295_v36 = vmul.f32 %v2291_v32, %v2258_v11  ;;  %v2293_v38 = vmul.f32 %v3306_v33, %v2123_v19 }
 0xb7e   : > { %v2296_v39 = vmul.f32 %v2292_v34, %v2260_v17  ;;  %v2294_v42 = vmul.f32 %v3308_v35, %v2125_v2 }
 0xb7f   : > { %v2297_v41 = vmul.f32 %v2293_v38, %v2262_v61 }
 0xb80   : > { %v2298_v49 = vmul.f32 %v2294_v42, %v2264_v37 }
 0xb81   : > { %v2299_v45 = vpack.c.bf16 %v2297_v41, %v2295_v36 }
 0xb82   : > { %v2300_v46 = vpack.c.bf16 %v2298_v49, %v2296_v39 }
 0xb84   : > { %2461 = vmatprep.mubr.bf16.mxu1 %v2300_v46 }
 0xb85   : > { %2462 = vmatmul.mubr.bf16.vlgmr.msra.gmra.mrb[32].mxu1 %v2299_v45 }
 0xc58   : > { %v2820_v3 = vpop.f32.mrb[32].mxu1 }
 0xc59   : > { %v2821_v9 = vpop.f32.mrb[33].mxu1 }
 0xc5a   : > { %v2822_v21 = vadd.f32 %v2821_v9, %v2820_v3  ;;  %v2823_v22 = vpop.f32.mrb[34].mxu1 }
 0xc5b   : > { %v2824_v47 = vpop.f32.mrb[35].mxu1 }
 0xc5c   : > { %v2470_v57 = vadd.f32 %v2822_v21, %v4487_v59  ;;  %v2825_v23 = vadd.f32 %v2824_v47, %v2823_v22 }
 0xc5e   : > { %2472 = vst [vmem:[%s533_s15] sm:$0xff] %v2470_v57  ;;  %v2471_v27 = vadd.f32 %v2825_v23, %v4490_v62 }
 0xc60   : > { %2473 = vst [vmem:[%s533_s15 + $0x8] sm:$0xff] %v2471_v27 }
 0xc61   : > { %3550 = shalt.err (!%p3547_p10)
}
 0xc62   : > { %s3551_s14 = scalar_lea.hbm %s4510_s2, 256  ;;  %s3555_s28 = scalar_lea.hbm %s4610_s5, 512 }
 0xc63   : > { %p3552_p11 = scmp.ne.s32.totalorder %s4510_s2, %s3551_s14  ;;  %p3556_p9 = scmp.lt.u32.totalorder %s4510_s2, %s4610_s5 }
 0xc64   : > { %p3557_p7 = scmp.lt.u32.totalorder %s3555_s28, %s3551_s14  ;;  %p3559_p12 = scmp.lt.u32.totalorder %s3551_s14, %s4510_s2 }
 0xc65   : > { %p3553_p3 = pnand %p3552_p11, %p4611_p1 }
 0xc66   : > { %p3558_p4 = por %p3557_p7, %p3556_p9 }
 0xc67   : > { %p3554_p5 = pneg %p3553_p3 }
 0xc68   : > { %p3560_p13 = por %p3559_p12, %p3558_p4 }
 0xc6a   : > { %p3561_p0 = pnand %p3560_p13, %p3554_p5 }
 0xc6c   : > { %3564 = shalt.err (!%p3561_p0)
}
 0xc6d   : > { %s3644_s27 = smov 128   ;;  %s3645_s29 = smov 8  }
 0xc6e   : > { %2984 = dma.vmem_to_hbm [thread:$0]  (%p4611_p1), %s4505_s18, 256, %s4510_s2, %s2475_s30, %s3644_s27, %s3644_s27, %s3645_s29  }
 0xc6f PF: > { %s2503_s11 = sand.u32 1, %s3607_s21   ;;  %p4612_p2 = scmp.ne.s32.totalorder %s4596_s20, 0 }
 0xc70   : > { %p4613_p8 = scmp.ge.s32.totalorder %s3619_s24, 2  ;;  %s2504_s13 = scalar_lea.sflag [#allocation5], %s2503_s11 }
 0xc72   : > { %p3013_p6 = pnand %p4613_p8, %p4612_p2 }
 0xc74   : > { %3602 = dma.done.wait (!%p3013_p6), %s2504_s13, 256  }
 0xc75   : > { %3604 = vsyncadd (!%p3013_p6), %s2504_s13, 4294967040  ;;  %p29_p10 = scmp.ge.s32.totalorder %s3926_s25, 4   ;;  %s4614_s21 = smov %s3611_s22 }
 0xc76   : > { %s4615_s22 = smov %s3615_s23  ;;  %s4616_s23 = smov %s3938_s3 }
 0xc77   : > { %s4617_s24 = smov %s3926_s25  ;;  %31 = sbr.rel (!%p29_p10) target bundleno = 16 (0x10), region = 141 }
 0xc7e   :  { %2509 = vsyncpa [#allocation4], 1 }
 0xc7f   :  { %2511 = vsyncpa [#allocation4 + $0x1], 1 }
 0xc80   :  { %2512 = vsyncpa [#allocation7], 1 }
 0xc81   :  { %2513 = vsyncpa [#allocation10], 1 }
 0xc82   :  { %2514 = vsyncpa [#allocation13], 1 }
 0xc83   :  { %2515 = vsyncpa [#allocation16], 1 }
 0xc84   :  { %2516 = vsyncpa [#allocation5], 1 }
 0xc85   :  { %2518 = vsyncpa [#allocation5 + $0x1], 1 }

// kernel: tpu_custom_call.1
= control target key start
LH: loop header
LB: loop body
LE: loop exit
PB: predicated region body
PF: predicated region fallthrough
CT: control target
= control target key end

     0   :  { %s4555_s0 = inlined_call_operand.hbm [shape: f32[2,16,128], index: 0, kind: input, shape index: {}]   ;;  %s4556_s1 = inlined_call_operand.vmem [shape: f32[1,128], index: 1, kind: input, shape index: {}]   ;;  %s4557_s2 = inlined_call_operand.vmem [shape: f32[1,128], index: 2, kind: input, shape index: {}]   ;;  %s4558_s3 = inlined_call_operand.hbm [shape: bf16[128,128], index: 3, kind: input, shape index: {}]   ;;  %s4559_s4 = inlined_call_operand.hbm [shape: bf16[128,128], index: 4, kind: input, shape index: {}]   ;;  %s4560_s5 = inlined_call_operand.hbm [shape: bf16[128,128], index: 5, kind: input, shape index: {}]   ;;  %s4561_s6 = inlined_call_operand.hbm [shape: bf16[128,128], index: 6, kind: input, shape index: {}]   ;;  %s4562_s7 = inlined_call_operand.hbm [shape: bf16[128,256], index: 7, kind: input, shape index: {}]   ;;  %s4563_s8 = inlined_call_operand.hbm [shape: bf16[256,128], index: 8, kind: input, shape index: {}]   ;;  %s4564_s9 = inlined_call_operand.hbm [shape: bf16[128,256], index: 9, kind: input, shape index: {}]   ;;  %s4565_s10 = inlined_call_operand.vmem [shape: f32[16,16], index: 10, kind: input, shape index: {}]   ;;  %s4566_s11 = inlined_call_operand.vmem [shape: f32[16,16], index: 11, kind: input, shape index: {}]   ;;  %s4567_s12 = inlined_call_operand.hbm [shape: f32[2,16,128], index: 12, kind: output, shape index: {}]  }
   0x1   :  { %4579 = sst [smem:[#allocation24_spill]] %s4556_s1 }
   0x2   :  { %4580 = sst [smem:[#allocation25_spill]] %s4557_s2 }
   0x3   :  { %4581 = sst [smem:[#allocation26_spill]] %s4558_s3 }
   0x4   :  { %4582 = sst [smem:[#allocation27_spill]] %s4560_s5 }
   0x5   :  { %4583 = sst [smem:[#allocation28_spill]] %s4566_s11 }
   0x6   :  { %4584 = sst [smem:[#allocation29_spill]] %s4567_s12 }
   0x7   :  { %17 = vsyncpa [#allocation4], 0 }
   0x8   :  { %19 = vsyncpa [#allocation4 + $0x1], 0 }
   0x9   :  { %20 = vsyncpa [#allocation7], 0 }
   0xa   :  { %21 = vsyncpa [#allocation10], 0 }
   0xb   :  { %22 = vsyncpa [#allocation13], 0 }
   0xc   :  { %23 = vsyncpa [#allocation16], 0 }
   0xd   :  { %24 = vsyncpa [#allocation5], 0 }
   0xe   :  { %26 = vsyncpa [#allocation5 + $0x1], 0  ;;  %s3711_s21 = smov 0   ;;  %s3713_s22 = smov 0  }
   0xf   :  { %s3715_s23 = smov 0   ;;  %s3717_s24 = smov 0  }
  0x10 LB: > { %s3621_s25 = smov [#allocation6]   ;;  %s3732_s27 = sadd.s32 4294967295, %s3619_s24   ;;  %s3619_s24 = sphi %s3717_s24, %s4617_s24   ;;  %s3615_s23 = sphi %s3715_s23, %s4616_s23   ;;  %s3611_s22 = sphi %s3713_s22, %s4615_s22   ;;  %s3607_s21 = sphi %s3711_s21, %s4614_s21  }
  0x11   : > { %s338_s26 = sshll.u32 %s3621_s25, 4  ;;  %p2629_p0 = scmp.ge.s32.totalorder %s3619_s24, 1  ;;  %s3737_s26 = int_to_ptr.vmem [resolvable:$true] %s338_s26 }
  0x12   : > { %p4574_p1 = scmp.eq.s32.totalorder %s3732_s27, 0  ;;  %p320_p2 = scmp.lt.s32.totalorder %s3619_s24, 3 }
  0x13   : > { %s3622_s29 = smov [#allocation9]   ;;  %s3623_s14 = smov [#allocation12]  }
  0x14   : > { %p3739_p3 = pnand %p2629_p0, %p320_p2  ;;  %s364_s30 = sshll.u32 %s3622_s29, 4  ;;  %s3752_s30 = int_to_ptr.vmem [resolvable:$true] %s364_s30 }
  0x15   : > { %s390_s15 = sshll.u32 %s3623_s14, 4  ;;  %s4587_s3 = sld [smem:[#allocation26_spill]]  ;;  %s3754_s15 = int_to_ptr.vmem [resolvable:$true] %s390_s15 }
  0x16   : > { %s4585_s28 = scalar_select %p3739_p3, 1, 0 }
  0x17   : > { %p2986_p5 = pneg %p3739_p3 }
  0x19   : > { %p3748_p6 = pnand %p2986_p5, %p4574_p1 }
  0x1b   : > { %s3311_s18 = scalar_lea.hbm %s4587_s3, 1024  ;;  %p3764_p8 = pneg %p3748_p6 }
  0x1c   : > { %p3312_p7 = scmp.ne.s32.totalorder %s4587_s3, %s3311_s18  ;;  %p3318_p11 = scmp.lt.u32.totalorder %s3311_s18, %s4587_s3 }
  0x1e   : > { %p3314_p9 = pnand %p3764_p8, %p3312_p7 }
  0x20   : > { %p3315_p10 = pneg %p3314_p9 }
  0x22   : > { %p3320_p12 = pnand %p3318_p11, %p3315_p10 }
  0x24   : > { %3323 = shalt.err (!%p3320_p12)
}
  0x25   : > { %s3324_s16 = scalar_lea.vmem %s3737_s26, 1024  ;;  %p3332_p5 = scmp.lt.s32.totalorder %s3737_s26, %s3737_s26 }
  0x26   : > { %p3325_p13 = scmp.ne.s32.totalorder %s3737_s26, %s3324_s16  ;;  %p3333_p4 = scmp.lt.s32.totalorder %s3324_s16, %s3324_s16 }
  0x28   : > { %p3327_p0 = pnand %p3325_p13, %p3764_p8  ;;  %p3334_p7 = por %p3333_p4, %p3332_p5 }
  0x2a   : > { %p3328_p2 = pneg %p3327_p0 }
  0x2c   : > { %p3335_p9 = pnand %p3334_p7, %p3328_p2 }
  0x2e   : > { %3338 = shalt.err (!%p3335_p9)
}
  0x2f   : > { %s4570_s17 = smov 64   ;;  %s4572_s18 = smov 4  }
  0x30   : > { %2989 = dma.hbm_to_vmem [thread:$0]  (!%p3748_p6), %s4587_s3, 1024, %s3737_s26, [#allocation7], %s4570_s17, %s4570_s17, %s4572_s18  }
  0x31   : > { %s4589_s5 = sld [smem:[#allocation27_spill]] }
  0x37   : > { %s3339_s16 = scalar_lea.hbm %s4589_s5, 1024 }
  0x38   : > { %p3340_p4 = scmp.ne.s32.totalorder %s4589_s5, %s3339_s16  ;;  %p3346_p12 = scmp.lt.u32.totalorder %s3339_s16, %s4589_s5 }
  0x3a   : > { %p3342_p10 = pnand %p3340_p4, %p3764_p8 }
  0x3c   : > { %p3343_p11 = pneg %p3342_p10 }
  0x3e   : > { %p3348_p13 = pnand %p3346_p12, %p3343_p11 }
  0x40   : > { %3351 = shalt.err (!%p3348_p13)
}
  0x41   : > { %s3352_s26 = scalar_lea.vmem %s3752_s30, 1024  ;;  %p3360_p7 = scmp.lt.s32.totalorder %s3752_s30, %s3752_s30 }
  0x42   : > { %p3353_p0 = scmp.ne.s32.totalorder %s3752_s30, %s3352_s26  ;;  %p3361_p9 = scmp.lt.s32.totalorder %s3352_s26, %s3352_s26 }
  0x44   : > { %p3355_p2 = pnand %p3353_p0, %p3764_p8  ;;  %p3362_p4 = por %p3361_p9, %p3360_p7 }
  0x46   : > { %p3356_p5 = pneg %p3355_p2 }
  0x48   : > { %p3363_p10 = pnand %p3362_p4, %p3356_p5 }
  0x4a   : > { %3366 = shalt.err (!%p3363_p10)
}
  0x4b   : > { %2995 = dma.hbm_to_vmem [thread:$0]  (!%p3748_p6), %s4589_s5, 1024, %s3752_s30, [#allocation10], %s4570_s17, %s4570_s17, %s4572_s18  }
  0x4c   : > { %s3367_s19 = scalar_lea.hbm %s4562_s7, 2048 }
  0x4d   : > { %p3368_p11 = scmp.ne.s32.totalorder %s4562_s7, %s3367_s19  ;;  %p3374_p0 = scmp.lt.u32.totalorder %s3367_s19, %s4562_s7 }
  0x4f   : > { %p3370_p12 = pnand %p3368_p11, %p3764_p8 }
  0x51   : > { %p3371_p13 = pneg %p3370_p12 }
  0x53   : > { %p3376_p2 = pnand %p3374_p0, %p3371_p13 }
  0x55   : > { %3379 = shalt.err (!%p3376_p2)
}
  0x56   : > { %s3380_s30 = scalar_lea.vmem %s3754_s15, 2048  ;;  %p3388_p4 = scmp.lt.s32.totalorder %s3754_s15, %s3754_s15 }
  0x57   : > { %p3381_p5 = scmp.ne.s32.totalorder %s3754_s15, %s3380_s30  ;;  %p3389_p10 = scmp.lt.s32.totalorder %s3380_s30, %s3380_s30 }
  0x59   : > { %p3383_p7 = pnand %p3381_p5, %p3764_p8  ;;  %p3390_p11 = por %p3389_p10, %p3388_p4 }
  0x5b   : > { %p3384_p9 = pneg %p3383_p7 }
  0x5d   : > { %p3391_p12 = pnand %p3390_p11, %p3384_p9 }
  0x5f   : > { %3394 = shalt.err (!%p3391_p12)
}
  0x60   : > { %s4576_s26 = smov 128   ;;  %s3627_s1 = smov 8  }
  0x61   : > { %3001 = dma.hbm_to_vmem [thread:$0]  (!%p3748_p6), %s4562_s7, 2048, %s3754_s15, [#allocation13], %s4576_s26, %s4576_s26, %s3627_s1  }
  0x62   : > { %s3628_s12 = smov [#allocation8]   ;;  %s3629_s20 = smov [#allocation11]  }
  0x63   : > { %s351_s19 = sshll.u32 %s3628_s12, 4  ;;  %s377_s29 = sshll.u32 %s3629_s20, 4  ;;  %s352_s19 = int_to_ptr.vmem [resolvable:$true] %s351_s19  ;;  %s378_s29 = int_to_ptr.vmem [resolvable:$true] %s377_s29 }
  0x64   : > { %s3395_s30 = scalar_lea.hbm %s4559_s4, 1024 }
  0x65   : > { %p3396_p13 = scmp.ne.s32.totalorder %s4559_s4, %s3395_s30  ;;  %p3402_p5 = scmp.lt.u32.totalorder %s3395_s30, %s4559_s4 }
  0x67   : > { %p3398_p0 = pnand %p3396_p13, %p3764_p8 }
  0x69   : > { %p3399_p2 = pneg %p3398_p0 }
  0x6b   : > { %p3404_p7 = pnand %p3402_p5, %p3399_p2 }
  0x6d   : > { %3407 = shalt.err (!%p3404_p7)
}
  0x6e   : > { %s3408_s15 = scalar_lea.vmem %s352_s19, 1024  ;;  %p3416_p11 = scmp.lt.s32.totalorder %s352_s19, %s352_s19 }
  0x6f   : > { %p3409_p9 = scmp.ne.s32.totalorder %s352_s19, %s3408_s15  ;;  %p3417_p12 = scmp.lt.s32.totalorder %s3408_s15, %s3408_s15 }
  0x71   : > { %p3411_p4 = pnand %p3409_p9, %p3764_p8  ;;  %p3418_p1 = por %p3417_p12, %p3416_p11 }
  0x73   : > { %p3412_p10 = pneg %p3411_p4 }
  0x75   : > { %p3419_p3 = pnand %p3418_p1, %p3412_p10 }
  0x77   : > { %3422 = shalt.err (!%p3419_p3)
}
  0x78   : > { %s4590_s17 = smov 4   ;;  %s4591_s18 = smov 64  }
  0x79   : > { %2992 = dma.hbm_to_vmem [thread:$0]  (!%p3748_p6), %s4559_s4, 1024, %s352_s19, [#allocation7], %s4591_s18, %s4591_s18, %s4590_s17  }
  0x7a   : > { %s3423_s12 = scalar_lea.hbm %s4561_s6, 1024 }
  0x7b   : > { %p3424_p1 = scmp.ne.s32.totalorder %s4561_s6, %s3423_s12  ;;  %p3430_p0 = scmp.lt.u32.totalorder %s3423_s12, %s4561_s6 }
  0x7d   : > { %p3426_p3 = pnand %p3424_p1, %p3764_p8 }
  0x7f   : > { %p3427_p13 = pneg %p3426_p3 }
  0x81   : > { %p3432_p2 = pnand %p3430_p0, %p3427_p13 }
  0x83   : > { %3435 = shalt.err (!%p3432_p2)
}
  0x84   : > { %s3436_s15 = scalar_lea.vmem %s378_s29, 1024  ;;  %p3444_p4 = scmp.lt.s32.totalorder %s378_s29, %s378_s29 }
  0x85   : > { %p3437_p5 = scmp.ne.s32.totalorder %s378_s29, %s3436_s15  ;;  %p3445_p10 = scmp.lt.s32.totalorder %s3436_s15, %s3436_s15 }
  0x87   : > { %p3439_p7 = pnand %p3437_p5, %p3764_p8  ;;  %p3446_p11 = por %p3445_p10, %p3444_p4 }
  0x89   : > { %p3440_p9 = pneg %p3439_p7 }
  0x8b   : > { %p3447_p12 = pnand %p3446_p11, %p3440_p9 }
  0x8d   : > { %3450 = shalt.err (!%p3447_p12)
}
  0x8e   : > { %2998 = dma.hbm_to_vmem [thread:$0]  (!%p3748_p6), %s4561_s6, 1024, %s378_s29, [#allocation10], %s4591_s18, %s4591_s18, %s4590_s17  }
  0x8f   : > { %s3630_s5 = smov [#allocation14]   ;;  %s3631_s11 = smov [#allocation15]  }
  0x90   : > { %s403_s2 = sshll.u32 %s3630_s5, 4  ;;  %s416_s12 = sshll.u32 %s3631_s11, 4  ;;  %s404_s2 = int_to_ptr.vmem [resolvable:$true] %s403_s2  ;;  %s417_s12 = int_to_ptr.vmem [resolvable:$true] %s416_s12 }
  0x91   : > { %s3451_s16 = scalar_lea.hbm %s4563_s8, 2048 }
  0x92   : > { %p3452_p1 = scmp.ne.s32.totalorder %s4563_s8, %s3451_s16  ;;  %p3458_p0 = scmp.lt.u32.totalorder %s3451_s16, %s4563_s8 }
  0x94   : > { %p3454_p3 = pnand %p3452_p1, %p3764_p8 }
  0x96   : > { %p3455_p13 = pneg %p3454_p3 }
  0x98   : > { %p3460_p2 = pnand %p3458_p0, %p3455_p13 }
  0x9a   : > { %3463 = shalt.err (!%p3460_p2)
}
  0x9b   : > { %s3464_s29 = scalar_lea.vmem %s404_s2, 2048  ;;  %p3472_p4 = scmp.lt.s32.totalorder %s404_s2, %s404_s2 }
  0x9c   : > { %p3465_p5 = scmp.ne.s32.totalorder %s404_s2, %s3464_s29  ;;  %p3473_p10 = scmp.lt.s32.totalorder %s3464_s29, %s3464_s29 }
  0x9e   : > { %p3467_p7 = pnand %p3465_p5, %p3764_p8  ;;  %p3474_p11 = por %p3473_p10, %p3472_p4 }
  0xa0   : > { %p3468_p9 = pneg %p3467_p7 }
  0xa2   : > { %p3475_p12 = pnand %p3474_p11, %p3468_p9 }
  0xa4   : > { %3478 = shalt.err (!%p3475_p12)
}
  0xa5   : > { %3004 = dma.hbm_to_vmem [thread:$0]  (!%p3748_p6), %s4563_s8, 2048, %s404_s2, [#allocation13], %s4591_s18, %s4591_s18, %s4590_s17  }
  0xa6   : > { %s3479_s20 = scalar_lea.hbm %s4564_s9, 2048 }
  0xa7   : > { %p3480_p1 = scmp.ne.s32.totalorder %s4564_s9, %s3479_s20  ;;  %p3486_p0 = scmp.lt.u32.totalorder %s3479_s20, %s4564_s9 }
  0xa9   : > { %p3482_p3 = pnand %p3480_p1, %p3764_p8 }
  0xab   : > { %p3483_p13 = pneg %p3482_p3 }
  0xad   : > { %p3488_p2 = pnand %p3486_p0, %p3483_p13 }
  0xaf   : > { %3491 = shalt.err (!%p3488_p2)
}
  0xb0   : > { %s3492_s19 = scalar_lea.vmem %s417_s12, 2048  ;;  %p3500_p4 = scmp.lt.s32.totalorder %s417_s12, %s417_s12 }
  0xb1   : > { %p3493_p5 = scmp.ne.s32.totalorder %s417_s12, %s3492_s19  ;;  %p3501_p10 = scmp.lt.s32.totalorder %s3492_s19, %s3492_s19 }
  0xb3   : > { %p3495_p7 = pnand %p3493_p5, %p3764_p8  ;;  %p3502_p11 = por %p3501_p10, %p3500_p4 }
  0xb5   : > { %p3496_p9 = pneg %p3495_p7 }
  0xb7   : > { %p3503_p12 = pnand %p3502_p11, %p3496_p9 }
  0xb9   : > { %3506 = shalt.err (!%p3503_p12)
}
  0xba   : > { %s4592_s17 = smov 128   ;;  %s2628_s13 = sadd.s32 4294967294, %s3619_s24  }
  0xbb   : > { %3007 = dma.hbm_to_vmem [thread:$0]  (!%p3748_p6), %s4564_s9, 2048, %s417_s12, [#allocation16], %s4592_s17, %s4592_s17, %s3627_s1  }
  0xbc   : > { %s3926_s25 = sadd.s32 1, %s3619_s24   ;;  %s39_s29 = sadd.s32 1, %s3615_s23 }
  0xbd   : > { %s36_s26 = ssub.s32 %s3619_s24, %s3926_s25  ;;  %p46_p8 = scmp.ne.s32.totalorder %s3615_s23, %s3611_s22 }
  0xbe   : > { %p37_p1 = scmp.eq.s32.totalorder %s36_s26, 0  ;;  %p47_p3 = scmp.eq.s32.totalorder %s3619_s24, 0 }
  0xbf   : > { %p52_p13 = scmp.ne.s32.totalorder %s3611_s22, %s3607_s21  ;;  %p307_p0 = scmp.eq.s32.totalorder %s3732_s27, 1 }
  0xc0   : > { %s3938_s3 = scalar_select %p37_p1, %s3615_s23, %s39_s29  }
  0xc1   : > { %p48_p2 = por %p47_p3, %p46_p8  ;;  %p4593_p5 = scmp.eq.s32.totalorder %s3732_s27, 0 }
  0xc2   : > { %p3946_p6 = por %p307_p0, %p46_p8  ;;  %p313_p9 = scmp.eq.s32.totalorder %s2628_s13, 1 }
  0xc3   : > { %p3942_p7 = por %p4593_p5, %p52_p13  ;;  %p3023_p4 = scmp.lt.s32.totalorder %s3619_s24, 2 }
  0xc4   : > { %s4595_s12 = scalar_select %p3946_p6, 1, 0 }
  0xc5   : > { %s436_s11 = sand.u32 1, %s3615_s23   ;;  %p3952_p10 = por %p313_p9, %p52_p13 }
  0xc6   : > { %s2638_s14 = sshll.u32 %s436_s11, 4  ;;  %s2750_s16 = sshll.u32 %s3619_s24, 8 }
  0xc7   : > { %s4596_s20 = scalar_select %p3952_p10, 1, 0 }
  0xc8   : > { %s3960_s19 = scalar_lea.hbm %s4555_s0, %s2750_s16  ;;  %s440_s18 = scalar_lea.vmem [#allocation3], %s2638_s14 }
  0xc9   : > { %s447_s2 = sshll.u32 %s440_s18, 4  ;;  %p3962_p11 = pnand %p3023_p4, %p48_p2  ;;  %s3966_s2 = int_to_ptr.vmem [resolvable:$true] %s447_s2 }
  0xca   : > { %s3968_s29 = scalar_lea.sflag [#allocation4], %s436_s11  ;;  %s3507_s26 = scalar_lea.hbm %s3960_s19, 256 }
  0xcb   : > { %p3508_p12 = scmp.ne.s32.totalorder %s3960_s19, %s3507_s26  ;;  %p3509_p8 = pneg %p3962_p11 }
  0xcc   : > { %s3512_s30 = scalar_lea.hbm %s4555_s0, 512  ;;  %p3513_p13 = scmp.lt.u32.totalorder %s3960_s19, %s4555_s0 }
  0xcd   : > { %p3510_p1 = pnand %p3509_p8, %p3508_p12  ;;  %p3514_p0 = scmp.lt.u32.totalorder %s3512_s30, %s3507_s26 }
  0xce   : > { %p3516_p5 = scmp.lt.u32.totalorder %s3507_s26, %s3960_s19 }
  0xcf   : > { %p3511_p3 = pneg %p3510_p1  ;;  %p3515_p2 = por %p3514_p0, %p3513_p13 }
  0xd1   : > { %p3517_p9 = por %p3516_p5, %p3515_p2 }
  0xd3   : > { %p3518_p4 = pnand %p3517_p9, %p3511_p3 }
  0xd5   : > { %3521 = shalt.err (!%p3518_p4)
}
  0xd6   : > { %s3522_s11 = scalar_lea.vmem %s3966_s2, 256  ;;  %s3632_s14 = smov [#allocation3]  }
  0xd7   : > { %p3523_p12 = scmp.ne.s32.totalorder %s3966_s2, %s3522_s11  ;;  %s3527_s16 = sshll.u32 %s3632_s14, 4  ;;  %s3528_s16 = int_to_ptr.vmem [resolvable:$false] %s3527_s16 }
  0xd8   : > { %s3529_s15 = scalar_lea.vmem %s3528_s16, 512  ;;  %p3530_p6 = scmp.lt.s32.totalorder %s3966_s2, %s3528_s16 }
  0xd9   : > { %p3525_p1 = pnand %p3523_p12, %p3509_p8  ;;  %p3531_p13 = scmp.lt.s32.totalorder %s3529_s15, %s3522_s11 }
  0xdb   : > { %p3526_p10 = pneg %p3525_p1  ;;  %p3532_p0 = por %p3531_p13, %p3530_p6 }
  0xdd   : > { %p3533_p2 = pnand %p3532_p0, %p3526_p10 }
  0xdf   : > { %3536 = shalt.err (!%p3533_p2)
}
  0xe0   : > { %3011 = dma.hbm_to_vmem [thread:$0]  (!%p3962_p11), %s3960_s19, 256, %s3966_s2, %s3968_s29, %s4592_s17, %s4592_s17, %s3627_s1  }
  0xe1   : > { %p4598_p8 = scmp.ne.s32.totalorder %s4585_s28, 0 }
  0xe2   : > { %s4002_s26 = sand.u32 (!%p4598_p8), 1, %s3611_s22  }
  0xe3   : > { %459 = sbr.rel (%p4598_p8) target bundleno = 3183 (0xc6f), region = 68  ;;  %s2642_s30 = sshll.u32 (!%p4598_p8), %s4002_s26, 4 }
  0xe4   : > { %s462_s18 = scalar_lea.sflag (!%p4598_p8), [#allocation4], %s4002_s26  ;;  %s4008_s13 = scalar_lea.vmem (!%p4598_p8), [#allocation3], %s2642_s30 }
  0xea   : > { %3582 = dma.done.wait (%p3942_p7), %s462_s18, 256  }
  0xeb   : > { %3584 = vsyncadd (%p3942_p7), %s462_s18, 4294967040  ;;  %p4599_p6 = scmp.eq.s32.totalorder %s3732_s27, 0 }
  0xed   : > { %3586 = dma.done.wait (%p4599_p6), [#allocation7], 2048   ;;  %p4600_p10 = pmov %p4599_p6 }
  0xee   : > { %p4601_p11 = pmov %p4599_p6 }
  0xef   : > { %3588 = vsyncadd (%p4600_p10), [#allocation7], 4294965248 }
  0xf0   : > { %3590 = dma.done.wait (%p4601_p11), [#allocation10], 2048   ;;  %p4602_p3 = pmov %p4599_p6 }
  0xf2   : > { %3592 = vsyncadd (%p4602_p3), [#allocation10], 4294965248  ;;  %p4603_p5 = pmov %p4602_p3 }
  0xf3   : > { %p4604_p9 = pmov %p4602_p3 }
  0xf4   : > { %3594 = dma.done.wait (%p4603_p5), [#allocation13], 4096  }
  0xf5   : > { %3596 = vsyncadd (%p4604_p9), [#allocation13], 4294963200  ;;  %p4605_p7 = pmov %p4602_p3 }
  0xf6   : > { %p4606_p4 = pmov %p4602_p3 }
  0xf7   : > { %3598 = dma.done.wait (%p4605_p7), [#allocation16], 2048  }
  0xf8   : > { %3600 = vsyncadd (%p4606_p4), [#allocation16], 4294965248  ;;  %v3633_v0 = vmov 0.0   ;;  %v4033_v1 = vld [vmem:[%s4008_s13] sm:$0xff]  ;;  %v4036_v2 = vld [vmem:[%s4008_s13 + $0x8] sm:$0xff]  ;;  %vm3634_vm0 = vmmov 0  }
  0xf9   : > { %2826 = vmatprep.subr.bf16.mxu0 %v3633_v0  ;;  %2846 = vmatprep.subr.bf16.mxu1 %v3633_v0  ;;  %v538_v3 = vmul.f32 %v4033_v1, %v4033_v1  ;;  %v3157_v4 = vld [vmem:[#allocation6] sm:$0xff]   ;;  %v539_v6 = vmul.f32 %v4036_v2, %v4036_v2  ;;  %v3159_v7 = vld [vmem:[#allocation6 + $0x8] sm:$0xff]   ;;  %v3161_v9 = vld [vmem:[#allocation6 + $0x10] sm:$0xff]   ;;  %s4607_s19 = sld [smem:[#allocation28_spill]]  ;;  %s3635_s2 = smov 16   ;;  %vm939_vm1 = vcmask 130048  }
  0xfa   : > { %v3158_v5 = vld [vmem:[#allocation8] sm:$0xff]   ;;  %2827 = vmatpush3.bf16.msra.mxu0 %v3157_v4  ;;  %v3160_v8 = vld [vmem:[#allocation8 + $0x8] sm:$0xff]   ;;  %v3162_v10 = vld [vmem:[#allocation8 + $0x10] sm:$0xff]   ;;  %2842 = vmatprep.mubr.msk.bf16.mxu0 %vm3634_vm0, %v3633_v0  ;;  %s4608_s28 = sld [smem:[#allocation24_spill]]  ;;  %s3636_s1 = smov 112   ;;  %vm983_vm2 = vcmask 261120  }
  0xfb   : > { %540 = vadd.xlane.f32.xlu0 %v538_v3  ;;  %2847 = vmatpush3.bf16.msra.mxu1 %v3158_v5  ;;  %v3163_v11 = vld [vmem:[#allocation6 + $0x18] sm:$0xff]   ;;  %v3165_v13 = vld [vmem:[#allocation6 + $0x20] sm:$0xff]   ;;  %v3167_v15 = vld [vmem:[#allocation6 + $0x28] sm:$0xff]   ;;  %s3637_s17 = smov 48   ;;  %s3638_s5 = smov 80   ;;  %vm1352_vm5 = vcmask 523520  }
  0xfc   : > { %2828 = vmatprep.subr.bf16.mxu0 %v3633_v0  ;;  %2848 = vmatprep.subr.bf16.mxu1 %v3633_v0  ;;  %v3164_v12 = vld [vmem:[#allocation8 + $0x18] sm:$0xff]   ;;  %v3166_v14 = vld [vmem:[#allocation8 + $0x20] sm:$0xff]   ;;  %v3168_v16 = vld [vmem:[#allocation8 + $0x28] sm:$0xff]   ;;  %s3640_s29 = smov 64   ;;  %s3641_s11 = smov 96   ;;  %vm1602_vm6 = vcmask 785920  }
  0xfd   : > { %v3169_v17 = vld [vmem:[#allocation6 + $0x30] sm:$0xff]   ;;  %2862 = vmatprep.mubr.msk.bf16.mxu1 %vm3634_vm0, %v3633_v0  ;;  %v3171_v19 = vld [vmem:[#allocation6 + $0x38] sm:$0xff]   ;;  %v3173_v38 = vld [vmem:[#allocation9] sm:$0xff]   ;;  %vm1852_vm7 = vcmask 1048320   ;;  %s4609_s16 = sld [smem:[#allocation25_spill]]  ;;  %s533_s15 = scalar_lea.vmem [#allocation17], %s2642_s30 }
  0xfe   : > { %2829 = vmatpush3.bf16.msra.mxu0 %v3159_v7  ;;  %v3170_v18 = vld [vmem:[#allocation8 + $0x30] sm:$0xff]   ;;  %v3172_v20 = vld [vmem:[#allocation8 + $0x38] sm:$0xff]   ;;  %v3174_v40 = vld [vmem:[#allocation9 + $0x8] sm:$0xff]   ;;  %s2488_s18 = sshll.u32 %s533_s15, 4  ;;  %s2475_s30 = scalar_lea.sflag [#allocation5], %s4002_s26  ;;  %s4505_s18 = int_to_ptr.vmem [resolvable:$true] %s2488_s18 }
  0xff   : > { %542 = vadd.xlane.f32.xlu0 %v539_v6  ;;  %2849 = vmatpush3.bf16.msra.mxu1 %v3160_v8  ;;  %v4065_v21 = vld [vmem:[%s4565_s10] sm:$0xff]  ;;  %v4079_v23 = vld [vmem:[%s4565_s10 + $0x8] sm:$0xff]  ;;  %v3177_v43 = vld [vmem:[#allocation9 + $0x20] sm:$0xff]   ;;  %p4611_p1 = scmp.ne.s32.totalorder %s4595_s12, 0 }
 0x100   : > { %2830 = vmatprep.subr.bf16.mxu0 %v3633_v0  ;;  %2850 = vmatprep.subr.bf16.mxu1 %v3633_v0  ;;  %v4070_v22 = vld [vmem:[%s4607_s19] sm:$0xff]  ;;  %v4086_v24 = vld [vmem:[%s4607_s19 + $0x8] sm:$0xff]  ;;  %v3178_v44 = vld [vmem:[#allocation9 + $0x28] sm:$0xff]  }
 0x101   : > { %913 = vrot.lane.b32.xlu1 %v4065_v21, %s3635_s2  ;;  %v2651_v31 = vld [vmem:[%s4608_s28] ss:$0 sm:$0xff]  ;;  %v3176_v42 = vld [vmem:[#allocation9 + $0x18] sm:$0xff]   ;;  %s2751_s28 = sshll.u32 %s3732_s27, 8  ;;  %s3537_s27 = scalar_lea.vmem %s4505_s18, 256 }
 0x102   : > { %2831 = vmatpush3.bf16.msra.mxu0 %v3161_v9  ;;  %v552_v32 = vmul.f32 %v2651_v31, %v4033_v1  ;;  %v553_v33 = vmul.f32 %v2651_v31, %v4036_v2  ;;  %v3175_v41 = vld [vmem:[#allocation9 + $0x10] sm:$0xff]   ;;  %v3180_v46 = vld [vmem:[#allocation9 + $0x38] sm:$0xff]   ;;  %p3538_p12 = scmp.ne.s32.totalorder %s4505_s18, %s3537_s27 }
 0x103   : > { %2832 = vmatprep.subr.bf16.mxu0 %v3633_v0  ;;  %2851 = vmatpush3.bf16.msra.mxu1 %v3162_v10  ;;  %v3179_v45 = vld [vmem:[#allocation9 + $0x30] sm:$0xff]  }
 0x104   : > { %2852 = vmatprep.subr.bf16.mxu1 %v3633_v0  ;;  %p3539_p13 = pnand %p3538_p12, %p4611_p1 }
 0x105   : > { %915 = vrot.lane.b32.xlu1 %v4079_v23, %s3635_s2 }
 0x106   : > { %2833 = vmatpush3.bf16.msra.mxu0 %v3163_v11  ;;  %p3540_p0 = pneg %p3539_p13 }
 0x107   : > { %2853 = vmatpush3.bf16.msra.mxu1 %v3164_v12  ;;  %2834 = vmatprep.subr.bf16.mxu0 %v3633_v0 }
 0x108   : > { %2854 = vmatprep.subr.bf16.mxu1 %v3633_v0 }
 0x109   : > { %893 = vrot.lane.b32.xlu1 %v4086_v24, %s3635_s2 }
 0x10a   : > { %2835 = vmatpush3.bf16.msra.mxu0 %v3165_v13 }
 0x10b   : > { %2855 = vmatpush3.bf16.msra.mxu1 %v3166_v14  ;;  %2836 = vmatprep.subr.bf16.mxu0 %v3633_v0 }
 0x10c   : > { %2856 = vmatprep.subr.bf16.mxu1 %v3633_v0 }
 0x10e   : > { %2837 = vmatpush3.bf16.msra.mxu0 %v3167_v15 }
 0x10f   : > { %2857 = vmatpush3.bf16.msra.mxu1 %v3168_v16  ;;  %2838 = vmatprep.subr.bf16.mxu0 %v3633_v0 }
 0x110   : > { %2858 = vmatprep.subr.bf16.mxu1 %v3633_v0 }
 0x112   : > { %2839 = vmatpush3.bf16.msra.mxu0 %v3169_v17 }
 0x113   : > { %2859 = vmatpush3.bf16.msra.mxu1 %v3170_v18  ;;  %2840 = vmatprep.subr.bf16.mxu0 %v3633_v0 }
 0x114   : > { %2860 = vmatprep.subr.bf16.mxu1 %v3633_v0 }
 0x115   : > { %891 = vrot.lane.b32.xlu0 %v4070_v22, %s3635_s2 }
 0x116   : > { %2841 = vmatpush3.bf16.msra.mxu0 %v3171_v19 }
 0x117   : > { %2861 = vmatpush3.bf16.msra.mxu1 %v3172_v20  ;;  %2866 = vmatprep.subr.bf16.mxu0 %v3633_v0 }
 0x118   : > { %2886 = vmatprep.subr.bf16.mxu1 %v3633_v0 }
 0x173   : > { %v914_v47 = vpop.permute.xlu1 %913 }
 0x177   : > { %v916_v48 = vpop.permute.xlu1 %915 }
 0x17b   : > { %v894_v49 = vpop.permute.xlu1 %893 }
 0x188   : > { %v541_v25 = vpop.xlane.xlu0 %540 }
 0x189   : > { %v544_v26 = vmul.f32 0.0078125, %v541_v25 }
 0x18b   : > { %v554_v27 = vadd.f32 1e-05, %v544_v26 }
 0x18c   : > { %v543_v28 = vpop.xlane.xlu0 %542 }
 0x18d   : > { %v545_v29 = vmul.f32 0.0078125, %v543_v28  ;;  %3253 = vrsqrt.f32 %v554_v27 }
 0x18f   : > { %v555_v30 = vadd.f32 1e-05, %v545_v29 }
 0x190   : > { %v892_v60 = vpop.permute.xlu0 %891 }
 0x191   : > { %3255 = vrsqrt.f32 %v555_v30 }
 0x197   : > { %v3254_v34 = vpop.eup %3253 }
 0x198   : > { %v558_v36 = vmul.f32 %v3254_v34, %v552_v32 }
 0x19b   : > { %v3256_v35 = vpop.eup %3255 }
 0x19c   : > { %v559_v37 = vmul.f32 %v3256_v35, %v553_v33 }
 0x19e   : > { %v560_v39 = vpack.c.bf16 %v559_v37, %v558_v36 }
 0x1a0   : > { %2843 = vmatmul.mubr.bf16.vlgmr.msra.gmra.mrb[0].mxu0 %v560_v39  ;;  %2863 = vmatmul.mubr.bf16.vlgmr.msra.gmra.mrb[0].mxu1 %v560_v39 }
 0x1a1   : > { %2867 = vmatpush3.bf16.msra.mxu0 %v3173_v38  ;;  %2882 = vmatprep.mubr.msk.bf16.mxu0 %vm3634_vm0, %v3633_v0 }
 0x1a2   : > { %2868 = vmatprep.subr.bf16.mxu0 %v3633_v0  ;;  %2888 = vmatprep.mubr.msk.bf16.mxu1 %vm3634_vm0, %v3633_v0 }
 0x1a5   : > { %2869 = vmatpush3.bf16.msra.mxu0 %v3174_v40 }
 0x1a6   : > { %2870 = vmatprep.subr.bf16.mxu0 %v3633_v0 }
 0x1a9   : > { %2871 = vmatpush3.bf16.msra.mxu0 %v3175_v41 }
 0x1aa   : > { %2872 = vmatprep.subr.bf16.mxu0 %v3633_v0 }
 0x1ad   : > { %2873 = vmatpush3.bf16.msra.mxu0 %v3176_v42 }
 0x1ae   : > { %2874 = vmatprep.subr.bf16.mxu0 %v3633_v0 }
 0x1b1   : > { %2875 = vmatpush3.bf16.msra.mxu0 %v3177_v43 }
 0x1b2   : > { %2876 = vmatprep.subr.bf16.mxu0 %v3633_v0 }
 0x1b5   : > { %2877 = vmatpush3.bf16.msra.mxu0 %v3178_v44 }
 0x1b6   : > { %2878 = vmatprep.subr.bf16.mxu0 %v3633_v0 }
 0x1b9   : > { %2879 = vmatpush3.bf16.msra.mxu0 %v3179_v45 }
 0x1ba   : > { %2880 = vmatprep.subr.bf16.mxu0 %v3633_v0 }
 0x1bd   : > { %2881 = vmatpush3.bf16.msra.mxu0 %v3180_v46 }
 0x1be   : > { %2910 = vmatprep.subr.bf16.mxu0 %v3633_v0 }
 0x1c0   : > { %2883 = vmatmul.mubr.bf16.vlgmr.msra.gmra.mrb[4].mxu0 %v560_v39 }
 0x1c1   : > { %2912 = vmatprep.mubr.msk.bf16.mxu0 %vm3634_vm0, %v3633_v0 }
 0x273   : > { %v4109_v50 = vpop.f32.mrb[0].mxu0  ;;  %v4111_v51 = vpop.f32.mrb[0].mxu1 }
 0x274   : > { %v2844_v52 = vpop.f32.mrb[1].mxu0  ;;  %v2864_v53 = vpop.f32.mrb[1].mxu1  ;;  %v959_v54 = vmul.f32 %v914_v47, %v4111_v51  ;;  %v897_v62 = vmul.f32 %v892_v60, %v4109_v50  ;;  %v919_v63 = vmul.f32 %v914_v47, %v4109_v50  ;;  %v945_v2 = vmul.f32 %v892_v60, %v4111_v51 }
 0x275   : > { %v4114_v55 = vpop.f32.mrb[2].mxu0  ;;  %v4116_v56 = vpop.f32.mrb[2].mxu1  ;;  %v957_v9 = vmul.f32 %v4070_v22, %v4111_v51  ;;  %v909_v16 = vmul.f32 %v4070_v22, %v4109_v50  ;;  %v943_v30 = vmul.f32 %v4065_v21, %v4111_v51  ;;  %v887_v41 = vmul.f32 %v4065_v21, %v4109_v50 }
 0x276   : > { %963 = vrot.lane.b32.xlu1 %v959_v54, %s3636_s1  ;;  %v2845_v57 = vpop.f32.mrb[3].mxu0  ;;  %v2865_v58 = vpop.f32.mrb[3].mxu1  ;;  %v946_v59 = vmul.f32 %v894_v49, %v4116_v56  ;;  %v960_v61 = vmul.f32 %v916_v48, %v4116_v56  ;;  %v920_v1 = vmul.f32 %v916_v48, %v4114_v55  ;;  %v958_v10 = vmul.f32 %v4086_v24, %v4116_v56 }
 0x277   : > { %v910_v17 = vmul.f32 %v4086_v24, %v4114_v55  ;;  %v898_v18 = vmul.f32 %v894_v49, %v4114_v55  ;;  %v944_v29 = vmul.f32 %v4079_v23, %v4116_v56  ;;  %v888_v43 = vmul.f32 %v4079_v23, %v4114_v55 }
 0x278   : > { %951 = vrot.lane.b32.xlu0 %v946_v59, %s3636_s1 }
 0x27a   : > { %965 = vrot.lane.b32.xlu1 %v960_v61, %s3636_s1 }
 0x27c   : > { %901 = vrot.lane.b32.xlu0 %v897_v62, %s3636_s1 }
 0x27e   : > { %923 = vrot.lane.b32.xlu1 %v919_v63, %s3636_s1 }
 0x282   : > { %925 = vrot.lane.b32.xlu1 %v920_v1, %s3636_s1 }
 0x286   : > { %949 = vrot.lane.b32.xlu1 %v945_v2, %s3636_s1 }
 0x293   : > { %v869_v3 = vpop.f32.mrb[4].mxu0 }
 0x294   : > { %v2884_v4 = vpop.f32.mrb[5].mxu0 }
 0x295   : > { %v872_v5 = vpop.f32.mrb[6].mxu0 }
 0x296   : > { %v4131_v6 = vpack.c.bf16 %v872_v5, %v869_v3  ;;  %v2885_v7 = vpop.f32.mrb[7].mxu0 }
 0x2e8   : > { %v964_v8 = vpop.permute.xlu1 %963 }
 0x2e9   : > { %v969_v12 = vadd.f32 %v964_v8, %v957_v9 }
 0x2ea   : > { %v952_v28 = vpop.permute.xlu0 %951 }
 0x2eb   : > { %v956_v32 = vsub.f32 %v944_v29, %v952_v28 }
 0x2ec   : > { %v966_v11 = vpop.permute.xlu1 %965 }
 0x2ed   : > { %v970_v13 = vadd.f32 %v966_v11, %v958_v10 }
 0x2ee   : > { %v902_v38 = vpop.permute.xlu0 %901 }
 0x2ef   : > { %v3087_v14 = vpack.i.bf16 %v970_v13, %v969_v12  ;;  %v907_v44 = vsub.f32 %v887_v41, %v902_v38 }
 0x2f0   : > { %v924_v15 = vpop.permute.xlu1 %923 }
 0x2f1   : > { %3088 = vrot.lane.b32.xlu1 %v3087_v14, %s3635_s2  ;;  %v929_v20 = vadd.f32 %v924_v15, %v909_v16 }
 0x2f4   : > { %v926_v19 = vpop.permute.xlu1 %925 }
 0x2f5   : > { %v930_v25 = vadd.f32 %v926_v19, %v910_v17  ;;  %903 = vrot.lane.b32.xlu1 %v898_v18, %s3636_s1 }
 0x2f7   : > { %v3092_v26 = vpack.i.bf16 %v930_v25, %v929_v20 }
 0x2f8   : > { %v950_v27 = vpop.permute.xlu1 %949 }
 0x2f9   : > { %1112 = vrot.lane.b32.xlu1 %v4070_v22, %s3637_s17  ;;  %3093 = vrot.lane.b32.xlu0 %v3092_v26, %s3635_s2  ;;  %s3639_s2 = smov 32   ;;  %v955_v33 = vsub.f32 %v943_v30, %v950_v27 }
 0x2fd   : > { %1138 = vrot.lane.b32.xlu1 %v4065_v21, %s3637_s17  ;;  %1114 = vrot.lane.b32.xlu0 %v4086_v24, %s3637_s17 }
 0x301   : > { %1365 = vrot.lane.b32.xlu1 %v4086_v24, %s3638_s5  ;;  %1140 = vrot.lane.b32.xlu0 %v4079_v23, %s3637_s17 }
 0x305   : > { %1389 = vrot.lane.b32.xlu1 %v4065_v21, %s3638_s5  ;;  %1363 = vrot.lane.b32.xlu0 %v4070_v22, %s3638_s5 }
 0x309   : > { %1613 = vrot.lane.b32.xlu1 %v4070_v22, %s3636_s1  ;;  %1391 = vrot.lane.b32.xlu0 %v4079_v23, %s3638_s5 }
 0x30d   : > { %1639 = vrot.lane.b32.xlu1 %v4065_v21, %s3636_s1  ;;  %1615 = vrot.lane.b32.xlu0 %v4086_v24, %s3636_s1 }
 0x311   : > { %1104 = vrot.lane.b32.xlu1 %v4065_v21, %s3639_s2  ;;  %1641 = vrot.lane.b32.xlu0 %v4079_v23, %s3636_s1 }
 0x315   : > { %1130 = vrot.lane.b32.xlu1 %v4070_v22, %s3639_s2  ;;  %1106 = vrot.lane.b32.xlu0 %v4079_v23, %s3639_s2 }
 0x319   : > { %1132 = vrot.lane.b32.xlu0 %v4086_v24, %s3639_s2 }
 0x363   : > { %v3089_v31 = vpop.permute.xlu1 %3088 }
 0x364   : > { %v3091_v34 = vunpack.i.h.bf16 %v3089_v31  ;;  %v3090_v35 = vunpack.i.l.bf16 %v3089_v31 }
 0x366   : > { %v979_v36 = vsel %vm939_vm1, %v955_v33, %v3090_v35  ;;  %v980_v37 = vsel %vm939_vm1, %v956_v32, %v3091_v34 }
 0x367   : > { %v904_v39 = vpop.permute.xlu1 %903  ;;  %v981_v40 = vpack.c.bf16 %v980_v37, %v979_v36 }
 0x368   : > { %v908_v47 = vsub.f32 %v888_v43, %v904_v39 }
 0x369   : > { %v988_v42 = vsel %vm983_vm2, %v981_v40, 0 }
 0x36a   : > { %2887 = vmatpush3.bf16.xpose.msra.mxu1 %v988_v42 }
 0x36b   : > { %v1113_v45 = vpop.permute.xlu1 %1112  ;;  %v3094_v46 = vpop.permute.xlu0 %3093  ;;  %2892 = vmatprep.subr.bf16.mxu1 %v3633_v0 }
 0x36c   : > { %v1177_v48 = vmul.f32 %v1113_v45, %v4111_v51  ;;  %v3096_v49 = vunpack.i.h.bf16 %v3094_v46  ;;  %v3095_v52 = vunpack.i.l.bf16 %v3094_v46  ;;  %v1118_v8 = vmul.f32 %v1113_v45, %v4109_v50 }
 0x36e   : > { %v941_v53 = vsel %vm939_vm1, %v908_v47, %v3096_v49  ;;  %v940_v54 = vsel %vm939_vm1, %v907_v44, %v3095_v52  ;;  %1181 = vrot.lane.b32.xlu1 %v1177_v48, %s3636_s1 }
 0x36f   : > { %v942_v57 = vpack.c.bf16 %v941_v53, %v940_v54  ;;  %v1139_v58 = vpop.permute.xlu1 %1138  ;;  %v1115_v59 = vpop.permute.xlu0 %1114 }
 0x370   : > { %v1191_v60 = vmul.f32 %v1139_v58, %v4111_v51  ;;  %v1178_v61 = vmul.f32 %v1115_v59, %v4116_v56  ;;  %v1144_v9 = vmul.f32 %v1139_v58, %v4109_v50  ;;  %v1119_v10 = vmul.f32 %v1115_v59, %v4114_v55 }
 0x371   : > { %2889 = vmatmul.mubr.msk.bf16.vlgmr.msra.gmra.mrb[4].mxu1 %vm983_vm2, %v942_v57 }
 0x372   : > { %1195 = vrot.lane.b32.xlu1 %v1191_v60, %s3636_s1  ;;  %1183 = vrot.lane.b32.xlu0 %v1178_v61, %s3636_s1 }
 0x373   : > { %2893 = vmatpush3.bf16.msra.mxu1 %v4131_v6  ;;  %v1366_v62 = vpop.permute.xlu1 %1365  ;;  %v1141_v63 = vpop.permute.xlu0 %1140  ;;  %2894 = vmatprep.mubr.msk.bf16.mxu1 %vm3634_vm0, %v3633_v0 }
 0x374   : > { %v4202_v1 = vmul.f32 %v1366_v62, %v4114_v55  ;;  %v1192_v2 = vmul.f32 %v1141_v63, %v4116_v56  ;;  %2898 = vmatprep.subr.bf16.mxu1 %v3633_v0  ;;  %v1145_v11 = vmul.f32 %v1141_v63, %v4114_v55  ;;  %v1429_v13 = vmul.f32 %v1366_v62, %v4116_v56 }
 0x376   : > { %1355 = vrot.lane.b32.xlu1 %v4065_v21, %s3640_s29  ;;  %1197 = vrot.lane.b32.xlu0 %v1192_v2, %s3636_s1 }
 0x377   : > { %v1390_v3 = vpop.permute.xlu1 %1389  ;;  %v1364_v4 = vpop.permute.xlu0 %1363 }
 0x378   : > { %v4210_v5 = vmul.f32 %v1390_v3, %v4109_v50  ;;  %v4213_v7 = vmul.f32 %v1364_v4, %v4109_v50  ;;  %v1428_v12 = vmul.f32 %v1364_v4, %v4111_v51  ;;  %v1442_v14 = vmul.f32 %v1390_v3, %v4111_v51 }
 0x37a   : > { %1381 = vrot.lane.b32.xlu1 %v4070_v22, %s3640_s29  ;;  %1357 = vrot.lane.b32.xlu0 %v4079_v23, %s3640_s29 }
 0x37b   : > { %v4235_v15 = vpop.permute.xlu0 %1391  ;;  %v4237_v16 = vpop.permute.xlu1 %1613 }
 0x37e   : > { %1122 = vrot.lane.b32.xlu1 %v1118_v8, %s3636_s1  ;;  %1383 = vrot.lane.b32.xlu0 %v4086_v24, %s3640_s29 }
 0x37f   : > { %v4239_v17 = vpop.permute.xlu0 %1615  ;;  %v4241_v18 = vpop.permute.xlu1 %1639 }
 0x382   : > { %1148 = vrot.lane.b32.xlu1 %v1144_v9, %s3636_s1  ;;  %1124 = vrot.lane.b32.xlu0 %v1119_v10, %s3636_s1 }
 0x383   : > { %v4243_v19 = vpop.permute.xlu0 %1641  ;;  %v1105_v20 = vpop.permute.xlu1 %1104 }
 0x384   : > { %v1175_v29 = vmul.f32 %v1105_v20, %v4111_v51  ;;  %v1110_v59 = vmul.f32 %v1105_v20, %v4109_v50 }
 0x386   : > { %1150 = vrot.lane.b32.xlu0 %v1145_v11, %s3636_s1  ;;  %1432 = vrot.lane.b32.xlu1 %v1428_v12, %s3636_s1 }
 0x387   : > { %v1107_v25 = vpop.permute.xlu0 %1106  ;;  %v1131_v26 = vpop.permute.xlu1 %1130 }
 0x388   : > { %v1176_v30 = vmul.f32 %v1107_v25, %v4116_v56  ;;  %v1189_v35 = vmul.f32 %v1131_v26, %v4111_v51  ;;  %v1111_v60 = vmul.f32 %v1107_v25, %v4114_v55  ;;  %v1136_v3 = vmul.f32 %v1131_v26, %v4109_v50 }
 0x38a   : > { %1434 = vrot.lane.b32.xlu0 %v1429_v13, %s3636_s1  ;;  %1446 = vrot.lane.b32.xlu1 %v1442_v14, %s3636_s1 }
 0x38b   : > { %v1133_v27 = vpop.permute.xlu0 %1132 }
 0x38c   : > { %v1190_v36 = vmul.f32 %v1133_v27, %v4116_v56  ;;  %v1137_v4 = vmul.f32 %v1133_v27, %v4114_v55 }
 0x3e0   : > { %v1182_v28 = vpop.permute.xlu1 %1181 }
 0x3e1   : > { %v1187_v33 = vsub.f32 %v1175_v29, %v1182_v28  ;;  %v880_v29 = vlaneseq }
 0x3e3   : > { %v4291_v26 = vand.u32 127, %v880_v29 }
 0x3e4   : > { %v1196_v31 = vpop.permute.xlu1 %1195  ;;  %v1184_v32 = vpop.permute.xlu0 %1183 }
 0x3e5   : > { %v1188_v34 = vsub.f32 %v1176_v30, %v1184_v32  ;;  %v4251_v40 = vadd.f32 %v1196_v31, %v1189_v35  ;;  %v4289_v30 = vshrl.u32 %v880_v29, 7 }
 0x3e7   : > { %v4249_v37 = vpack.i.bf16 %v1188_v34, %v1187_v33  ;;  %v4294_v27 = vadd.s32 8, %v4289_v30  ;;  %vm885_vm3 = vcmp.le.s32.totalorder %v4291_v26, %v4289_v30 }
 0x3e8   : > { %v1356_v38 = vpop.permute.xlu1 %1355  ;;  %v1198_v39 = vpop.permute.xlu0 %1197 }
 0x3e9   : > { %v4254_v41 = vmul.f32 %v1356_v38, %v4109_v50  ;;  %v1426_v42 = vmul.f32 %v1356_v38, %v4111_v51  ;;  %v4257_v43 = vadd.f32 %v1198_v39, %v1190_v36  ;;  %vm886_vm4 = vcmp.le.s32.totalorder %v4291_v26, %v4294_v27 }
 0x3eb   : > { %v3102_v44 = vpack.i.bf16 %v4257_v43, %v4251_v40 }
 0x3ec   : > { %v1382_v45 = vpop.permute.xlu1 %1381  ;;  %v1358_v46 = vpop.permute.xlu0 %1357 }
 0x3ed   : > { %v4262_v47 = vmul.f32 %v1382_v45, %v4109_v50  ;;  %v4265_v48 = vmul.f32 %v1382_v45, %v4111_v51  ;;  %v4268_v49 = vmul.f32 %v1358_v46, %v4114_v55  ;;  %v1427_v52 = vmul.f32 %v1358_v46, %v4116_v56 }
 0x3ee   : > { %v1443_v46 = vmul.f32 %v4235_v15, %v4116_v56 }
 0x3f0   : > { %v1123_v53 = vpop.permute.xlu1 %1122  ;;  %v1384_v54 = vpop.permute.xlu0 %1383 }
 0x3f1   : > { %v4272_v57 = vmul.f32 %v1384_v54, %v4114_v55  ;;  %v4275_v58 = vmul.f32 %v1384_v54, %v4116_v56  ;;  %v1128_v63 = vsub.f32 %v1110_v59, %v1123_v53 }
 0x3f4   : > { %v1149_v61 = vpop.permute.xlu1 %1148  ;;  %v1125_v62 = vpop.permute.xlu0 %1124 }
 0x3f5   : > { %v1129_v2 = vsub.f32 %v1111_v60, %v1125_v62  ;;  %v4281_v10 = vadd.f32 %v1149_v61, %v1136_v3 }
 0x3f7   : > { %v3107_v8 = vpack.i.bf16 %v1129_v2, %v1128_v63 }
 0x3f8   : > { %v1151_v9 = vpop.permute.xlu0 %1150  ;;  %v1433_v12 = vpop.permute.xlu1 %1432 }
 0x3f9   : > { %v4283_v11 = vadd.f32 %v1151_v9, %v1137_v4  ;;  %v1438_v20 = vsub.f32 %v1426_v42, %v1433_v12 }
 0x3fb   : > { %v3112_v13 = vpack.i.bf16 %v4283_v11, %v4281_v10 }
 0x3fc   : > { %v1435_v14 = vpop.permute.xlu0 %1434 }
 0x3fd   : > { %v1439_v25 = vsub.f32 %v1427_v52, %v1435_v14 }
 0x3ff   : > { %v4287_v28 = vpack.i.bf16 %v1439_v25, %v1438_v20 }
 0x444   : > { %v1024_v31 = vpop.f32.mrb[4].mxu1 }
 0x445   : > { %v1031_v32 = vmul.f32 0.17677669, %v1024_v31  ;;  %v2890_v33 = vpop.f32.mrb[5].mxu1 }
 0x446   : > { %v1027_v34 = vpop.f32.mrb[6].mxu1 }
 0x447   : > { %v1032_v35 = vmul.f32 0.17677669, %v1027_v34  ;;  %v2891_v36 = vpop.f32.mrb[7].mxu1  ;;  %v1033_v38 = vsel %vm885_vm3, %v1031_v32, -1e+30 }
 0x448   : > { %v1035_v39 = vsel %vm939_vm1, %v1033_v38, -inf }
 0x449   : > { %1036 = vmax.xlane.f32.xlu1 %v1035_v39  ;;  %v1034_v42 = vsel %vm886_vm4, %v1032_v35, -1e+30 }
 0x44a   : > { %v1038_v45 = vsel %vm939_vm1, %v1034_v42, -inf }
 0x44b   : > { %1039 = vmax.xlane.f32.xlu0 %v1038_v45 }
 0x45a   : > { %1605 = vrot.lane.b32.xlu1 %v4065_v21, %s3641_s11  ;;  %v1678_v21 = vmul.f32 %v4237_v16, %v4111_v51 }
 0x45e   : > { %1631 = vrot.lane.b32.xlu1 %v4070_v22, %s3641_s11  ;;  %v1692_v22 = vmul.f32 %v4241_v18, %v4111_v51 }
 0x461   : > { %1448 = vrot.lane.b32.xlu0 %v1443_v46, %s3636_s1 }
 0x462   : > { %1373 = vrot.lane.b32.xlu1 %v4213_v7, %s3636_s1  ;;  %v1645_v7 = vmul.f32 %v4241_v18, %v4109_v50  ;;  %v1447_v18 = vpop.permute.xlu1 %1446 }
 0x463   : > { %v1452_v60 = vadd.f32 %v1447_v18, %v4265_v48 }
 0x465   : > { %1607 = vrot.lane.b32.xlu0 %v4079_v23, %s3641_s11  ;;  %v1396_v23 = vmul.f32 %v4235_v15, %v4114_v55  ;;  %v1620_v15 = vmul.f32 %v4239_v17, %v4114_v55 }
 0x466   : > { %1399 = vrot.lane.b32.xlu1 %v4210_v5, %s3636_s1  ;;  %v1619_v5 = vmul.f32 %v4237_v16, %v4109_v50  ;;  %v1646_v16 = vmul.f32 %v4243_v19, %v4114_v55 }
 0x469   : > { %1633 = vrot.lane.b32.xlu0 %v4086_v24, %s3641_s11  ;;  %v1679_v24 = vmul.f32 %v4239_v17, %v4116_v56 }
 0x46a   : > { %1682 = vrot.lane.b32.xlu1 %v1678_v21, %s3636_s1 }
 0x46d   : > { %1375 = vrot.lane.b32.xlu0 %v4202_v1, %s3636_s1  ;;  %v1693_v1 = vmul.f32 %v4243_v19, %v4116_v56 }
 0x46e   : > { %1696 = vrot.lane.b32.xlu1 %v1692_v22, %s3636_s1 }
 0x471   : > { %1401 = vrot.lane.b32.xlu0 %v1396_v23, %s3636_s1 }
 0x472   : > { %1623 = vrot.lane.b32.xlu1 %v1619_v5, %s3636_s1 }
 0x475   : > { %1684 = vrot.lane.b32.xlu0 %v1679_v24, %s3636_s1 }
 0x476   : > { %1649 = vrot.lane.b32.xlu1 %v1645_v7, %s3636_s1 }
 0x479   : > { %1698 = vrot.lane.b32.xlu0 %v1693_v1, %s3636_s1 }
 0x47a   : > { %3103 = vrot.lane.b32.xlu1 %v3102_v44, %s3636_s1 }
 0x47d   : > { %1625 = vrot.lane.b32.xlu0 %v1620_v15, %s3636_s1 }
 0x47e   : > { %3108 = vrot.lane.b32.xlu1 %v3107_v8, %s3641_s11 }
 0x481   : > { %1651 = vrot.lane.b32.xlu0 %v1646_v16, %s3636_s1 }
 0x485   : > { %3098 = vrot.lane.b32.xlu0 %v4249_v37, %s3641_s11 }
 0x4d6   : > { %v1037_v52 = vpop.xlane.xlu1 %1036 }
 0x4d7   : > { %v1041_v53 = vsub.f32 %v1033_v38, %v1037_v52 }
 0x4d8   : > { %v1040_v40 = vpop.xlane.xlu0 %1039 }
 0x4d9   : > { %v1043_v43 = vmul.f32 1.442695, %v1041_v53  ;;  %v1042_v44 = vsub.f32 %v1034_v42, %v1040_v40 }
 0x4da   : > { %v1606_v54 = vpop.permute.xlu1 %1605 }
 0x4db   : > { %3257 = vpow2.f32 %v1043_v43  ;;  %v1045_v17 = vmul.f32 1.442695, %v1042_v44  ;;  %v1676_v34 = vmul.f32 %v1606_v54, %v4111_v51 }
 0x4dc   : > { %v1449_v59 = vpop.permute.xlu0 %1448 }
 0x4dd   : > { %3259 = vpow2.f32 %v1045_v17  ;;  %v1453_v19 = vadd.f32 %v1449_v59, %v4275_v58 }
 0x4de   : > { %v1632_v61 = vpop.permute.xlu1 %1631 }
 0x4df   : > { %v3122_v62 = vpack.i.bf16 %v1453_v19, %v1452_v60 }
 0x4e0   : > { %v1608_v63 = vpop.permute.xlu0 %1607 }
 0x4e1   : > { %v1677_v35 = vmul.f32 %v1608_v63, %v4116_v56  ;;  %v1612_v23 = vmul.f32 %v1608_v63, %v4114_v55 }
 0x4e2   : > { %v1374_v2 = vpop.permute.xlu1 %1373 }
 0x4e3   : > { %v1379_v58 = vsub.f32 %v4254_v41, %v1374_v2  ;;  %v1690_v41 = vmul.f32 %v1632_v61, %v4111_v51  ;;  %v1637_v51 = vmul.f32 %v1632_v61, %v4109_v50 }
 0x4e4   : > { %v1634_v37 = vpop.permute.xlu0 %1633 }
 0x4e5   : > { %v4361_v3 = vpop.eup %3257 }
 0x4e6   : > { %v1400_v4 = vpop.permute.xlu1 %1399  ;;  %v1047_v8 = vsel %vm939_vm1, %v4361_v3, 0.0 }
 0x4e7   : > { %v4365_v9 = vpop.eup %3259  ;;  %1048 = vadd.xlane.f32.xlu1 %v1047_v8  ;;  %v1405_v31 = vadd.f32 %v1400_v4, %v4262_v47 }
 0x4e8   : > { %v1376_v12 = vpop.permute.xlu0 %1375  ;;  %v1050_v48 = vsel %vm939_vm1, %v4365_v9, 0.0 }
 0x4e9   : > { %v1380_v14 = vsub.f32 %v4268_v49, %v1376_v12  ;;  %1051 = vadd.xlane.f32.xlu0 %v1050_v48  ;;  %v1691_v49 = vmul.f32 %v1634_v37, %v4116_v56  ;;  %v1638_v56 = vmul.f32 %v1634_v37, %v4114_v55 }
 0x4ea   : > { %v1683_v20 = vpop.permute.xlu1 %1682 }
 0x4eb   : > { %v3127_v25 = vpack.i.bf16 %v1380_v14, %v1379_v58  ;;  %v1688_v39 = vsub.f32 %v1676_v34, %v1683_v20 }
 0x4ec   : > { %v1402_v29 = vpop.permute.xlu0 %1401 }
 0x4ed   : > { %v1406_v32 = vadd.f32 %v1402_v29, %v4272_v57  ;;  %v1611_v57 = vmul.f32 %v1606_v54, %v4109_v50 }
 0x4ee   : > { %v1697_v33 = vpop.permute.xlu1 %1696 }
 0x4ef   : > { %v3132_v36 = vpack.i.bf16 %v1406_v32, %v1405_v31  ;;  %v1702_v22 = vadd.f32 %v1697_v33, %v1690_v41 }
 0x4f0   : > { %v1685_v38 = vpop.permute.xlu0 %1684 }
 0x4f1   : > { %v1689_v42 = vsub.f32 %v1677_v35, %v1685_v38 }
 0x4f2   : > { %v1624_v46 = vpop.permute.xlu1 %1623 }
 0x4f3   : > { %v3137_v45 = vpack.i.bf16 %v1689_v42, %v1688_v39  ;;  %v1629_v7 = vsub.f32 %v1611_v57, %v1624_v46 }
 0x4f4   : > { %v1699_v21 = vpop.permute.xlu0 %1698 }
 0x4f5   : > { %v1703_v47 = vadd.f32 %v1699_v21, %v1691_v49 }
 0x4f6   : > { %v1650_v15 = vpop.permute.xlu1 %1649 }
 0x4f7   : > { %v3142_v5 = vpack.i.bf16 %v1703_v47, %v1702_v22  ;;  %v1655_v52 = vadd.f32 %v1650_v15, %v1637_v51 }
 0x4f8   : > { %3118 = vrot.lane.b32.xlu1 %v4287_v28, %s3640_s29  ;;  %v1626_v24 = vpop.permute.xlu0 %1625 }
 0x4f9   : > { %v1630_v1 = vsub.f32 %v1612_v23, %v1626_v24 }
 0x4fa   : > { %v3104_v50 = vpop.permute.xlu1 %3103 }
 0x4fb   : > { %v3147_v16 = vpack.i.bf16 %v1630_v1, %v1629_v7  ;;  %v3106_v17 = vunpack.i.h.bf16 %v3104_v50  ;;  %v3105_v59 = vunpack.i.l.bf16 %v3104_v50 }
 0x4fc   : > { %3128 = vrot.lane.b32.xlu1 %v3127_v25, %s3640_s29  ;;  %v1652_v18 = vpop.permute.xlu0 %1651 }
 0x4fd   : > { %v1656_v53 = vadd.f32 %v1652_v18, %v1638_v56 }
 0x4fe   : > { %v3109_v55 = vpop.permute.xlu1 %3108 }
 0x4ff   : > { %v3152_v40 = vpack.i.bf16 %v1656_v53, %v1655_v52  ;;  %3113 = vrot.lane.b32.xlu0 %v3112_v13, %s3636_s1  ;;  %v3111_v35 = vunpack.i.h.bf16 %v3109_v55 }
 0x500   : > { %3138 = vrot.lane.b32.xlu1 %v3137_v45, %s3639_s2  ;;  %v3099_v28 = vpop.permute.xlu0 %3098  ;;  %v3110_v45 = vunpack.i.l.bf16 %v3109_v55 }
 0x501   : > { %v3101_v11 = vunpack.i.h.bf16 %v3099_v28  ;;  %v3100_v13 = vunpack.i.l.bf16 %v3099_v28 }
 0x503   : > { %3123 = vrot.lane.b32.xlu0 %v3122_v62, %s3638_s5  ;;  %v1220_v19 = vsel %vm939_vm1, %v3101_v11, %v3106_v17  ;;  %v1219_v61 = vsel %vm939_vm1, %v3100_v13, %v3105_v59 }
 0x504   : > { %3148 = vrot.lane.b32.xlu1 %v3147_v16, %s3639_s2  ;;  %v1221_v31 = vpack.c.bf16 %v1220_v19, %v1219_v61 }
 0x506   : > { %v1226_v21 = vsel %vm983_vm2, %v1221_v31, 0 }
 0x507   : > { %3133 = vrot.lane.b32.xlu0 %v3132_v36, %s3638_s5  ;;  %s4610_s5 = sld [smem:[#allocation29_spill]] }
 0x50b   : > { %3143 = vrot.lane.b32.xlu0 %v3142_v5, %s3637_s17 }
 0x50f   : > { %3153 = vrot.lane.b32.xlu0 %v3152_v40, %s3637_s17 }
 0x574   : > { %v1049_v43 = vpop.xlane.xlu1 %1048 }
 0x575   : > { %3261 = vrcp.f32 %v1049_v43 }
 0x576   : > { %v1052_v44 = vpop.xlane.xlu0 %1051 }
 0x577   : > { %3263 = vrcp.f32 %v1052_v44 }
 0x578   : > { %v3119_v10 = vpop.permute.xlu1 %3118 }
 0x579   : > { %v3121_v2 = vunpack.i.h.bf16 %v3119_v10  ;;  %v3120_v37 = vunpack.i.l.bf16 %v3119_v10 }
 0x57a   : > { %v3114_v54 = vpop.permute.xlu0 %3113 }
 0x57b   : > { %v3116_v39 = vunpack.i.h.bf16 %v3114_v54  ;;  %v3115_v42 = vunpack.i.l.bf16 %v3114_v54 }
 0x57c   : > { %v3129_v60 = vpop.permute.xlu1 %3128 }
 0x57d   : > { %v3131_v41 = vunpack.i.h.bf16 %v3129_v60  ;;  %v3130_v49 = vunpack.i.l.bf16 %v3129_v60  ;;  %v1173_v5 = vsel %vm939_vm1, %v3111_v35, %v3116_v39  ;;  %v1172_v24 = vsel %vm939_vm1, %v3110_v45, %v3115_v42 }
 0x57e   : > { %v3124_v62 = vpop.permute.xlu0 %3123  ;;  %v1174_v53 = vpack.c.bf16 %v1173_v5, %v1172_v24 }
 0x57f   : > { %v3262_v63 = vpop.eup %3261  ;;  %v3126_v4 = vunpack.i.h.bf16 %v3124_v62  ;;  %v3125_v8 = vunpack.i.l.bf16 %v3124_v62 }
 0x580   : > { %v1055_v14 = vmul.f32 %v3262_v63, %v4361_v3  ;;  %v3139_v32 = vpop.permute.xlu1 %3138 }
 0x581   : > { %v3264_v12 = vpop.eup %3263  ;;  %v1471_v48 = vsel %vm939_vm1, %v3121_v2, %v3126_v4  ;;  %v1470_v58 = vsel %vm939_vm1, %v3120_v37, %v3125_v8  ;;  %v3141_v46 = vunpack.i.h.bf16 %v3139_v32  ;;  %v3140_v3 = vunpack.i.l.bf16 %v3139_v32 }
 0x582   : > { %v1056_v20 = vmul.f32 %v3264_v12, %v4365_v9  ;;  %v3134_v25 = vpop.permute.xlu0 %3133  ;;  %v1472_v29 = vpack.c.bf16 %v1471_v48, %v1470_v58 }
 0x583   : > { %v3136_v33 = vunpack.i.h.bf16 %v3134_v25  ;;  %v3135_v34 = vunpack.i.l.bf16 %v3134_v25 }
 0x584   : > { %v1477_v36 = vsel %vm983_vm2, %v1472_v29, 0  ;;  %v1057_v38 = vpack.c.bf16 %v1056_v20, %v1055_v14  ;;  %v3149_v51 = vpop.permute.xlu1 %3148 }
 0x585   : > { %2911 = vmatpush3.bf16.xpose.msra.mxu0 %v1477_v36  ;;  %v1424_v22 = vsel %vm939_vm1, %v3131_v41, %v3136_v33  ;;  %v1423_v47 = vsel %vm939_vm1, %v3130_v49, %v3135_v34  ;;  %v3151_v50 = vunpack.i.h.bf16 %v3149_v51  ;;  %v3150_v55 = vunpack.i.l.bf16 %v3149_v51 }
 0x586   : > { %2895 = vmatmul.mubr.msk.bf16.vlgmr.msra.gmra.mrb[8].mxu1 %vm939_vm1, %v1057_v38  ;;  %v3144_v9 = vpop.permute.xlu0 %3143  ;;  %2922 = vmatprep.subr.bf16.mxu0 %v3633_v0  ;;  %v1425_v15 = vpack.c.bf16 %v1424_v22, %v1423_v47 }
 0x587   : > { %v3146_v57 = vunpack.i.h.bf16 %v3144_v9  ;;  %v3145_v23 = vunpack.i.l.bf16 %v3144_v9  ;;  %2899 = vmatpush3.bf16.xpose.msra.mxu1 %v1226_v21  ;;  %2900 = vmatprep.mubr.msk.bf16.mxu1 %vm3634_vm0, %v3633_v0 }
 0x588   : > { %2904 = vmatprep.subr.bf16.mxu1 %v3633_v0 }
 0x589   : > { %v1721_v7 = vsel %vm939_vm1, %v3141_v46, %v3146_v57  ;;  %v1720_v1 = vsel %vm939_vm1, %v3140_v3, %v3145_v23 }
 0x58a   : > { %v3154_v56 = vpop.permute.xlu0 %3153  ;;  %v1722_v16 = vpack.c.bf16 %v1721_v7, %v1720_v1 }
 0x58b   : > { %v3156_v18 = vunpack.i.h.bf16 %v3154_v56  ;;  %v3155_v52 = vunpack.i.l.bf16 %v3154_v56 }
 0x58c   : > { %2913 = vmatmul.mubr.msk.bf16.vlgmr.msra.gmra.mrb[8].mxu0 %vm983_vm2, %v1425_v15  ;;  %v1727_v40 = vsel %vm983_vm2, %v1722_v16, 0 }
 0x58d   : > { %2923 = vmatpush3.bf16.xpose.msra.mxu0 %v1727_v40  ;;  %2924 = vmatprep.mubr.msk.bf16.mxu0 %vm3634_vm0, %v3633_v0  ;;  %v1674_v28 = vsel %vm939_vm1, %v3151_v50, %v3156_v18  ;;  %v1673_v43 = vsel %vm939_vm1, %v3150_v55, %v3155_v52 }
 0x58e   : > { %2901 = vmatmul.mubr.msk.bf16.vlgmr.msra.gmra.mrb[12].mxu1 %vm983_vm2, %v1174_v53  ;;  %2934 = vmatprep.subr.bf16.mxu0 %v3633_v0  ;;  %v1675_v44 = vpack.c.bf16 %v1674_v28, %v1673_v43 }
 0x58f   : > { %2906 = vmatprep.mubr.msk.bf16.mxu1 %vm3634_vm0, %v3633_v0 }
 0x594   : > { %2925 = vmatmul.mubr.msk.bf16.vlgmr.msra.gmra.mrb[12].mxu0 %vm983_vm2, %v1675_v44 }
 0x595   : > { %2950 = vmatprep.mubr.msk.bf16.mxu0 %vm3634_vm0, %v3633_v0 }
 0x659   : > { %v1095_v10 = vpop.f32.mrb[8].mxu1 }
 0x65a   : > { %1102 = vst.msk [vmem:[#allocation2] sm:$0xff] %vm983_vm2, %v1095_v10  ;;  %v2896_v11 = vpop.f32.mrb[9].mxu1 }
 0x65b   : > { %v1098_v13 = vpop.f32.mrb[10].mxu1 }
 0x65c   : > { %1103 = vst.msk [vmem:[#allocation2 + $0x8] sm:$0xff] %vm983_vm2, %v1098_v13  ;;  %v2897_v54 = vpop.f32.mrb[11].mxu1 }
 0x65f   : > { %v1513_v17 = vpop.f32.mrb[8].mxu0 }
 0x660   : > { %v2914_v59 = vpop.f32.mrb[9].mxu0  ;;  %v1520_v37 = vmul.f32 0.17677669, %v1513_v17 }
 0x661   : > { %v1262_v60 = vpop.f32.mrb[12].mxu1  ;;  %v1516_v19 = vpop.f32.mrb[10].mxu0 }
 0x662   : > { %v1269_v61 = vmul.f32 0.17677669, %v1262_v60  ;;  %v1521_v62 = vmul.f32 0.17677669, %v1516_v19  ;;  %v2902_v63 = vpop.f32.mrb[13].mxu1  ;;  %v2915_v2 = vpop.f32.mrb[11].mxu0 }
 0x663   : > { %v1265_v4 = vpop.f32.mrb[14].mxu1  ;;  %v1522_v33 = vsel %vm885_vm3, %v1520_v37, -1e+30 }
 0x664   : > { %v1270_v8 = vmul.f32 0.17677669, %v1265_v4  ;;  %v2903_v12 = vpop.f32.mrb[15].mxu1  ;;  %v1271_v48 = vsel %vm885_vm3, %v1269_v61, -1e+30  ;;  %v1524_v39 = vsel %vm939_vm1, %v1522_v33, -inf }
 0x665   : > { %v1273_v58 = vsel %vm939_vm1, %v1271_v48, -inf  ;;  %v1523_v20 = vsel %vm886_vm4, %v1521_v62, -1e+30 }
 0x666   : > { %1274 = vmax.xlane.f32.xlu1 %v1273_v58  ;;  %v1272_v14 = vsel %vm886_vm4, %v1270_v8, -1e+30  ;;  %v1527_v35 = vsel %vm939_vm1, %v1523_v20, -inf }
 0x667   : > { %v1763_v25 = vpop.f32.mrb[12].mxu0  ;;  %v1276_v29 = vsel %vm939_vm1, %v1272_v14, -inf }
 0x668   : > { %v1770_v31 = vmul.f32 0.17677669, %v1763_v25  ;;  %v2926_v32 = vpop.f32.mrb[13].mxu0  ;;  %1277 = vmax.xlane.f32.xlu0 %v1276_v29 }
 0x669   : > { %v1766_v34 = vpop.f32.mrb[14].mxu0 }
 0x66a   : > { %v1771_v36 = vmul.f32 0.17677669, %v1766_v34  ;;  %v2927_v38 = vpop.f32.mrb[15].mxu0  ;;  %1528 = vmax.xlane.f32.xlu1 %v1527_v35  ;;  %v1772_v41 = vsel %vm885_vm3, %v1770_v31, -1e+30  ;;  %v3181_v34 = vld [vmem:[#allocation11] sm:$0xff]  }
 0x66b   : > { %v1774_v45 = vsel %vm939_vm1, %v1772_v41, -inf  ;;  %2935 = vmatpush3.bf16.msra.mxu0 %v3181_v34  ;;  %v3182_v35 = vld [vmem:[#allocation11 + $0x8] sm:$0xff]   ;;  %v3184_v38 = vld [vmem:[#allocation11 + $0x18] sm:$0xff]  }
 0x66c   : > { %1525 = vmax.xlane.f32.xlu0 %v1524_v39  ;;  %v1773_v42 = vsel %vm886_vm4, %v1771_v36, -1e+30  ;;  %2936 = vmatprep.subr.bf16.mxu0 %v3633_v0  ;;  %v3183_v36 = vld [vmem:[#allocation11 + $0x10] sm:$0xff]   ;;  %v3185_v39 = vld [vmem:[#allocation11 + $0x20] sm:$0xff]  }
 0x66d   : > { %v1777_v49 = vsel %vm939_vm1, %v1773_v42, -inf  ;;  %v3230_v34 = vld [vmem:[#allocation15 + $0x64] ss:$8 sps:$4 sm:$0xff]  }
 0x66e   : > { %1778 = vmax.xlane.f32.xlu1 %v1777_v49 }
 0x66f   : > { %2937 = vmatpush3.bf16.msra.mxu0 %v3182_v35  ;;  %v3225_v35 = vld [vmem:[#allocation12 + $0x60] ss:$8 sps:$4 sm:$0xff]  }
 0x670   : > { %1775 = vmax.xlane.f32.xlu0 %v1774_v45  ;;  %2938 = vmatprep.subr.bf16.mxu0 %v3633_v0 }
 0x673   : > { %2939 = vmatpush3.bf16.msra.mxu0 %v3183_v36  ;;  %v3228_v36 = vld [vmem:[#allocation15 + $0x60] ss:$8 sps:$4 sm:$0xff]  }
 0x674   : > { %2940 = vmatprep.subr.bf16.mxu0 %v3633_v0 }
 0x677   : > { %2941 = vmatpush3.bf16.msra.mxu0 %v3184_v38  ;;  %v3233_v38 = vld [vmem:[#allocation12 + $0x74] ss:$8 sps:$4 sm:$0xff]  }
 0x678   : > { %2942 = vmatprep.subr.bf16.mxu0 %v3633_v0 }
 0x67b   : > { %2943 = vmatpush3.bf16.msra.mxu0 %v3185_v39  ;;  %v3236_v39 = vld [vmem:[#allocation15 + $0x74] ss:$8 sps:$4 sm:$0xff]  }
 0x67c   : > { %2944 = vmatprep.subr.bf16.mxu0 %v3633_v0 }
 0x6f3   : > { %v1275_v46 = vpop.xlane.xlu1 %1274 }
 0x6f4   : > { %v1279_v5 = vsub.f32 %v1271_v48, %v1275_v46  ;;  %v3186_v46 = vld [vmem:[#allocation11 + $0x28] sm:$0xff]  }
 0x6f5   : > { %v1278_v3 = vpop.xlane.xlu0 %1277  ;;  %2945 = vmatpush3.bf16.msra.mxu0 %v3186_v46 }
 0x6f6   : > { %v1280_v22 = vsub.f32 %v1272_v14, %v1278_v3  ;;  %v1281_v51 = vmul.f32 1.442695, %v1279_v5  ;;  %v3187_v3 = vld [vmem:[#allocation11 + $0x30] sm:$0xff]   ;;  %2946 = vmatprep.subr.bf16.mxu0 %v3633_v0 }
 0x6f7   : > { %v1529_v9 = vpop.xlane.xlu1 %1528 }
 0x6f8   : > { %v1531_v21 = vsub.f32 %v1523_v20, %v1529_v9  ;;  %v1283_v26 = vmul.f32 1.442695, %v1280_v22 }
 0x6f9   : > { %v1526_v47 = vpop.xlane.xlu0 %1525  ;;  %2947 = vmatpush3.bf16.msra.mxu0 %v3187_v3 }
 0x6fa   : > { %v1534_v57 = vmul.f32 1.442695, %v1531_v21  ;;  %v1530_v23 = vsub.f32 %v1522_v33, %v1526_v47  ;;  %v3188_v47 = vld [vmem:[#allocation11 + $0x38] sm:$0xff]   ;;  %2948 = vmatprep.subr.bf16.mxu0 %v3633_v0 }
 0x6fb   : > { %v1779_v27 = vpop.xlane.xlu1 %1778 }
 0x6fc   : > { %3265 = vpow2.f32 %v1534_v57  ;;  %v1532_v24 = vmul.f32 1.442695, %v1530_v23  ;;  %v1781_v30 = vsub.f32 %v1773_v42, %v1779_v27 }
 0x6fd   : > { %v1776_v7 = vpop.xlane.xlu0 %1775  ;;  %2949 = vmatpush3.bf16.msra.mxu0 %v3188_v47  ;;  %v2692_v47 = vld [vmem:[%s4609_s16] ss:$0 sm:$0xff] }
 0x6fe   : > { %3267 = vpow2.f32 %v1532_v24  ;;  %v1784_v1 = vmul.f32 1.442695, %v1781_v30  ;;  %v1780_v15 = vsub.f32 %v1772_v41, %v1776_v7 }
 0x700   : > { %3269 = vpow2.f32 %v1784_v1  ;;  %v1782_v56 = vmul.f32 1.442695, %v1780_v15 }
 0x701   : > { %3271 = vpow2.f32 %v1283_v26 }
 0x702   : > { %3273 = vpow2.f32 %v1782_v56 }
 0x703   : > { %3275 = vpow2.f32 %v1281_v51 }
 0x706   : > { %v3266_v16 = vpop.eup %3265 }
 0x707   : > { %v1539_v18 = vsel %vm939_vm1, %v3266_v16, 0.0 }
 0x708   : > { %v3268_v52 = vpop.eup %3267  ;;  %1540 = vadd.xlane.f32.xlu1 %v1539_v18  ;;  %v3189_v18 = vld [vmem:[#allocation12] ss:$8 sps:$4 sm:$0xff]  }
 0x709   : > { %v1536_v53 = vsel %vm939_vm1, %v3268_v52, 0.0 }
 0x70a   : > { %v3270_v40 = vpop.eup %3269  ;;  %1537 = vadd.xlane.f32.xlu0 %v1536_v53  ;;  %v3192_v53 = vld [vmem:[#allocation15] ss:$8 sps:$4 sm:$0xff]  }
 0x70b   : > { %v3272_v50 = vpop.eup %3271  ;;  %v1789_v55 = vsel %vm939_vm1, %v3270_v40, 0.0 }
 0x70c   : > { %v3274_v28 = vpop.eup %3273  ;;  %1790 = vadd.xlane.f32.xlu1 %v1789_v55  ;;  %v1288_v10 = vsel %vm939_vm1, %v3272_v50, 0.0  ;;  %v3200_v55 = vld [vmem:[#allocation15 + $0x14] ss:$8 sps:$4 sm:$0xff]  }
 0x70d   : > { %v1786_v43 = vsel %vm939_vm1, %v3274_v28, 0.0  ;;  %v3276_v44 = vpop.eup %3275 }
 0x70e   : > { %1787 = vadd.xlane.f32.xlu0 %v1786_v43  ;;  %v1285_v11 = vsel %vm939_vm1, %v3276_v44, 0.0  ;;  %v3198_v43 = vld [vmem:[#allocation15 + $0x10] ss:$8 sps:$4 sm:$0xff]  }
 0x710   : > { %1289 = vadd.xlane.f32.xlu1 %v1288_v10  ;;  %v3206_v10 = vld [vmem:[#allocation15 + $0x24] ss:$8 sps:$4 sm:$0xff]  }
 0x712   : > { %1286 = vadd.xlane.f32.xlu0 %v1285_v11  ;;  %v3201_v11 = vld [vmem:[#allocation12 + $0x20] ss:$8 sps:$4 sm:$0xff]  }
 0x721   : > { %1547 = vrot.lane.b32.xlu1 %v4131_v6, %s3640_s29 }
 0x725   : > { %1797 = vrot.lane.b32.xlu1 %v4131_v6, %s3639_s2 }
 0x728   : > { %1297 = vrot.lane.b32.xlu0 %v4131_v6, %s3641_s11 }
 0x795   : > { %v1541_v13 = vpop.xlane.xlu1 %1540 }
 0x797   : > { %v1538_v54 = vpop.xlane.xlu0 %1537 }
 0x799   : > { %v1791_v17 = vpop.xlane.xlu1 %1790 }
 0x79b   : > { %v1788_v59 = vpop.xlane.xlu0 %1787 }
 0x79d   : > { %v1290_v60 = vpop.xlane.xlu1 %1289 }
 0x79e   : > { %3277 = vrcp.f32 %v1290_v60 }
 0x79f   : > { %v1287_v19 = vpop.xlane.xlu0 %1286 }
 0x7a0   : > { %3279 = vrcp.f32 %v1287_v19 }
 0x7a1   : > { %3281 = vrcp.f32 %v1538_v54  ;;  %v1548_v8 = vpop.permute.xlu1 %1547 }
 0x7a2   : > { %3283 = vrcp.f32 %v1541_v13  ;;  %v3204_v13 = vld [vmem:[#allocation15 + $0x20] ss:$8 sps:$4 sm:$0xff]  }
 0x7a3   : > { %v1298_v61 = vpop.permute.xlu0 %1297  ;;  %3285 = vrcp.f32 %v1788_v59 }
 0x7a4   : > { %2905 = vmatpush3.bf16.msra.mxu1 %v1298_v61  ;;  %3287 = vrcp.f32 %v1791_v17  ;;  %v3309_v17 = vld [vmem:[%s4008_s13] sm:$0xff]  ;;  %v3310_v61 = vld [vmem:[%s4008_s13 + $0x8] sm:$0xff] }
 0x7a5   : > { %2916 = vmatprep.subr.bf16.mxu1 %v3633_v0  ;;  %v1798_v25 = vpop.permute.xlu1 %1797 }
 0x7a8   : > { %v3278_v62 = vpop.eup %3277 }
 0x7a9   : > { %v1294_v2 = vmul.f32 %v3278_v62, %v3272_v50  ;;  %v3197_v50 = vld [vmem:[#allocation12 + $0x14] ss:$8 sps:$4 sm:$0xff]  }
 0x7aa   : > { %v3280_v63 = vpop.eup %3279 }
 0x7ab   : > { %v1293_v37 = vmul.f32 %v3280_v63, %v3276_v44  ;;  %v3282_v4 = vpop.eup %3281  ;;  %v3203_v44 = vld [vmem:[#allocation12 + $0x24] ss:$8 sps:$4 sm:$0xff]  }
 0x7ac   : > { %v3284_v12 = vpop.eup %3283  ;;  %v1544_v48 = vmul.f32 %v3282_v4, %v3268_v52  ;;  %v3191_v52 = vld [vmem:[#allocation12 + $0x4] ss:$8 sps:$4 sm:$0xff]   ;;  %v3212_v4 = vld [vmem:[#allocation15 + $0x34] ss:$8 sps:$4 sm:$0xff]  }
 0x7ad   : > { %v1295_v6 = vpack.c.bf16 %v1294_v2, %v1293_v37  ;;  %v1545_v58 = vmul.f32 %v3284_v12, %v3266_v16  ;;  %v3286_v20 = vpop.eup %3285  ;;  %v3210_v12 = vld [vmem:[#allocation15 + $0x30] ss:$8 sps:$4 sm:$0xff]  }
 0x7ae   : > { %v3288_v29 = vpop.eup %3287  ;;  %v1794_v31 = vmul.f32 %v3286_v20, %v3274_v28  ;;  %v3195_v28 = vld [vmem:[#allocation12 + $0x10] ss:$8 sps:$4 sm:$0xff]   ;;  %v3216_v20 = vld [vmem:[#allocation15 + $0x40] ss:$8 sps:$4 sm:$0xff]  }
 0x7af   : > { %2907 = vmatmul.mubr.msk.bf16.vlgmr.msra.gmra.mrb[16].mxu1 %vm939_vm1, %v1295_v6  ;;  %v1546_v14 = vpack.c.bf16 %v1545_v58, %v1544_v48  ;;  %v1795_v32 = vmul.f32 %v3288_v29, %v3270_v40  ;;  %v3194_v40 = vld [vmem:[#allocation15 + $0x4] ss:$8 sps:$4 sm:$0xff]   ;;  %v3209_v6 = vld [vmem:[#allocation12 + $0x34] ss:$8 sps:$4 sm:$0xff]   ;;  %v3219_v29 = vld [vmem:[#allocation12 + $0x50] ss:$8 sps:$4 sm:$0xff]  }
 0x7b0   : > { %2917 = vmatpush3.bf16.msra.mxu1 %v1548_v8  ;;  %2918 = vmatprep.mubr.msk.bf16.mxu1 %vm3634_vm0, %v3633_v0  ;;  %v3207_v8 = vld [vmem:[#allocation12 + $0x30] ss:$8 sps:$4 sm:$0xff]   ;;  %v3215_v48 = vld [vmem:[#allocation12 + $0x44] ss:$8 sps:$4 sm:$0xff]  }
 0x7b1   : > { %2928 = vmatprep.subr.bf16.mxu1 %v3633_v0  ;;  %v1796_v33 = vpack.c.bf16 %v1795_v32, %v1794_v31  ;;  %2224 = vmatprep.subr.bf16.mxu0 %v3194_v40  ;;  %v3218_v58 = vld [vmem:[#allocation15 + $0x44] ss:$8 sps:$4 sm:$0xff]   ;;  %v3222_v31 = vld [vmem:[#allocation15 + $0x50] ss:$8 sps:$4 sm:$0xff]   ;;  %v3224_v32 = vld [vmem:[#allocation15 + $0x54] ss:$8 sps:$4 sm:$0xff]  }
 0x7b2   : > { %v3247_v40 = vld [vmem:[#allocation14 + $0x68] sm:$0xff]  }
 0x7b7   : > { %2919 = vmatmul.mubr.msk.bf16.vlgmr.msra.gmra.mrb[20].mxu1 %vm939_vm1, %v1546_v14  ;;  %v3213_v14 = vld [vmem:[#allocation12 + $0x40] ss:$8 sps:$4 sm:$0xff]  }
 0x7b8   : > { %2929 = vmatpush3.bf16.msra.mxu1 %v1798_v25  ;;  %2930 = vmatprep.mubr.msk.bf16.mxu1 %vm3634_vm0, %v3633_v0  ;;  %v3221_v25 = vld [vmem:[#allocation12 + $0x54] ss:$8 sps:$4 sm:$0xff]  }
 0x7b9   : > { %2085 = vmatprep.subr.bf16.mxu1 %v3191_v52  ;;  %v3245_v52 = vld [vmem:[#allocation14 + $0x60] sm:$0xff]  }
 0x7bf   : > { %2931 = vmatmul.mubr.msk.bf16.vlgmr.msra.gmra.mrb[24].mxu1 %vm939_vm1, %v1796_v33  ;;  %v3227_v33 = vld [vmem:[#allocation12 + $0x64] ss:$8 sps:$4 sm:$0xff]  }
 0x7c0   : > { %2086 = vmatpush1.bf16.msra.mxu1 %v3189_v18  ;;  %v3244_v18 = vld [vmem:[#allocation14 + $0x18] sm:$0xff]  }
 0x7c1   : > { %2087 = vmatprep.subr.bf16.mxu1 %v3197_v50  ;;  %v3248_v50 = vld [vmem:[#allocation14 + $0x28] sm:$0xff]  }
 0x7c4   : > { %2088 = vmatpush1.bf16.msra.mxu1 %v3195_v28  ;;  %v3250_v28 = vld [vmem:[#allocation14 + $0x30] sm:$0xff]  }
 0x7c5   : > { %2089 = vmatprep.subr.bf16.mxu1 %v3203_v44  ;;  %v3252_v44 = vld [vmem:[#allocation14 + $0x38] sm:$0xff]  }
 0x7c8   : > { %2090 = vmatpush1.bf16.msra.mxu1 %v3201_v11 }
 0x7c9   : > { %2091 = vmatprep.subr.bf16.mxu1 %v3209_v6 }
 0x7cc   : > { %2092 = vmatpush1.bf16.msra.mxu1 %v3207_v8 }
 0x7cd   : > { %2093 = vmatprep.subr.bf16.mxu1 %v3215_v48 }
 0x7d0   : > { %2094 = vmatpush1.bf16.msra.mxu1 %v3213_v14 }
 0x7d1   : > { %2095 = vmatprep.subr.bf16.mxu1 %v3221_v25 }
 0x7d4   : > { %2096 = vmatpush1.bf16.msra.mxu1 %v3219_v29 }
 0x7d5   : > { %2097 = vmatprep.subr.bf16.mxu1 %v3227_v33 }
 0x7d8   : > { %2098 = vmatpush1.bf16.msra.mxu1 %v3225_v35 }
 0x7d9   : > { %2099 = vmatprep.subr.bf16.mxu1 %v3233_v38 }
 0x882   : > { %v1337_v42 = vpop.f32.mrb[16].mxu1 }
 0x883   : > { %1346 = vrot.lane.b32.xlu0 %v1337_v42, %s3639_s2  ;;  %v2908_v41 = vpop.f32.mrb[17].mxu1  ;;  %v3642_v42 = vmov 0  }
 0x884   : > { %v1340_v49 = vpop.f32.mrb[18].mxu1  ;;  %2117 = vmatprep.mubr.bf16.mxu1 %v3642_v42  ;;  %v3231_v41 = vld [vmem:[#allocation12 + $0x70] ss:$8 sps:$4 sm:$0xff]  }
 0x885   : > { %1348 = vrot.lane.b32.xlu1 %v1340_v49, %s3639_s2  ;;  %v2909_v45 = vpop.f32.mrb[19].mxu1  ;;  %v3234_v49 = vld [vmem:[#allocation15 + $0x70] ss:$8 sps:$4 sm:$0xff]   ;;  %2100 = vmatpush1.bf16.msra.mxu1 %v3231_v41  ;;  %s4510_s2 = scalar_lea.hbm %s4610_s5, %s2751_s28 }
 0x88a   : > { %v1587_v9 = vpop.f32.mrb[20].mxu1 }
 0x88b   : > { %1596 = vrot.lane.b32.xlu0 %v1587_v9, %s3640_s29  ;;  %v2920_v21 = vpop.f32.mrb[21].mxu1 }
 0x88c   : > { %v1590_v22 = vpop.f32.mrb[22].mxu1 }
 0x88d   : > { %1598 = vrot.lane.b32.xlu1 %v1590_v22, %s3640_s29  ;;  %v2921_v57 = vpop.f32.mrb[23].mxu1  ;;  %s3643_s29 = smov [#allocation17]  }
 0x892   : > { %v1837_v23 = vpop.f32.mrb[24].mxu1 }
 0x893   : > { %1846 = vrot.lane.b32.xlu0 %v1837_v23, %s3641_s11  ;;  %v2932_v27 = vpop.f32.mrb[25].mxu1 }
 0x894   : > { %v1840_v5 = vpop.f32.mrb[26].mxu1 }
 0x895   : > { %1848 = vrot.lane.b32.xlu1 %v1840_v5, %s3641_s11  ;;  %v2933_v24 = vpop.f32.mrb[27].mxu1  ;;  %s3541_s11 = sshll.u32 %s3643_s29, 4  ;;  %s3542_s11 = int_to_ptr.vmem [resolvable:$false] %s3541_s11 }
 0x896   : > { %s3543_s13 = scalar_lea.vmem %s3542_s11, 512  ;;  %p3544_p2 = scmp.lt.s32.totalorder %s4505_s18, %s3542_s11 }
 0x897   : > { %p3545_p8 = scmp.lt.s32.totalorder %s3543_s13, %s3537_s27 }
 0x899   : > { %p3546_p6 = por %p3545_p8, %p3544_p2 }
 0x89b   : > { %p3547_p10 = pnand %p3546_p6, %p3540_p0 }
 0x8f5   : > { %v1347_v30 = vpop.permute.xlu0 %1346 }
 0x8f6   : > { %1353 = vst.msk [vmem:[#allocation2] sm:$0xff] %vm1352_vm5, %v1347_v30 }
 0x8f7   : > { %v1349_v26 = vpop.permute.xlu1 %1348 }
 0x8f8   : > { %1354 = vst.msk [vmem:[#allocation2 + $0x8] sm:$0xff] %vm1352_vm5, %v1349_v26 }
 0x8fd   : > { %v1597_v7 = vpop.permute.xlu0 %1596 }
 0x8fe   : > { %1603 = vst.msk [vmem:[#allocation2] sm:$0xff] %vm1602_vm6, %v1597_v7  ;;  %v3237_v7 = vld [vmem:[#allocation14 + $0x40] sm:$0xff]  }
 0x8ff   : > { %v1599_v1 = vpop.permute.xlu1 %1598  ;;  %2804 = vmatprep.subr.bf16.mxu1 %v3237_v7 }
 0x900   : > { %1604 = vst.msk [vmem:[#allocation2 + $0x8] sm:$0xff] %vm1602_vm6, %v1599_v1  ;;  %v3238_v1 = vld [vmem:[#allocation14] sm:$0xff]  }
 0x905   : > { %v1847_v0 = vpop.permute.xlu0 %1846 }
 0x906   : > { %1853 = vst.msk [vmem:[#allocation2] sm:$0xff] %vm1852_vm7, %v1847_v0  ;;  %v3239_v0 = vld [vmem:[#allocation14 + $0x48] sm:$0xff]  }
 0x907   : > { %v1849_v15 = vpop.permute.xlu1 %1848 }
 0x908   : > { %1854 = vst.msk [vmem:[#allocation2 + $0x8] sm:$0xff] %vm1852_vm7, %v1849_v15  ;;  %v3240_v15 = vld [vmem:[#allocation14 + $0x8] sm:$0xff]  }
 0x90d   : > { %v1855_v51 = vld [vmem:[#allocation2] sm:$0xff] }
 0x90f   : > { %v1856_v56 = vld [vmem:[#allocation2 + $0x8] sm:$0xff] }
 0x910   : > { %v1857_v16 = vpack.c.bf16 %v1856_v56, %v1855_v51  ;;  %v3241_v51 = vld [vmem:[#allocation14 + $0x50] sm:$0xff]  }
 0x911   : > { %v3242_v56 = vld [vmem:[#allocation14 + $0x10] sm:$0xff]  }
 0x912   : > { %2951 = vmatmul.mubr.bf16.vlgmr.msra.gmra.mrb[16].mxu0 %v1857_v16  ;;  %v3243_v16 = vld [vmem:[#allocation14 + $0x58] sm:$0xff]  }
 0x913   : > { %2225 = vmatpush1.bf16.msra.mxu0 %v3192_v53  ;;  %2256 = vmatprep.mubr.bf16.mxu0 %v3642_v42  ;;  %v3246_v53 = vld [vmem:[#allocation14 + $0x20] sm:$0xff]  }
 0x914   : > { %2226 = vmatprep.subr.bf16.mxu0 %v3200_v55  ;;  %v3249_v55 = vld [vmem:[#allocation14 + $0x70] sm:$0xff]  }
 0x917   : > { %2227 = vmatpush1.bf16.msra.mxu0 %v3198_v43  ;;  %v3251_v43 = vld [vmem:[#allocation14 + $0x78] sm:$0xff]  }
 0x918   : > { %2228 = vmatprep.subr.bf16.mxu0 %v3206_v10 }
 0x91b   : > { %2229 = vmatpush1.bf16.msra.mxu0 %v3204_v13 }
 0x91c   : > { %2230 = vmatprep.subr.bf16.mxu0 %v3212_v4 }
 0x91f   : > { %2231 = vmatpush1.bf16.msra.mxu0 %v3210_v12 }
 0x920   : > { %2232 = vmatprep.subr.bf16.mxu0 %v3218_v58 }
 0x923   : > { %2233 = vmatpush1.bf16.msra.mxu0 %v3216_v20 }
 0x924   : > { %2234 = vmatprep.subr.bf16.mxu0 %v3224_v32 }
 0x927   : > { %2235 = vmatpush1.bf16.msra.mxu0 %v3222_v31 }
 0x928   : > { %2236 = vmatprep.subr.bf16.mxu0 %v3230_v34 }
 0x92b   : > { %2237 = vmatpush1.bf16.msra.mxu0 %v3228_v36 }
 0x92c   : > { %2238 = vmatprep.subr.bf16.mxu0 %v3236_v39 }
 0x92f   : > { %2239 = vmatpush1.bf16.msra.mxu0 %v3234_v49 }
 0x9e5   : > { %v1956_v54 = vpop.f32.mrb[16].mxu0 }
 0x9e6   : > { %v4487_v59 = vadd.f32 %v3309_v17, %v1956_v54  ;;  %v2952_v60 = vpop.f32.mrb[17].mxu0 }
 0x9e7   : > { %v1959_v19 = vpop.f32.mrb[18].mxu0 }
 0x9e8   : > { %v4490_v62 = vadd.f32 %v3310_v61, %v1959_v19  ;;  %v2953_v63 = vpop.f32.mrb[19].mxu0  ;;  %v1966_v2 = vmul.f32 %v4487_v59, %v4487_v59  ;;  %v1980_v23 = vmul.f32 %v2692_v47, %v4487_v59 }
 0x9ea   : > { %1968 = vadd.xlane.f32.xlu0 %v1966_v2  ;;  %v1967_v37 = vmul.f32 %v4490_v62, %v4490_v62  ;;  %v1981_v27 = vmul.f32 %v2692_v47, %v4490_v62 }
 0x9ec   : > { %1970 = vadd.xlane.f32.xlu1 %v1967_v37 }
 0xa77   : > { %v1969_v45 = vpop.xlane.xlu0 %1968 }
 0xa78   : > { %v1972_v46 = vmul.f32 0.0078125, %v1969_v45 }
 0xa79   : > { %v1971_v3 = vpop.xlane.xlu1 %1970 }
 0xa7a   : > { %v1982_v9 = vadd.f32 1e-05, %v1972_v46  ;;  %v1973_v21 = vmul.f32 0.0078125, %v1971_v3 }
 0xa7c   : > { %3289 = vrsqrt.f32 %v1982_v9  ;;  %v1983_v22 = vadd.f32 1e-05, %v1973_v21 }
 0xa7e   : > { %3291 = vrsqrt.f32 %v1983_v22 }
 0xa86   : > { %v3290_v57 = vpop.eup %3289 }
 0xa87   : > { %v1986_v24 = vmul.f32 %v3290_v57, %v1980_v23 }
 0xa88   : > { %v3292_v5 = vpop.eup %3291 }
 0xa89   : > { %v1987_v30 = vmul.f32 %v3292_v5, %v1981_v27 }
 0xa8b   : > { %v1988_v26 = vpack.c.bf16 %v1987_v30, %v1986_v24 }
 0xa8d   : > { %2118 = vmatmul.mubr.bf16.vlgmr.msra.gmra.mrb[28].mxu1 %v1988_v26  ;;  %2257 = vmatmul.mubr.bf16.vlgmr.msra.gmra.mrb[20].mxu0 %v1988_v26 }
 0xa8e   : > { %2805 = vmatpush3.bf16.msra.mxu1 %v3238_v1 }
 0xa8f   : > { %2806 = vmatprep.subr.bf16.mxu1 %v3239_v0 }
 0xa92   : > { %2807 = vmatpush3.bf16.msra.mxu1 %v3240_v15 }
 0xa93   : > { %2808 = vmatprep.subr.bf16.mxu1 %v3241_v51 }
 0xa96   : > { %2809 = vmatpush3.bf16.msra.mxu1 %v3242_v56 }
 0xa97   : > { %2810 = vmatprep.subr.bf16.mxu1 %v3243_v16 }
 0xa9a   : > { %2811 = vmatpush3.bf16.msra.mxu1 %v3244_v18 }
 0xa9b   : > { %2812 = vmatprep.subr.bf16.mxu1 %v3245_v52 }
 0xa9e   : > { %2813 = vmatpush3.bf16.msra.mxu1 %v3246_v53 }
 0xa9f   : > { %2814 = vmatprep.subr.bf16.mxu1 %v3247_v40 }
 0xaa2   : > { %2815 = vmatpush3.bf16.msra.mxu1 %v3248_v50 }
 0xaa3   : > { %2816 = vmatprep.subr.bf16.mxu1 %v3249_v55 }
 0xaa6   : > { %2817 = vmatpush3.bf16.msra.mxu1 %v3250_v28 }
 0xaa7   : > { %2818 = vmatprep.subr.bf16.mxu1 %v3251_v43 }
 0xaaa   : > { %2819 = vmatpush3.bf16.msra.mxu1 %v3252_v44 }
 0xb60   : > { %v2119_v10 = vpop.f32.mrb[28].mxu1  ;;  %v2258_v11 = vpop.f32.mrb[20].mxu0 }
 0xb61   : > { %v2725_v13 = vmul.f32 -1.442695, %v2119_v10  ;;  %v2121_v54 = vpop.f32.mrb[29].mxu1  ;;  %v2260_v17 = vpop.f32.mrb[21].mxu0 }
 0xb62   : > { %v2726_v60 = vmul.f32 -1.442695, %v2121_v54  ;;  %v2123_v19 = vpop.f32.mrb[30].mxu1  ;;  %v2262_v61 = vpop.f32.mrb[22].mxu0 }
 0xb63   : > { %3293 = vpow2.f32 %v2725_v13  ;;  %v2727_v63 = vmul.f32 -1.442695, %v2123_v19  ;;  %v2125_v2 = vpop.f32.mrb[31].mxu1  ;;  %v2264_v37 = vpop.f32.mrb[23].mxu0 }
 0xb64   : > { %3295 = vpow2.f32 %v2726_v60  ;;  %v2728_v6 = vmul.f32 -1.442695, %v2125_v2 }
 0xb65   : > { %3297 = vpow2.f32 %v2727_v63 }
 0xb66   : > { %3299 = vpow2.f32 %v2728_v6 }
 0xb6d   : > { %v3294_v4 = vpop.eup %3293 }
 0xb6e   : > { %v3296_v8 = vpop.eup %3295  ;;  %v2279_v12 = vadd.f32 1.0, %v3294_v4 }
 0xb6f   : > { %v3298_v48 = vpop.eup %3297  ;;  %v2280_v58 = vadd.f32 1.0, %v3296_v8 }
 0xb70   : > { %v3300_v14 = vpop.eup %3299  ;;  %3301 = vrcp.f32 %v2279_v12  ;;  %v2281_v20 = vadd.f32 1.0, %v3298_v48 }
 0xb71   : > { %3303 = vrcp.f32 %v2280_v58  ;;  %v2282_v25 = vadd.f32 1.0, %v3300_v14 }
 0xb72   : > { %3305 = vrcp.f32 %v2281_v20 }
 0xb73   : > { %3307 = vrcp.f32 %v2282_v25 }
 0xb7a   : > { %v3302_v29 = vpop.eup %3301 }
 0xb7b   : > { %v3304_v31 = vpop.eup %3303  ;;  %v2291_v32 = vmul.f32 %v3302_v29, %v2119_v10 }
 0xb7c   : > { %v3306_v33 = vpop.eup %3305  ;;  %v2292_v34 = vmul.f32 %v3304_v31, %v2121_v54 }
 0xb7d   : > { %v3308_v35 = vpop.eup %3307  ;;  %v2295_v36 = vmul.f32 %v2291_v32, %v2258_v11  ;;  %v2293_v38 = vmul.f32 %v3306_v33, %v2123_v19 }
 0xb7e   : > { %v2296_v39 = vmul.f32 %v2292_v34, %v2260_v17  ;;  %v2294_v42 = vmul.f32 %v3308_v35, %v2125_v2 }
 0xb7f   : > { %v2297_v41 = vmul.f32 %v2293_v38, %v2262_v61 }
 0xb80   : > { %v2298_v49 = vmul.f32 %v2294_v42, %v2264_v37 }
 0xb81   : > { %v2299_v45 = vpack.c.bf16 %v2297_v41, %v2295_v36 }
 0xb82   : > { %v2300_v46 = vpack.c.bf16 %v2298_v49, %v2296_v39 }
 0xb84   : > { %2461 = vmatprep.mubr.bf16.mxu1 %v2300_v46 }
 0xb85   : > { %2462 = vmatmul.mubr.bf16.vlgmr.msra.gmra.mrb[32].mxu1 %v2299_v45 }
 0xc58   : > { %v2820_v3 = vpop.f32.mrb[32].mxu1 }
 0xc59   : > { %v2821_v9 = vpop.f32.mrb[33].mxu1 }
 0xc5a   : > { %v2822_v21 = vadd.f32 %v2821_v9, %v2820_v3  ;;  %v2823_v22 = vpop.f32.mrb[34].mxu1 }
 0xc5b   : > { %v2824_v47 = vpop.f32.mrb[35].mxu1 }
 0xc5c   : > { %v2470_v57 = vadd.f32 %v2822_v21, %v4487_v59  ;;  %v2825_v23 = vadd.f32 %v2824_v47, %v2823_v22 }
 0xc5e   : > { %2472 = vst [vmem:[%s533_s15] sm:$0xff] %v2470_v57  ;;  %v2471_v27 = vadd.f32 %v2825_v23, %v4490_v62 }
 0xc60   : > { %2473 = vst [vmem:[%s533_s15 + $0x8] sm:$0xff] %v2471_v27 }
 0xc61   : > { %3550 = shalt.err (!%p3547_p10)
}
 0xc62   : > { %s3551_s14 = scalar_lea.hbm %s4510_s2, 256  ;;  %s3555_s28 = scalar_lea.hbm %s4610_s5, 512 }
 0xc63   : > { %p3552_p11 = scmp.ne.s32.totalorder %s4510_s2, %s3551_s14  ;;  %p3556_p9 = scmp.lt.u32.totalorder %s4510_s2, %s4610_s5 }
 0xc64   : > { %p3557_p7 = scmp.lt.u32.totalorder %s3555_s28, %s3551_s14  ;;  %p3559_p12 = scmp.lt.u32.totalorder %s3551_s14, %s4510_s2 }
 0xc65   : > { %p3553_p3 = pnand %p3552_p11, %p4611_p1 }
 0xc66   : > { %p3558_p4 = por %p3557_p7, %p3556_p9 }
 0xc67   : > { %p3554_p5 = pneg %p3553_p3 }
 0xc68   : > { %p3560_p13 = por %p3559_p12, %p3558_p4 }
 0xc6a   : > { %p3561_p0 = pnand %p3560_p13, %p3554_p5 }
 0xc6c   : > { %3564 = shalt.err (!%p3561_p0)
}
 0xc6d   : > { %s3644_s27 = smov 128   ;;  %s3645_s29 = smov 8  }
 0xc6e   : > { %2984 = dma.vmem_to_hbm [thread:$0]  (%p4611_p1), %s4505_s18, 256, %s4510_s2, %s2475_s30, %s3644_s27, %s3644_s27, %s3645_s29  }
 0xc6f PF: > { %s2503_s11 = sand.u32 1, %s3607_s21   ;;  %p4612_p2 = scmp.ne.s32.totalorder %s4596_s20, 0 }
 0xc70   : > { %p4613_p8 = scmp.ge.s32.totalorder %s3619_s24, 2  ;;  %s2504_s13 = scalar_lea.sflag [#allocation5], %s2503_s11 }
 0xc72   : > { %p3013_p6 = pnand %p4613_p8, %p4612_p2 }
 0xc74   : > { %3602 = dma.done.wait (!%p3013_p6), %s2504_s13, 256  }
 0xc75   : > { %3604 = vsyncadd (!%p3013_p6), %s2504_s13, 4294967040  ;;  %p29_p10 = scmp.ge.s32.totalorder %s3926_s25, 4   ;;  %s4614_s21 = smov %s3611_s22 }
 0xc76   : > { %s4615_s22 = smov %s3615_s23  ;;  %s4616_s23 = smov %s3938_s3 }
 0xc77   : > { %s4617_s24 = smov %s3926_s25  ;;  %31 = sbr.rel (!%p29_p10) target bundleno = 16 (0x10), region = 141 }
 0xc7e   :  { %2509 = vsyncpa [#allocation4], 1 }
 0xc7f   :  { %2511 = vsyncpa [#allocation4 + $0x1], 1 }
 0xc80   :  { %2512 = vsyncpa [#allocation7], 1 }
 0xc81   :  { %2513 = vsyncpa [#allocation10], 1 }
 0xc82   :  { %2514 = vsyncpa [#allocation13], 1 }
 0xc83   :  { %2515 = vsyncpa [#allocation16], 1 }
 0xc84   :  { %2516 = vsyncpa [#allocation5], 1 }
 0xc85   :  { %2518 = vsyncpa [#allocation5 + $0x1], 1 }

</bundles_post_ra>
